<compile_context>
chip_gen: v7x
topology: tpu7x:2x2x1
jax: 0.10.0
libtpu: 0.0.40
codegen_flags: <defaults>
</compile_context>

<pallas_src>
import jax
import jax.numpy as jnp
from jax.experimental import pallas as pl
from jax.experimental.pallas import tpu as pltpu

HIDDEN = 400           # logical hidden width (module spec)
HIDDEN_PAD = 512       # padded hidden width (multiple of 128/256)
N_OUT = 10
OUT_PAD = 128          # lane-dense padded output width
MIN_BATCH_TILE = 128
MAX_BATCH_TILE = 512


def _mlp_kernel(x_ref, w1_ref, b1_ref, w2_ref, b2_ref, w3_ref, b3_ref, y_ref):
    # Fused hot path: fc1 -> ReLU -> fc2 -> ReLU -> (dropout=identity) -> last
    x = x_ref[...].astype(jnp.bfloat16)                                  # (TB, D) bf16 (cast in-kernel)
    h1 = jnp.dot(x, w1_ref[...], preferred_element_type=jnp.float32)     # (TB, 512) f32
    h1 = jnp.maximum(h1 + b1_ref[...], 0.0)
    h2 = jnp.dot(h1.astype(jnp.bfloat16), w2_ref[...],
                 preferred_element_type=jnp.float32)                     # (TB, 512) f32
    h2 = jnp.maximum(h2 + b2_ref[...], 0.0)
    # dropout(0.5) in eval mode == identity
    y = jnp.dot(h2.astype(jnp.bfloat16), w3_ref[...],
                preferred_element_type=jnp.float32)                      # (TB, 128) f32
    y_ref[...] = y + b3_ref[...]


def prepare_params(params):
    """One-time prep: bf16 weights, zero-padded hidden (400->512) and output
    (10->128) dims. Padded bias entries are ZERO so ReLU keeps padded hidden
    columns at exactly 0 and they contribute nothing downstream."""
    w1, b1, w2, b2, w3, b3 = params
    hp = HIDDEN_PAD - HIDDEN
    op = OUT_PAD - N_OUT
    w1p = jnp.pad(w1, ((0, 0), (0, hp))).astype(jnp.bfloat16)   # (D, 512)
    b1p = jnp.pad(b1, ((0, 0), (0, hp)))                        # (1, 512) f32
    w2p = jnp.pad(w2, ((0, hp), (0, hp))).astype(jnp.bfloat16)  # (512, 512)
    b2p = jnp.pad(b2, ((0, 0), (0, hp)))                        # (1, 512) f32
    w3p = jnp.pad(w3, ((0, hp), (0, op))).astype(jnp.bfloat16)  # (512, 128)
    b3p = jnp.pad(b3, ((0, 0), (0, op)))                        # (1, 128) f32
    return (w1p, b1p, w2p, b2p, w3p, b3p)


def _pick_batch_tile(batch):
    # Largest power-of-two tile in [128, 512] that doesn't over-pad tiny
    # batches; >=2 grid steps appear naturally once B exceeds the tile,
    # letting v7x's two TensorCores split the "parallel" batch axis.
    tile = MIN_BATCH_TILE
    while tile < MAX_BATCH_TILE and batch >= 2 * tile:
        tile *= 2
    return tile


@jax.jit
def mlp_forward(x_nchw, prepared_params):
    """x_nchw: (B, C, H, W) float32. prepared_params: from prepare_params().
    Returns (B, 10) float32."""
    w1, b1, w2, b2, w3, b3 = prepared_params
    B = x_nchw.shape[0]
    D = w1.shape[0]
    H = w1.shape[1]          # HIDDEN_PAD

    # glue: flatten (no cast -- kernel casts to bf16) + pad batch to tile
    x_flat = x_nchw.reshape(B, -1)
    tb = _pick_batch_tile(B)
    Bp = pl.cdiv(B, tb) * tb
    if Bp != B:
        x_flat = jnp.pad(x_flat, ((0, Bp - B), (0, 0)))

    grid = (Bp // tb,)

    flops = 2 * Bp * (D * H + H * H + H * OUT_PAD)
    bytes_accessed = (x_flat.size * 4 + w1.size * 2 + w2.size * 2 + w3.size * 2
                      + b1.size * 4 + b2.size * 4 + b3.size * 4 + Bp * OUT_PAD * 4)

    out = pl.pallas_call(
        _mlp_kernel,
        out_shape=jax.ShapeDtypeStruct((Bp, OUT_PAD), jnp.float32),
        grid_spec=pltpu.PrefetchScalarGridSpec(
            num_scalar_prefetch=0,
            grid=grid,
            in_specs=[
                # batch tile of activations (f32, cast in kernel)
                pl.BlockSpec((tb, D), lambda i: (i, 0)),
                # weights/biases: constant block index -> VMEM-resident across steps
                pl.BlockSpec((D, H), lambda i: (0, 0)),
                pl.BlockSpec((1, H), lambda i: (0, 0)),
                pl.BlockSpec((H, H), lambda i: (0, 0)),
                pl.BlockSpec((1, H), lambda i: (0, 0)),
                pl.BlockSpec((H, OUT_PAD), lambda i: (0, 0)),
                pl.BlockSpec((1, OUT_PAD), lambda i: (0, 0)),
            ],
            out_specs=pl.BlockSpec((tb, OUT_PAD), lambda i: (i, 0)),
        ),
        compiler_params=pltpu.CompilerParams(
            dimension_semantics=("parallel",),
        ),
        cost_estimate=pl.CostEstimate(
            flops=flops, bytes_accessed=bytes_accessed, transcendentals=0),
    )(x_flat, w1, b1, w2, b2, w3, b3)

    return out[:B, :N_OUT]


def init_params(key, in_dim, hidden=HIDDEN, n_out=N_OUT):
    # Deterministic init mimicking nn.Linear's U(-1/sqrt(fan_in), 1/sqrt(fan_in)).
    ks = jax.random.split(key, 6)

    def lin(kw, kb, fan_in, fan_out):
        bound = 1.0 / jnp.sqrt(jnp.float32(fan_in))
        w = jax.random.uniform(kw, (fan_in, fan_out), jnp.float32, -bound, bound)
        b = jax.random.uniform(kb, (1, fan_out), jnp.float32, -bound, bound)
        return w, b

    w1, b1 = lin(ks[0], ks[1], in_dim, hidden)
    w2, b2 = lin(ks[2], ks[3], hidden, hidden)
    w3, b3 = lin(ks[4], ks[5], hidden, n_out)
    return (w1, b1, w2, b2, w3, b3)


if __name__ == "__main__":
    key = jax.random.PRNGKey(0)
    k_x, k_p = jax.random.split(key)

    # inputsize = (ncha=4, size=16, size=16) -> flattened dim = 1024
    B, C, H, W = 2, 4, 16, 16
    x = jax.random.normal(k_x, (B, C, H, W), jnp.float32)

    params = init_params(k_p, C * H * W, hidden=HIDDEN, n_out=N_OUT)
    # One-time prep (bf16 cast + padding) -- NOT in the per-call forward path.
    prepared = jax.block_until_ready(prepare_params(params))

    y = mlp_forward(x, prepared)
    jax.block_until_ready(y)

    # Sanity check against a plain-JAX reference using the same bf16-weight
    # math as the kernel (bf16 x / weights, f32 accumulation, unpadded dims).
    w1, b1, w2, b2, w3, b3 = params
    h = x.reshape(B, -1).astype(jnp.bfloat16)
    h = jnp.dot(h, w1.astype(jnp.bfloat16), preferred_element_type=jnp.float32) + b1
    h = jnp.maximum(h, 0.0).astype(jnp.bfloat16)
    h = jnp.dot(h, w2.astype(jnp.bfloat16), preferred_element_type=jnp.float32) + b2
    h = jnp.maximum(h, 0.0).astype(jnp.bfloat16)
    y_ref = jnp.dot(h, w3.astype(jnp.bfloat16), preferred_element_type=jnp.float32) + b3

    assert y.shape == (B, N_OUT)
    assert jnp.allclose(y, y_ref, atol=1e-2, rtol=1e-2)

    print("KERNEL_OK")
</pallas_src>

<mosaic_0001>
module attributes {stable_mosaic.version = 11 : i64} {
  func.func @_mlp_kernel(%arg0: i32, %arg1: memref<128x1024xf32, #tpu.memory_space<vmem>>, %arg2: memref<1024x512xbf16, #tpu.memory_space<vmem>>, %arg3: memref<1x512xf32, #tpu.memory_space<vmem>>, %arg4: memref<512x512xbf16, #tpu.memory_space<vmem>>, %arg5: memref<1x512xf32, #tpu.memory_space<vmem>>, %arg6: memref<512x128xbf16, #tpu.memory_space<vmem>>, %arg7: memref<1x128xf32, #tpu.memory_space<vmem>>, %arg8: memref<128x128xf32, #tpu.memory_space<vmem>>) attributes {dimension_semantics = [#tpu.dimension_semantics<parallel>], iteration_bounds = array<i64: 1>, scalar_prefetch = 0 : i64, scratch_operands = 0 : i64, tpu.core_type = #tpu.core_type<tc>, window_params = [{transform_indices = @transform_0, window_bounds = array<i64: 128, 1024>}, {pipeline_mode = #tpu.pipeline_mode<synchronous>, transform_indices = @transform_1, window_bounds = array<i64: 1024, 512>}, {pipeline_mode = #tpu.pipeline_mode<synchronous>, transform_indices = @transform_2, window_bounds = array<i64: 1, 512>}, {pipeline_mode = #tpu.pipeline_mode<synchronous>, transform_indices = @transform_3, window_bounds = array<i64: 512, 512>}, {pipeline_mode = #tpu.pipeline_mode<synchronous>, transform_indices = @transform_4, window_bounds = array<i64: 1, 512>}, {pipeline_mode = #tpu.pipeline_mode<synchronous>, transform_indices = @transform_5, window_bounds = array<i64: 512, 128>}, {pipeline_mode = #tpu.pipeline_mode<synchronous>, transform_indices = @transform_6, window_bounds = array<i64: 1, 128>}, {transform_indices = @transform_7, window_bounds = array<i64: 128, 128>}]} {
    %c0 = arith.constant 0 : index
    %c0_0 = arith.constant 0 : index
    %0 = vector.load %arg1[%c0, %c0_0] : memref<128x1024xf32, #tpu.memory_space<vmem>>, vector<128x1024xf32>
    %1 = arith.truncf %0 : vector<128x1024xf32> to vector<128x1024xbf16>
    %c0_1 = arith.constant 0 : index
    %c0_2 = arith.constant 0 : index
    %2 = vector.load %arg2[%c0_1, %c0_2] : memref<1024x512xbf16, #tpu.memory_space<vmem>>, vector<1024x512xbf16>
    %cst = arith.constant dense<0.000000e+00> : vector<128x512xf32>
    %3 = tpu.matmul %1, %2, %cst {dimension_numbers = #tpu.dot_dimension_numbers<[1], [0], [0], [1], [0, 0, 1, 1], [], []>} : vector<128x1024xbf16>, vector<1024x512xbf16>, vector<128x512xf32> -> vector<128x512xf32>
    %c0_3 = arith.constant 0 : index
    %c0_4 = arith.constant 0 : index
    %4 = vector.load %arg3[%c0_3, %c0_4] : memref<1x512xf32, #tpu.memory_space<vmem>>, vector<1x512xf32>
    %5 = vector.broadcast %4 : vector<1x512xf32> to vector<128x512xf32>
    %6 = arith.addf %3, %5 : vector<128x512xf32>
    %cst_5 = arith.constant 0.000000e+00 : f32
    %7 = vector.broadcast %cst_5 : f32 to vector<128x512xf32>
    %8 = arith.maximumf %6, %7 : vector<128x512xf32>
    %9 = arith.truncf %8 : vector<128x512xf32> to vector<128x512xbf16>
    %c0_6 = arith.constant 0 : index
    %c0_7 = arith.constant 0 : index
    %10 = vector.load %arg4[%c0_6, %c0_7] : memref<512x512xbf16, #tpu.memory_space<vmem>>, vector<512x512xbf16>
    %cst_8 = arith.constant dense<0.000000e+00> : vector<128x512xf32>
    %11 = tpu.matmul %9, %10, %cst_8 {dimension_numbers = #tpu.dot_dimension_numbers<[1], [0], [0], [1], [0, 0, 1, 1], [], []>} : vector<128x512xbf16>, vector<512x512xbf16>, vector<128x512xf32> -> vector<128x512xf32>
    %c0_9 = arith.constant 0 : index
    %c0_10 = arith.constant 0 : index
    %12 = vector.load %arg5[%c0_9, %c0_10] : memref<1x512xf32, #tpu.memory_space<vmem>>, vector<1x512xf32>
    %13 = vector.broadcast %12 : vector<1x512xf32> to vector<128x512xf32>
    %14 = arith.addf %11, %13 : vector<128x512xf32>
    %cst_11 = arith.constant 0.000000e+00 : f32
    %15 = vector.broadcast %cst_11 : f32 to vector<128x512xf32>
    %16 = arith.maximumf %14, %15 : vector<128x512xf32>
    %17 = arith.truncf %16 : vector<128x512xf32> to vector<128x512xbf16>
    %c0_12 = arith.constant 0 : index
    %c0_13 = arith.constant 0 : index
    %18 = vector.load %arg6[%c0_12, %c0_13] : memref<512x128xbf16, #tpu.memory_space<vmem>>, vector<512x128xbf16>
    %cst_14 = arith.constant dense<0.000000e+00> : vector<128x128xf32>
    %19 = tpu.matmul %17, %18, %cst_14 {dimension_numbers = #tpu.dot_dimension_numbers<[1], [0], [0], [1], [0, 0, 1, 1], [], []>} : vector<128x512xbf16>, vector<512x128xbf16>, vector<128x128xf32> -> vector<128x128xf32>
    %c0_15 = arith.constant 0 : index
    %c0_16 = arith.constant 0 : index
    %20 = vector.load %arg7[%c0_15, %c0_16] : memref<1x128xf32, #tpu.memory_space<vmem>>, vector<1x128xf32>
    %21 = vector.broadcast %20 : vector<1x128xf32> to vector<128x128xf32>
    %22 = arith.addf %19, %21 : vector<128x128xf32>
    %c0_17 = arith.constant 0 : index
    %c0_18 = arith.constant 0 : index
    %23 = vector.load %arg8[%c0_17, %c0_18] : memref<128x128xf32, #tpu.memory_space<vmem>>, vector<128x128xf32>
    tpu.vector_store %arg8[%c0_17, %c0_18], %22 {strides = array<i32>} : memref<128x128xf32, #tpu.memory_space<vmem>>, vector<128x128xf32>,
    return
  }
  func.func @transform_0(%arg0: i32) -> (i32, i32) {
    %c0_i32 = arith.constant 0 : i32
    %c0_i32_0 = arith.constant 0 : i32
    return %arg0, %c0_i32 : i32, i32
  }
  func.func @transform_1(%arg0: i32) -> (i32, i32) {
    %c0_i32 = arith.constant 0 : i32
    %c0_i32_0 = arith.constant 0 : i32
    %c0_i32_1 = arith.constant 0 : i32
    return %c0_i32, %c0_i32_0 : i32, i32
  }
  func.func @transform_2(%arg0: i32) -> (i32, i32) {
    %c0_i32 = arith.constant 0 : i32
    %c0_i32_0 = arith.constant 0 : i32
    %c0_i32_1 = arith.constant 0 : i32
    return %c0_i32, %c0_i32_0 : i32, i32
  }
  func.func @transform_3(%arg0: i32) -> (i32, i32) {
    %c0_i32 = arith.constant 0 : i32
    %c0_i32_0 = arith.constant 0 : i32
    %c0_i32_1 = arith.constant 0 : i32
    return %c0_i32, %c0_i32_0 : i32, i32
  }
  func.func @transform_4(%arg0: i32) -> (i32, i32) {
    %c0_i32 = arith.constant 0 : i32
    %c0_i32_0 = arith.constant 0 : i32
    %c0_i32_1 = arith.constant 0 : i32
    return %c0_i32, %c0_i32_0 : i32, i32
  }
  func.func @transform_5(%arg0: i32) -> (i32, i32) {
    %c0_i32 = arith.constant 0 : i32
    %c0_i32_0 = arith.constant 0 : i32
    %c0_i32_1 = arith.constant 0 : i32
    return %c0_i32, %c0_i32_0 : i32, i32
  }
  func.func @transform_6(%arg0: i32) -> (i32, i32) {
    %c0_i32 = arith.constant 0 : i32
    %c0_i32_0 = arith.constant 0 : i32
    %c0_i32_1 = arith.constant 0 : i32
    return %c0_i32, %c0_i32_0 : i32, i32
  }
  func.func @transform_7(%arg0: i32) -> (i32, i32) {
    %c0_i32 = arith.constant 0 : i32
    %c0_i32_0 = arith.constant 0 : i32
    return %arg0, %c0_i32 : i32, i32
  }
}

</mosaic_0001>

<bundles_post_ra>
// kernel: mlp_forward.1
= control target key start
LH: loop header
LB: loop body
LE: loop exit
PB: predicated region body
PF: predicated region fallthrough
CT: control target
= control target key end

     0   :  { %12 = vsyncpa [#allocation3], 0  ;;  %s7356_s0 = inlined_call_operand.vmem [shape: f32[128,1024], index: 0, kind: input, shape index: {}]   ;;  %s7357_s1 = inlined_call_operand.hbm [shape: bf16[1024,512], index: 1, kind: input, shape index: {}]   ;;  %s7358_s2 = inlined_call_operand.vmem [shape: f32[1,512], index: 2, kind: input, shape index: {}]   ;;  %s7359_s3 = inlined_call_operand.vmem [shape: bf16[512,512], index: 3, kind: input, shape index: {}]   ;;  %s7360_s4 = inlined_call_operand.vmem [shape: f32[1,512], index: 4, kind: input, shape index: {}]   ;;  %s7361_s5 = inlined_call_operand.hbm [shape: bf16[512,128], index: 5, kind: input, shape index: {}]   ;;  %s7362_s6 = inlined_call_operand.vmem [shape: f32[1,128], index: 6, kind: input, shape index: {}]   ;;  %s7363_s7 = inlined_call_operand.vmem [shape: f32[128,128], index: 7, kind: output, shape index: {}]  }
   0x1   :  { %13 = vsyncpa [#allocation5], 0  ;;  %s6213_s24 = smov [#allocation2]   ;;  %s6165_s28 = scalar_lea.hbm %s7357_s1, 32768 }
   0x2   :  { %s21_s25 = sshll.u32 %s6213_s24, 4  ;;  %p6166_p0 = scmp.ne.s32.totalorder %s7357_s1, %s6165_s28  ;;  %s22_s25 = int_to_ptr.vmem [resolvable:$true] %s21_s25 }
   0x3   :  { %p6169_p1 = scmp.lt.u32.totalorder %s6165_s28, %s7357_s1 }
   0x5   :  { %p6171_p2 = pnand %p6169_p1, %p6166_p0 }
   0x7   :  { %6174 = shalt.err (!%p6171_p2)
}
   0x8   :  { %s6175_s10 = scalar_lea.vmem %s22_s25, 32768  ;;  %p6180_p4 = scmp.lt.s32.totalorder %s22_s25, %s22_s25 }
   0x9   :  { %p6176_p3 = scmp.ne.s32.totalorder %s22_s25, %s6175_s10  ;;  %p6181_p5 = scmp.lt.s32.totalorder %s6175_s10, %s6175_s10 }
   0xb   :  { %p6182_p6 = por %p6181_p5, %p6180_p4 }
   0xd   :  { %p6183_p7 = pnand %p6182_p6, %p6176_p3 }
   0xf   :  { %6186 = shalt.err (!%p6183_p7)
}
  0x10   :  { %s6214_s11 = smov 256   ;;  %s6215_s12 = smov 16  }
  0x11   :  { %27 = dma.hbm_to_vmem [thread:$0]  %s7357_s1, 32768, %s22_s25, [#allocation3], %s6214_s11, %s6214_s11, %s6215_s12  }
  0x12   :  { %s6216_s15 = smov [#allocation4]   ;;  %s6187_s19 = scalar_lea.hbm %s7361_s5, 4096 }
  0x13   :  { %s39_s16 = sshll.u32 %s6216_s15, 4  ;;  %p6188_p8 = scmp.ne.s32.totalorder %s7361_s5, %s6187_s19  ;;  %s40_s16 = int_to_ptr.vmem [resolvable:$true] %s39_s16 }
  0x14   :  { %p6191_p9 = scmp.lt.u32.totalorder %s6187_s19, %s7361_s5 }
  0x16   :  { %p6193_p10 = pnand %p6191_p9, %p6188_p8 }
  0x18   :  { %6196 = shalt.err (!%p6193_p10)
}
  0x19   :  { %s6197_s24 = scalar_lea.vmem %s40_s16, 4096  ;;  %p6202_p12 = scmp.lt.s32.totalorder %s40_s16, %s40_s16 }
  0x1a   :  { %p6198_p11 = scmp.ne.s32.totalorder %s40_s16, %s6197_s24  ;;  %p6203_p13 = scmp.lt.s32.totalorder %s6197_s24, %s6197_s24 }
  0x1c   :  { %p6204_p0 = por %p6203_p13, %p6202_p12 }
  0x1e   :  { %p6205_p1 = pnand %p6204_p0, %p6198_p11 }
  0x20   :  { %6208 = shalt.err (!%p6205_p1)
}
  0x21   :  { %s6217_s1 = smov 64   ;;  %s6218_s25 = smov 4  }
  0x22   :  { %45 = dma.hbm_to_vmem [thread:$0]  %s7361_s5, 4096, %s40_s16, [#allocation5], %s6217_s1, %s6217_s1, %s6218_s25  }
  0x23   :  { %6209 = dma.done.wait [#allocation3], 32768  }
  0x24   :  { %6210 = vsyncadd [#allocation3], 4294934528 }
  0x25   :  { %6211 = dma.done.wait [#allocation5], 4096  }
  0x26   :  { %6212 = vsyncadd [#allocation5], 4294963200  ;;  %v5557_v0 = vld [vmem:[#allocation2 + $0x4] ss:$16 sps:$4 sm:$0xff]   ;;  %v5559_v1 = vld [vmem:[#allocation2 + $0xc] ss:$16 sps:$4 sm:$0xff]  }
  0x27   :  { %1805 = vmatprep.subr.bf16.mxu0 %v5557_v0  ;;  %v5561_v2 = vld [vmem:[#allocation2] ss:$16 sps:$4 sm:$0xff]   ;;  %v5562_v3 = vld [vmem:[#allocation2 + $0x8] ss:$16 sps:$4 sm:$0xff]   ;;  %2257 = vmatprep.subr.bf16.mxu1 %v5559_v1  ;;  %v5563_v4 = vld [vmem:[#allocation2 + $0x24] ss:$16 sps:$4 sm:$0xff]  }
  0x28   :  { %1806 = vmatpush1.bf16.msra.mxu0 %v5561_v2  ;;  %2258 = vmatpush1.bf16.msra.mxu1 %v5562_v3  ;;  %v5565_v5 = vld [vmem:[#allocation2 + $0x2c] ss:$16 sps:$4 sm:$0xff]   ;;  %v5567_v6 = vld [vmem:[#allocation2 + $0x20] ss:$16 sps:$4 sm:$0xff]   ;;  %v5568_v7 = vld [vmem:[#allocation2 + $0x28] ss:$16 sps:$4 sm:$0xff]  }
  0x29   :  { %1807 = vmatprep.subr.bf16.mxu0 %v5563_v4  ;;  %2259 = vmatprep.subr.bf16.mxu1 %v5565_v5  ;;  %v5569_v8 = vld [vmem:[#allocation2 + $0x44] ss:$16 sps:$4 sm:$0xff]   ;;  %v5571_v9 = vld [vmem:[#allocation2 + $0x4c] ss:$16 sps:$4 sm:$0xff]   ;;  %v5573_v10 = vld [vmem:[#allocation2 + $0x40] ss:$16 sps:$4 sm:$0xff]  }
  0x2a   :  { %v5574_v11 = vld [vmem:[#allocation2 + $0x48] ss:$16 sps:$4 sm:$0xff]   ;;  %v5575_v12 = vld [vmem:[#allocation2 + $0x64] ss:$16 sps:$4 sm:$0xff]   ;;  %v5577_v13 = vld [vmem:[#allocation2 + $0x6c] ss:$16 sps:$4 sm:$0xff]  }
  0x2b   :  { %v5579_v14 = vld [vmem:[#allocation2 + $0x60] ss:$16 sps:$4 sm:$0xff]   ;;  %v5580_v15 = vld [vmem:[#allocation2 + $0x68] ss:$16 sps:$4 sm:$0xff]   ;;  %v5581_v16 = vld [vmem:[#allocation2 + $0x84] ss:$16 sps:$4 sm:$0xff]  }
  0x2c   :  { %1808 = vmatpush1.bf16.msra.mxu0 %v5567_v6  ;;  %2260 = vmatpush1.bf16.msra.mxu1 %v5568_v7  ;;  %v5583_v17 = vld [vmem:[#allocation2 + $0x8c] ss:$16 sps:$4 sm:$0xff]   ;;  %v5585_v18 = vld [vmem:[#allocation2 + $0x80] ss:$16 sps:$4 sm:$0xff]   ;;  %v5586_v19 = vld [vmem:[#allocation2 + $0x88] ss:$16 sps:$4 sm:$0xff]  }
  0x2d   :  { %1809 = vmatprep.subr.bf16.mxu0 %v5569_v8  ;;  %2261 = vmatprep.subr.bf16.mxu1 %v5571_v9  ;;  %v5587_v20 = vld [vmem:[#allocation2 + $0xa4] ss:$16 sps:$4 sm:$0xff]   ;;  %v5589_v21 = vld [vmem:[#allocation2 + $0xac] ss:$16 sps:$4 sm:$0xff]   ;;  %v5591_v22 = vld [vmem:[#allocation2 + $0xa0] ss:$16 sps:$4 sm:$0xff]  }
  0x2e   :  { %v5592_v23 = vld [vmem:[#allocation2 + $0xa8] ss:$16 sps:$4 sm:$0xff]   ;;  %v5593_v24 = vld [vmem:[#allocation2 + $0xc4] ss:$16 sps:$4 sm:$0xff]   ;;  %v5595_v25 = vld [vmem:[#allocation2 + $0xcc] ss:$16 sps:$4 sm:$0xff]  }
  0x2f   :  { %v5597_v26 = vld [vmem:[#allocation2 + $0xc0] ss:$16 sps:$4 sm:$0xff]   ;;  %v5598_v27 = vld [vmem:[#allocation2 + $0xc8] ss:$16 sps:$4 sm:$0xff]   ;;  %v5599_v28 = vld [vmem:[#allocation2 + $0xe4] ss:$16 sps:$4 sm:$0xff]  }
  0x30   :  { %1810 = vmatpush1.bf16.msra.mxu0 %v5573_v10  ;;  %2262 = vmatpush1.bf16.msra.mxu1 %v5574_v11  ;;  %v5601_v29 = vld [vmem:[#allocation2 + $0xec] ss:$16 sps:$4 sm:$0xff]   ;;  %v5603_v30 = vld [vmem:[#allocation2 + $0xe0] ss:$16 sps:$4 sm:$0xff]   ;;  %v5604_v31 = vld [vmem:[#allocation2 + $0xe8] ss:$16 sps:$4 sm:$0xff]  }
  0x31   :  { %1811 = vmatprep.subr.bf16.mxu0 %v5575_v12  ;;  %2263 = vmatprep.subr.bf16.mxu1 %v5577_v13  ;;  %v5605_v32 = vld [vmem:[#allocation2 + $0x104] ss:$16 sps:$4 sm:$0xff]   ;;  %v5607_v33 = vld [vmem:[#allocation2 + $0x10c] ss:$16 sps:$4 sm:$0xff]   ;;  %v5609_v34 = vld [vmem:[#allocation2 + $0x100] ss:$16 sps:$4 sm:$0xff]  }
  0x32   :  { %v5610_v35 = vld [vmem:[#allocation2 + $0x108] ss:$16 sps:$4 sm:$0xff]   ;;  %v5611_v36 = vld [vmem:[#allocation2 + $0x124] ss:$16 sps:$4 sm:$0xff]   ;;  %v5613_v37 = vld [vmem:[#allocation2 + $0x12c] ss:$16 sps:$4 sm:$0xff]  }
  0x33   :  { %v5615_v38 = vld [vmem:[#allocation2 + $0x120] ss:$16 sps:$4 sm:$0xff]   ;;  %v5616_v39 = vld [vmem:[#allocation2 + $0x128] ss:$16 sps:$4 sm:$0xff]   ;;  %v5617_v40 = vld [vmem:[#allocation2 + $0x144] ss:$16 sps:$4 sm:$0xff]  }
  0x34   :  { %1812 = vmatpush1.bf16.msra.mxu0 %v5579_v14  ;;  %2264 = vmatpush1.bf16.msra.mxu1 %v5580_v15  ;;  %v5619_v41 = vld [vmem:[#allocation2 + $0x14c] ss:$16 sps:$4 sm:$0xff]   ;;  %v5621_v42 = vld [vmem:[#allocation2 + $0x140] ss:$16 sps:$4 sm:$0xff]   ;;  %v5622_v43 = vld [vmem:[#allocation2 + $0x148] ss:$16 sps:$4 sm:$0xff]  }
  0x35   :  { %1813 = vmatprep.subr.bf16.mxu0 %v5581_v16  ;;  %2265 = vmatprep.subr.bf16.mxu1 %v5583_v17  ;;  %v5623_v44 = vld [vmem:[#allocation2 + $0x164] ss:$16 sps:$4 sm:$0xff]   ;;  %v5625_v45 = vld [vmem:[#allocation2 + $0x16c] ss:$16 sps:$4 sm:$0xff]   ;;  %v5627_v47 = vld [vmem:[#allocation2 + $0x160] ss:$16 sps:$4 sm:$0xff]  }
  0x36   :  { %v56_v46 = vld [vmem:[%s7356_s0 + $0x8] sm:$0xff]  ;;  %v5629_v50 = vld [vmem:[#allocation2 + $0x184] ss:$16 sps:$4 sm:$0xff]   ;;  %v5633_v53 = vld [vmem:[#allocation2 + $0x180] ss:$16 sps:$4 sm:$0xff]  }
  0x37   :  { %v5628_v48 = vld [vmem:[#allocation2 + $0x168] ss:$16 sps:$4 sm:$0xff]   ;;  %v5631_v52 = vld [vmem:[#allocation2 + $0x18c] ss:$16 sps:$4 sm:$0xff]   ;;  %v5635_v55 = vld [vmem:[#allocation2 + $0x1a4] ss:$16 sps:$4 sm:$0xff]  }
  0x38   :  { %1814 = vmatpush1.bf16.msra.mxu0 %v5585_v18  ;;  %2266 = vmatpush1.bf16.msra.mxu1 %v5586_v19  ;;  %v64_v49 = vld [vmem:[%s7356_s0 + $0x48] sm:$0xff]  ;;  %v5639_v57 = vld [vmem:[#allocation2 + $0x1a0] ss:$16 sps:$4 sm:$0xff]   ;;  %v5641_v59 = vld [vmem:[#allocation2 + $0x1c4] ss:$16 sps:$4 sm:$0xff]  }
  0x39   :  { %1815 = vmatprep.subr.bf16.mxu0 %v5587_v20  ;;  %2267 = vmatprep.subr.bf16.mxu1 %v5589_v21  ;;  %v184_v51 = vpack.c.bf16 %v64_v49, %v56_v46  ;;  %v5634_v54 = vld [vmem:[#allocation2 + $0x188] ss:$16 sps:$4 sm:$0xff]   ;;  %v5637_v56 = vld [vmem:[#allocation2 + $0x1ac] ss:$16 sps:$4 sm:$0xff]   ;;  %v5645_v61 = vld [vmem:[#allocation2 + $0x1c0] ss:$16 sps:$4 sm:$0xff]  }
  0x3a   :  { %v5640_v58 = vld [vmem:[#allocation2 + $0x1a8] ss:$16 sps:$4 sm:$0xff]   ;;  %v5643_v60 = vld [vmem:[#allocation2 + $0x1cc] ss:$16 sps:$4 sm:$0xff]   ;;  %v5647_v63 = vld [vmem:[#allocation2 + $0x1e4] ss:$16 sps:$4 sm:$0xff]  }
  0x3b   :  { %1837 = vmatprep.mubr.bf16.mxu0 %v184_v51  ;;  %2289 = vmatprep.mubr.bf16.mxu1 %v184_v51  ;;  %v5646_v62 = vld [vmem:[#allocation2 + $0x1c8] ss:$16 sps:$4 sm:$0xff]   ;;  %v5649_v0 = vld [vmem:[#allocation2 + $0x1ec] ss:$16 sps:$4 sm:$0xff]   ;;  %v5651_v1 = vld [vmem:[#allocation2 + $0x1e0] ss:$16 sps:$4 sm:$0xff]  }
  0x3c   :  { %1816 = vmatpush1.bf16.msra.mxu0 %v5591_v22  ;;  %2268 = vmatpush1.bf16.msra.mxu1 %v5592_v23  ;;  %v5652_v2 = vld [vmem:[#allocation2 + $0x1e8] ss:$16 sps:$4 sm:$0xff]   ;;  %v55_v3 = vld [vmem:[%s7356_s0] sm:$0xff]  ;;  %v5658_v6 = vld [vmem:[#allocation2 + $0x20c] ss:$16 sps:$4 sm:$0xff]  }
  0x3d   :  { %1817 = vmatprep.subr.bf16.mxu0 %v5593_v24  ;;  %2269 = vmatprep.subr.bf16.mxu1 %v5595_v25  ;;  %v63_v4 = vld [vmem:[%s7356_s0 + $0x40] sm:$0xff]  ;;  %v5656_v9 = vld [vmem:[#allocation2 + $0x208] ss:$16 sps:$4 sm:$0xff]   ;;  %v5664_v13 = vld [vmem:[#allocation2 + $0x22c] ss:$16 sps:$4 sm:$0xff]  }
  0x3e   :  { %v5655_v5 = vld [vmem:[#allocation2 + $0x204] ss:$16 sps:$4 sm:$0xff]   ;;  %v5653_v7 = vld [vmem:[#allocation2 + $0x200] ss:$16 sps:$4 sm:$0xff]   ;;  %v183_v8 = vpack.c.bf16 %v63_v4, %v55_v3  ;;  %v72_v10 = vld [vmem:[%s7356_s0 + $0x88] sm:$0xff] }
  0x3f   :  { %v80_v11 = vld [vmem:[%s7356_s0 + $0xc8] sm:$0xff]  ;;  %v5661_v12 = vld [vmem:[#allocation2 + $0x224] ss:$16 sps:$4 sm:$0xff]   ;;  %v5659_v14 = vld [vmem:[#allocation2 + $0x220] ss:$16 sps:$4 sm:$0xff]  }
  0x40   :  { %1818 = vmatpush1.bf16.msra.mxu0 %v5597_v26  ;;  %2270 = vmatpush1.bf16.msra.mxu1 %v5598_v27  ;;  %v192_v15 = vpack.c.bf16 %v80_v11, %v72_v10  ;;  %v5662_v16 = vld [vmem:[#allocation2 + $0x228] ss:$16 sps:$4 sm:$0xff]   ;;  %v71_v17 = vld [vmem:[%s7356_s0 + $0x80] sm:$0xff]  ;;  %v5670_v20 = vld [vmem:[#allocation2 + $0x24c] ss:$16 sps:$4 sm:$0xff]  }
  0x41   :  { %1819 = vmatprep.subr.bf16.mxu0 %v5599_v28  ;;  %2271 = vmatprep.subr.bf16.mxu1 %v5601_v29  ;;  %v79_v18 = vld [vmem:[%s7356_s0 + $0xc0] sm:$0xff]  ;;  %v5668_v22 = vld [vmem:[#allocation2 + $0x248] ss:$16 sps:$4 sm:$0xff]   ;;  %v5676_v27 = vld [vmem:[#allocation2 + $0x26c] ss:$16 sps:$4 sm:$0xff]  }
  0x42   :  { %v5667_v19 = vld [vmem:[#allocation2 + $0x244] ss:$16 sps:$4 sm:$0xff]   ;;  %v5665_v21 = vld [vmem:[#allocation2 + $0x240] ss:$16 sps:$4 sm:$0xff]   ;;  %v191_v23 = vpack.c.bf16 %v79_v18, %v71_v17  ;;  %v88_v24 = vld [vmem:[%s7356_s0 + $0x108] sm:$0xff] }
  0x43   :  { %v96_v25 = vld [vmem:[%s7356_s0 + $0x148] sm:$0xff]  ;;  %v5673_v26 = vld [vmem:[#allocation2 + $0x264] ss:$16 sps:$4 sm:$0xff]   ;;  %v5671_v29 = vld [vmem:[#allocation2 + $0x260] ss:$16 sps:$4 sm:$0xff]  }
  0x44   :  { %1820 = vmatpush1.bf16.msra.mxu0 %v5603_v30  ;;  %2272 = vmatpush1.bf16.msra.mxu1 %v5604_v31  ;;  %v200_v28 = vpack.c.bf16 %v96_v25, %v88_v24  ;;  %v5674_v30 = vld [vmem:[#allocation2 + $0x268] ss:$16 sps:$4 sm:$0xff]   ;;  %v87_v31 = vld [vmem:[%s7356_s0 + $0x100] sm:$0xff] }
  0x45   :  { %1821 = vmatprep.subr.bf16.mxu0 %v5605_v32  ;;  %2273 = vmatprep.subr.bf16.mxu1 %v5607_v33  ;;  %v95_v32 = vld [vmem:[%s7356_s0 + $0x140] sm:$0xff]  ;;  %v120_v51 = vld [vmem:[%s7356_s0 + $0x208] sm:$0xff] }
  0x46   :  { %v5679_v33 = vld [vmem:[#allocation2 + $0x284] ss:$16 sps:$4 sm:$0xff]   ;;  %v5689_v49 = vld [vmem:[#allocation2 + $0x2c0] ss:$16 sps:$4 sm:$0xff]   ;;  %v5704_v3 = vld [vmem:[#allocation2 + $0x308] ss:$16 sps:$4 sm:$0xff]  }
  0x47   :  { %v111_v46 = vld [vmem:[%s7356_s0 + $0x1c0] sm:$0xff]  ;;  %v160_v17 = vld [vmem:[%s7356_s0 + $0x348] sm:$0xff] }
  0x48   :  { %1822 = vmatpush1.bf16.msra.mxu0 %v5609_v34  ;;  %2274 = vmatpush1.bf16.msra.mxu1 %v5610_v35  ;;  %v5682_v34 = vld [vmem:[#allocation2 + $0x28c] ss:$16 sps:$4 sm:$0xff]   ;;  %v5677_v35 = vld [vmem:[#allocation2 + $0x280] ss:$16 sps:$4 sm:$0xff]   ;;  %v5709_v4 = vld [vmem:[#allocation2 + $0x324] ss:$16 sps:$4 sm:$0xff]  }
  0x49   :  { %1823 = vmatprep.subr.bf16.mxu0 %v5611_v36  ;;  %2275 = vmatprep.subr.bf16.mxu1 %v5613_v37  ;;  %v5680_v36 = vld [vmem:[#allocation2 + $0x288] ss:$16 sps:$4 sm:$0xff]   ;;  %v199_v37 = vpack.c.bf16 %v95_v32, %v87_v31  ;;  %v143_v10 = vld [vmem:[%s7356_s0 + $0x2c0] sm:$0xff] }
  0x4a   :  { %v5715_v11 = vld [vmem:[#allocation2 + $0x344] ss:$16 sps:$4 sm:$0xff]   ;;  %v176_v31 = vld [vmem:[%s7356_s0 + $0x3c8] sm:$0xff] }
  0x4b   :  { %v5721_v18 = vld [vmem:[#allocation2 + $0x364] ss:$16 sps:$4 sm:$0xff]  }
  0x4c   :  { %1824 = vmatpush1.bf16.msra.mxu0 %v5615_v38  ;;  %2276 = vmatpush1.bf16.msra.mxu1 %v5616_v39  ;;  %v104_v38 = vld [vmem:[%s7356_s0 + $0x188] sm:$0xff]  ;;  %v159_v24 = vld [vmem:[%s7356_s0 + $0x340] sm:$0xff] }
  0x4d   :  { %1825 = vmatprep.subr.bf16.mxu0 %v5617_v40  ;;  %2277 = vmatprep.subr.bf16.mxu1 %v5619_v41  ;;  %v112_v39 = vld [vmem:[%s7356_s0 + $0x1c8] sm:$0xff]  ;;  %v5685_v40 = vld [vmem:[#allocation2 + $0x2a4] ss:$16 sps:$4 sm:$0xff]  }
  0x4e   :  { %v5688_v41 = vld [vmem:[#allocation2 + $0x2ac] ss:$16 sps:$4 sm:$0xff]   ;;  %v5727_v25 = vld [vmem:[#allocation2 + $0x384] ss:$16 sps:$4 sm:$0xff]  }
  0x4f   :  { %v5733_v32 = vld [vmem:[#allocation2 + $0x3a4] ss:$16 sps:$4 sm:$0xff]  }
  0x50   :  { %1826 = vmatpush1.bf16.msra.mxu0 %v5621_v42  ;;  %2278 = vmatpush1.bf16.msra.mxu1 %v5622_v43  ;;  %v5683_v42 = vld [vmem:[#allocation2 + $0x2a0] ss:$16 sps:$4 sm:$0xff]   ;;  %v208_v43 = vpack.c.bf16 %v112_v39, %v104_v38  ;;  %v5739_v39 = vld [vmem:[#allocation2 + $0x3c4] ss:$16 sps:$4 sm:$0xff]  }
  0x51   :  { %1827 = vmatprep.subr.bf16.mxu0 %v5623_v44  ;;  %2279 = vmatprep.subr.bf16.mxu1 %v5625_v45  ;;  %v5686_v44 = vld [vmem:[#allocation2 + $0x2a8] ss:$16 sps:$4 sm:$0xff]   ;;  %v103_v45 = vld [vmem:[%s7356_s0 + $0x180] sm:$0xff] }
  0x52   :  { %v175_v38 = vld [vmem:[%s7356_s0 + $0x3c0] sm:$0xff] }
  0x54   :  { %1828 = vmatpush1.bf16.msra.mxu0 %v5627_v47  ;;  %2280 = vmatpush1.bf16.msra.mxu1 %v5628_v48  ;;  %v5691_v47 = vld [vmem:[#allocation2 + $0x2c4] ss:$16 sps:$4 sm:$0xff]   ;;  %v5694_v48 = vld [vmem:[#allocation2 + $0x2cc] ss:$16 sps:$4 sm:$0xff]  }
  0x55   :  { %1829 = vmatprep.subr.bf16.mxu0 %v5629_v50  ;;  %2281 = vmatprep.subr.bf16.mxu1 %v5631_v52  ;;  %v207_v50 = vpack.c.bf16 %v111_v46, %v103_v45  ;;  %v128_v52 = vld [vmem:[%s7356_s0 + $0x248] sm:$0xff]  ;;  %v66_v45 = vld [vmem:[%s7356_s0 + $0x58] sm:$0xff]  ;;  %v5745_v46 = vld [vmem:[#allocation2 + $0x3e4] ss:$16 sps:$4 sm:$0xff]  }
  0x58   :  { %1830 = vmatpush1.bf16.msra.mxu0 %v5633_v53  ;;  %2282 = vmatpush1.bf16.msra.mxu1 %v5634_v54  ;;  %v5692_v53 = vld [vmem:[#allocation2 + $0x2c8] ss:$16 sps:$4 sm:$0xff]   ;;  %v5697_v54 = vld [vmem:[#allocation2 + $0x2e4] ss:$16 sps:$4 sm:$0xff]  }
  0x59   :  { %1831 = vmatprep.subr.bf16.mxu0 %v5635_v55  ;;  %2283 = vmatprep.subr.bf16.mxu1 %v5637_v56  ;;  %v5700_v55 = vld [vmem:[#allocation2 + $0x2ec] ss:$16 sps:$4 sm:$0xff]   ;;  %v5695_v56 = vld [vmem:[#allocation2 + $0x2e0] ss:$16 sps:$4 sm:$0xff]  }
  0x5c   :  { %1832 = vmatpush1.bf16.msra.mxu0 %v5639_v57  ;;  %2284 = vmatpush1.bf16.msra.mxu1 %v5640_v58  ;;  %v5698_v57 = vld [vmem:[#allocation2 + $0x2e8] ss:$16 sps:$4 sm:$0xff]   ;;  %v216_v58 = vpack.c.bf16 %v128_v52, %v120_v51  ;;  %v57_v51 = vld [vmem:[%s7356_s0 + $0x10] sm:$0xff] }
  0x5d   :  { %1833 = vmatprep.subr.bf16.mxu0 %v5641_v59  ;;  %2285 = vmatprep.subr.bf16.mxu1 %v5643_v60  ;;  %v119_v59 = vld [vmem:[%s7356_s0 + $0x200] sm:$0xff]  ;;  %v65_v52 = vld [vmem:[%s7356_s0 + $0x50] sm:$0xff] }
  0x5e   :  { %v127_v60 = vld [vmem:[%s7356_s0 + $0x240] sm:$0xff] }
  0x60   :  { %1834 = vmatpush1.bf16.msra.mxu0 %v5645_v61  ;;  %2286 = vmatpush1.bf16.msra.mxu1 %v5646_v62  ;;  %v5703_v61 = vld [vmem:[#allocation2 + $0x304] ss:$16 sps:$4 sm:$0xff]   ;;  %v5706_v62 = vld [vmem:[#allocation2 + $0x30c] ss:$16 sps:$4 sm:$0xff]  }
  0x61   :  { %1835 = vmatprep.subr.bf16.mxu0 %v5647_v63  ;;  %2287 = vmatprep.subr.bf16.mxu1 %v5649_v0  ;;  %v215_v63 = vpack.c.bf16 %v127_v60, %v119_v59  ;;  %v136_v0 = vld [vmem:[%s7356_s0 + $0x288] sm:$0xff]  ;;  %v5757_v60 = vld [vmem:[#allocation2 + $0x424] ss:$16 sps:$4 sm:$0xff]  }
  0x62   :  { %v5752_v59 = vld [vmem:[#allocation2 + $0x408] ss:$16 sps:$4 sm:$0xff]  }
  0x64   :  { %1836 = vmatpush1.bf16.msra.mxu0 %v5651_v1  ;;  %2288 = vmatpush1.bf16.msra.mxu1 %v5652_v2  ;;  %v144_v1 = vld [vmem:[%s7356_s0 + $0x2c8] sm:$0xff]  ;;  %v5701_v2 = vld [vmem:[#allocation2 + $0x300] ss:$16 sps:$4 sm:$0xff]  }
  0x65   :  { %1918 = vmatprep.subr.bf16.mxu0 %v5655_v5  ;;  %2370 = vmatprep.subr.bf16.mxu1 %v5658_v6  ;;  %v5712_v5 = vld [vmem:[#allocation2 + $0x32c] ss:$16 sps:$4 sm:$0xff]   ;;  %v5707_v6 = vld [vmem:[#allocation2 + $0x320] ss:$16 sps:$4 sm:$0xff]  }
  0x67   :  { %1838 = vmatmul.mubr.bf16.vlgmr.msra.gmra.mrb[0].mxu0 %v183_v8  ;;  %2290 = vmatmul.mubr.bf16.vlgmr.msra.gmra.mrb[0].mxu1 %v183_v8  ;;  %v224_v8 = vpack.c.bf16 %v144_v1, %v136_v0  ;;  %v73_v1 = vld [vmem:[%s7356_s0 + $0x90] sm:$0xff] }
  0x68   :  { %1919 = vmatpush1.bf16.msra.mxu0 %v5653_v7  ;;  %2371 = vmatpush1.bf16.msra.mxu1 %v5656_v9  ;;  %v5710_v7 = vld [vmem:[#allocation2 + $0x328] ss:$16 sps:$4 sm:$0xff]   ;;  %v135_v9 = vld [vmem:[%s7356_s0 + $0x280] sm:$0xff] }
  0x69   :  { %1920 = vmatprep.subr.bf16.mxu0 %v5661_v12  ;;  %2372 = vmatprep.subr.bf16.mxu1 %v5664_v13  ;;  %v5718_v12 = vld [vmem:[#allocation2 + $0x34c] ss:$16 sps:$4 sm:$0xff]   ;;  %v5713_v13 = vld [vmem:[#allocation2 + $0x340] ss:$16 sps:$4 sm:$0xff]  }
  0x6a   :  { %1847 = vmatprep.mubr.bf16.mxu0 %v192_v15  ;;  %2299 = vmatprep.mubr.bf16.mxu1 %v192_v15  ;;  %v5716_v15 = vld [vmem:[#allocation2 + $0x348] ss:$16 sps:$4 sm:$0xff]  }
  0x6c   :  { %1921 = vmatpush1.bf16.msra.mxu0 %v5659_v14  ;;  %2373 = vmatpush1.bf16.msra.mxu1 %v5662_v16  ;;  %v223_v14 = vpack.c.bf16 %v143_v10, %v135_v9  ;;  %v152_v16 = vld [vmem:[%s7356_s0 + $0x308] sm:$0xff]  ;;  %v5769_v10 = vld [vmem:[#allocation2 + $0x464] ss:$16 sps:$4 sm:$0xff]  }
  0x6d   :  { %1922 = vmatprep.subr.bf16.mxu0 %v5667_v19  ;;  %2374 = vmatprep.subr.bf16.mxu1 %v5670_v20  ;;  %v5724_v19 = vld [vmem:[#allocation2 + $0x36c] ss:$16 sps:$4 sm:$0xff]   ;;  %v5719_v20 = vld [vmem:[#allocation2 + $0x360] ss:$16 sps:$4 sm:$0xff]   ;;  %v5764_v9 = vld [vmem:[#allocation2 + $0x448] ss:$16 sps:$4 sm:$0xff]  }
  0x6f   :  { %1848 = vmatmul.mubr.bf16.gmra.mrb[4].mxu0 %v191_v23  ;;  %2300 = vmatmul.mubr.bf16.gmra.mrb[4].mxu1 %v191_v23  ;;  %v151_v23 = vld [vmem:[%s7356_s0 + $0x300] sm:$0xff] }
  0x70   :  { %1923 = vmatpush1.bf16.msra.mxu0 %v5665_v21  ;;  %2375 = vmatpush1.bf16.msra.mxu1 %v5668_v22  ;;  %v232_v21 = vpack.c.bf16 %v160_v17, %v152_v16  ;;  %v5722_v22 = vld [vmem:[#allocation2 + $0x368] ss:$16 sps:$4 sm:$0xff]   ;;  %v97_v16 = vld [vmem:[%s7356_s0 + $0x150] sm:$0xff] }
  0x71   :  { %1924 = vmatprep.subr.bf16.mxu0 %v5673_v26  ;;  %2376 = vmatprep.subr.bf16.mxu1 %v5676_v27  ;;  %v5730_v26 = vld [vmem:[#allocation2 + $0x38c] ss:$16 sps:$4 sm:$0xff]   ;;  %v5725_v27 = vld [vmem:[#allocation2 + $0x380] ss:$16 sps:$4 sm:$0xff]   ;;  %v5775_v17 = vld [vmem:[#allocation2 + $0x484] ss:$16 sps:$4 sm:$0xff]  }
  0x72   :  { %1857 = vmatprep.mubr.bf16.mxu0 %v200_v28  ;;  %2309 = vmatprep.mubr.bf16.mxu1 %v200_v28  ;;  %v5728_v28 = vld [vmem:[#allocation2 + $0x388] ss:$16 sps:$4 sm:$0xff]  }
  0x74   :  { %1925 = vmatpush1.bf16.msra.mxu0 %v5671_v29  ;;  %2377 = vmatpush1.bf16.msra.mxu1 %v5674_v30  ;;  %v231_v29 = vpack.c.bf16 %v159_v24, %v151_v23  ;;  %v168_v30 = vld [vmem:[%s7356_s0 + $0x388] sm:$0xff]  ;;  %v114_v23 = vld [vmem:[%s7356_s0 + $0x1d8] sm:$0xff]  ;;  %v5781_v24 = vld [vmem:[#allocation2 + $0x4a4] ss:$16 sps:$4 sm:$0xff]  }
  0x75   :  { %1926 = vmatprep.subr.bf16.mxu0 %v5679_v33  ;;  %2378 = vmatprep.subr.bf16.mxu1 %v5682_v34  ;;  %v5736_v33 = vld [vmem:[#allocation2 + $0x3ac] ss:$16 sps:$4 sm:$0xff]   ;;  %v240_v34 = vpack.c.bf16 %v176_v31, %v168_v30  ;;  %v113_v30 = vld [vmem:[%s7356_s0 + $0x1d0] sm:$0xff] }
  0x76   :  { %v5787_v31 = vld [vmem:[#allocation2 + $0x4c4] ss:$16 sps:$4 sm:$0xff]  }
  0x77   :  { %1858 = vmatmul.mubr.bf16.gmra.mrb[8].mxu0 %v199_v37  ;;  %2310 = vmatmul.mubr.bf16.gmra.mrb[8].mxu1 %v199_v37  ;;  %v167_v37 = vld [vmem:[%s7356_s0 + $0x380] sm:$0xff] }
  0x78   :  { %1927 = vmatpush1.bf16.msra.mxu0 %v5677_v35  ;;  %2379 = vmatpush1.bf16.msra.mxu1 %v5680_v36  ;;  %v5731_v35 = vld [vmem:[#allocation2 + $0x3a0] ss:$16 sps:$4 sm:$0xff]   ;;  %v5734_v36 = vld [vmem:[#allocation2 + $0x3a8] ss:$16 sps:$4 sm:$0xff]  }
  0x79   :  { %1928 = vmatprep.subr.bf16.mxu0 %v5685_v40  ;;  %2380 = vmatprep.subr.bf16.mxu1 %v5688_v41  ;;  %v5742_v40 = vld [vmem:[#allocation2 + $0x3cc] ss:$16 sps:$4 sm:$0xff]   ;;  %v5737_v41 = vld [vmem:[#allocation2 + $0x3c0] ss:$16 sps:$4 sm:$0xff]  }
  0x7a   :  { %1867 = vmatprep.mubr.bf16.mxu0 %v208_v43  ;;  %2319 = vmatprep.mubr.bf16.mxu1 %v208_v43  ;;  %v239_v43 = vpack.c.bf16 %v175_v38, %v167_v37  ;;  %v130_v37 = vld [vmem:[%s7356_s0 + $0x258] sm:$0xff]  ;;  %v5793_v38 = vld [vmem:[#allocation2 + $0x4e4] ss:$16 sps:$4 sm:$0xff]  }
  0x7c   :  { %1929 = vmatpush1.bf16.msra.mxu0 %v5683_v42  ;;  %2381 = vmatpush1.bf16.msra.mxu1 %v5686_v44  ;;  %v5740_v42 = vld [vmem:[#allocation2 + $0x3c8] ss:$16 sps:$4 sm:$0xff]  }
  0x7d   :  { %1930 = vmatprep.subr.bf16.mxu0 %v5691_v47  ;;  %2382 = vmatprep.subr.bf16.mxu1 %v5694_v48  ;;  %v58_v44 = vld [vmem:[%s7356_s0 + $0x18] sm:$0xff]  ;;  %v5743_v48 = vld [vmem:[#allocation2 + $0x3e0] ss:$16 sps:$4 sm:$0xff]  }
  0x7e   :  { %v5748_v47 = vld [vmem:[#allocation2 + $0x3ec] ss:$16 sps:$4 sm:$0xff]  }
  0x7f   :  { %1868 = vmatmul.mubr.bf16.gmra.mrb[12].mxu0 %v207_v50  ;;  %2320 = vmatmul.mubr.bf16.gmra.mrb[12].mxu1 %v207_v50  ;;  %v5746_v50 = vld [vmem:[#allocation2 + $0x3e8] ss:$16 sps:$4 sm:$0xff]  }
  0x80   :  { %1931 = vmatpush1.bf16.msra.mxu0 %v5689_v49  ;;  %2383 = vmatpush1.bf16.msra.mxu1 %v5692_v53  ;;  %v186_v49 = vpack.c.bf16 %v66_v45, %v58_v44  ;;  %v5751_v53 = vld [vmem:[#allocation2 + $0x404] ss:$16 sps:$4 sm:$0xff]  }
  0x81   :  { %1932 = vmatprep.subr.bf16.mxu0 %v5697_v54  ;;  %2384 = vmatprep.subr.bf16.mxu1 %v5700_v55  ;;  %v5754_v54 = vld [vmem:[#allocation2 + $0x40c] ss:$16 sps:$4 sm:$0xff]   ;;  %v5749_v55 = vld [vmem:[#allocation2 + $0x400] ss:$16 sps:$4 sm:$0xff]   ;;  %v5799_v45 = vld [vmem:[#allocation2 + $0x504] ss:$16 sps:$4 sm:$0xff]  }
  0x82   :  { %1877 = vmatprep.mubr.bf16.mxu0 %v216_v58  ;;  %2329 = vmatprep.mubr.bf16.mxu1 %v216_v58  ;;  %v82_v58 = vld [vmem:[%s7356_s0 + $0xd8] sm:$0xff]  ;;  %v129_v44 = vld [vmem:[%s7356_s0 + $0x250] sm:$0xff] }
  0x84   :  { %1933 = vmatpush1.bf16.msra.mxu0 %v5695_v56  ;;  %2385 = vmatpush1.bf16.msra.mxu1 %v5698_v57  ;;  %v185_v56 = vpack.c.bf16 %v65_v52, %v57_v51  ;;  %v74_v57 = vld [vmem:[%s7356_s0 + $0x98] sm:$0xff]  ;;  %v5805_v52 = vld [vmem:[#allocation2 + $0x524] ss:$16 sps:$4 sm:$0xff]  }
  0x85   :  { %1934 = vmatprep.subr.bf16.mxu0 %v5703_v61  ;;  %2386 = vmatprep.subr.bf16.mxu1 %v5706_v62  ;;  %v5760_v61 = vld [vmem:[#allocation2 + $0x42c] ss:$16 sps:$4 sm:$0xff]   ;;  %v5755_v62 = vld [vmem:[#allocation2 + $0x420] ss:$16 sps:$4 sm:$0xff]   ;;  %v194_v0 = vpack.c.bf16 %v82_v58, %v74_v57 }
  0x86   :  { %v146_v51 = vld [vmem:[%s7356_s0 + $0x2d8] sm:$0xff]  ;;  %v137_v57 = vld [vmem:[%s7356_s0 + $0x290] sm:$0xff] }
  0x87   :  { %1878 = vmatmul.mubr.bf16.gmra.mrb[16].mxu0 %v215_v63  ;;  %2330 = vmatmul.mubr.bf16.gmra.mrb[16].mxu1 %v215_v63  ;;  %v5758_v63 = vld [vmem:[#allocation2 + $0x428] ss:$16 sps:$4 sm:$0xff]   ;;  %v145_v58 = vld [vmem:[%s7356_s0 + $0x2d0] sm:$0xff] }
  0x88   :  { %1935 = vmatpush1.bf16.msra.mxu0 %v5701_v2  ;;  %2387 = vmatpush1.bf16.msra.mxu1 %v5704_v3  ;;  %v81_v2 = vld [vmem:[%s7356_s0 + $0xd0] sm:$0xff] }
  0x89   :  { %1936 = vmatprep.subr.bf16.mxu0 %v5709_v4  ;;  %2388 = vmatprep.subr.bf16.mxu1 %v5712_v5  ;;  %v5763_v3 = vld [vmem:[#allocation2 + $0x444] ss:$16 sps:$4 sm:$0xff]   ;;  %v5766_v4 = vld [vmem:[#allocation2 + $0x44c] ss:$16 sps:$4 sm:$0xff]   ;;  %v193_v5 = vpack.c.bf16 %v81_v2, %v73_v1  ;;  %v5812_v1 = vld [vmem:[#allocation2 + $0x548] ss:$16 sps:$4 sm:$0xff]  }
  0x8a   :  { %1887 = vmatprep.mubr.bf16.mxu0 %v224_v8  ;;  %2339 = vmatprep.mubr.bf16.mxu1 %v224_v8  ;;  %v5761_v8 = vld [vmem:[#allocation2 + $0x440] ss:$16 sps:$4 sm:$0xff]   ;;  %v5817_v2 = vld [vmem:[#allocation2 + $0x564] ss:$16 sps:$4 sm:$0xff]  }
  0x8c   :  { %1937 = vmatpush1.bf16.msra.mxu0 %v5707_v6  ;;  %2389 = vmatpush1.bf16.msra.mxu1 %v5710_v7  ;;  %v90_v6 = vld [vmem:[%s7356_s0 + $0x118] sm:$0xff] }
  0x8d   :  { %1938 = vmatprep.subr.bf16.mxu0 %v5715_v11  ;;  %2390 = vmatprep.subr.bf16.mxu1 %v5718_v12  ;;  %v98_v7 = vld [vmem:[%s7356_s0 + $0x158] sm:$0xff]  ;;  %v5767_v12 = vld [vmem:[#allocation2 + $0x460] ss:$16 sps:$4 sm:$0xff]  }
  0x8e   :  { %v5772_v11 = vld [vmem:[#allocation2 + $0x46c] ss:$16 sps:$4 sm:$0xff]  }
  0x8f   :  { %1888 = vmatmul.mubr.bf16.gmra.mrb[20].mxu0 %v223_v14  ;;  %2340 = vmatmul.mubr.bf16.gmra.mrb[20].mxu1 %v223_v14  ;;  %v202_v14 = vpack.c.bf16 %v98_v7, %v90_v6  ;;  %v153_v7 = vld [vmem:[%s7356_s0 + $0x310] sm:$0xff] }
  0x90   :  { %1939 = vmatpush1.bf16.msra.mxu0 %v5713_v13  ;;  %2391 = vmatpush1.bf16.msra.mxu1 %v5716_v15  ;;  %v5770_v13 = vld [vmem:[#allocation2 + $0x468] ss:$16 sps:$4 sm:$0xff]   ;;  %v89_v15 = vld [vmem:[%s7356_s0 + $0x110] sm:$0xff] }
  0x91   :  { %1940 = vmatprep.subr.bf16.mxu0 %v5721_v18  ;;  %2392 = vmatprep.subr.bf16.mxu1 %v5724_v19  ;;  %v5778_v18 = vld [vmem:[#allocation2 + $0x48c] ss:$16 sps:$4 sm:$0xff]   ;;  %v5773_v19 = vld [vmem:[#allocation2 + $0x480] ss:$16 sps:$4 sm:$0xff]  }
  0x92   :  { %1897 = vmatprep.mubr.bf16.mxu0 %v232_v21  ;;  %2349 = vmatprep.mubr.bf16.mxu1 %v232_v21  ;;  %v5776_v21 = vld [vmem:[#allocation2 + $0x488] ss:$16 sps:$4 sm:$0xff]  }
  0x94   :  { %1941 = vmatpush1.bf16.msra.mxu0 %v5719_v20  ;;  %2393 = vmatpush1.bf16.msra.mxu1 %v5722_v22  ;;  %v201_v20 = vpack.c.bf16 %v97_v16, %v89_v15  ;;  %v106_v22 = vld [vmem:[%s7356_s0 + $0x198] sm:$0xff]  ;;  %v5829_v16 = vld [vmem:[#allocation2 + $0x5a4] ss:$16 sps:$4 sm:$0xff]  }
  0x95   :  { %1942 = vmatprep.subr.bf16.mxu0 %v5727_v25  ;;  %2394 = vmatprep.subr.bf16.mxu1 %v5730_v26  ;;  %v5784_v25 = vld [vmem:[#allocation2 + $0x4ac] ss:$16 sps:$4 sm:$0xff]   ;;  %v5779_v26 = vld [vmem:[#allocation2 + $0x4a0] ss:$16 sps:$4 sm:$0xff]   ;;  %v5824_v15 = vld [vmem:[#allocation2 + $0x588] ss:$16 sps:$4 sm:$0xff]  }
  0x97   :  { %1898 = vmatmul.mubr.bf16.gmra.mrb[24].mxu0 %v231_v29  ;;  %2350 = vmatmul.mubr.bf16.gmra.mrb[24].mxu1 %v231_v29  ;;  %v105_v29 = vld [vmem:[%s7356_s0 + $0x190] sm:$0xff] }
  0x98   :  { %1943 = vmatpush1.bf16.msra.mxu0 %v5725_v27  ;;  %2395 = vmatpush1.bf16.msra.mxu1 %v5728_v28  ;;  %v210_v27 = vpack.c.bf16 %v114_v23, %v106_v22  ;;  %v5782_v28 = vld [vmem:[#allocation2 + $0x4a8] ss:$16 sps:$4 sm:$0xff]   ;;  %v177_v22 = vld [vmem:[%s7356_s0 + $0x3d0] sm:$0xff] }
  0x99   :  { %1944 = vmatprep.subr.bf16.mxu0 %v5733_v32  ;;  %2396 = vmatprep.subr.bf16.mxu1 %v5736_v33  ;;  %v5790_v32 = vld [vmem:[#allocation2 + $0x4cc] ss:$16 sps:$4 sm:$0xff]   ;;  %v5785_v33 = vld [vmem:[#allocation2 + $0x4c0] ss:$16 sps:$4 sm:$0xff]   ;;  %v5835_v23 = vld [vmem:[#allocation2 + $0x5c4] ss:$16 sps:$4 sm:$0xff]  }
  0x9a   :  { %1907 = vmatprep.mubr.bf16.mxu0 %v240_v34  ;;  %2359 = vmatprep.mubr.bf16.mxu1 %v240_v34  ;;  %v5788_v34 = vld [vmem:[#allocation2 + $0x4c8] ss:$16 sps:$4 sm:$0xff]  }
  0x9c   :  { %1945 = vmatpush1.bf16.msra.mxu0 %v5731_v35  ;;  %2397 = vmatpush1.bf16.msra.mxu1 %v5734_v36  ;;  %v209_v35 = vpack.c.bf16 %v113_v30, %v105_v29  ;;  %v122_v36 = vld [vmem:[%s7356_s0 + $0x218] sm:$0xff]  ;;  %v68_v29 = vld [vmem:[%s7356_s0 + $0x68] sm:$0xff]  ;;  %v5841_v30 = vld [vmem:[#allocation2 + $0x5e4] ss:$16 sps:$4 sm:$0xff]  }
  0x9d   :  { %1946 = vmatprep.subr.bf16.mxu0 %v5739_v39  ;;  %2398 = vmatprep.subr.bf16.mxu1 %v5742_v40  ;;  %v5796_v39 = vld [vmem:[#allocation2 + $0x4ec] ss:$16 sps:$4 sm:$0xff]   ;;  %v218_v40 = vpack.c.bf16 %v130_v37, %v122_v36  ;;  %v67_v36 = vld [vmem:[%s7356_s0 + $0x60] sm:$0xff] }
  0x9e   :  { %v5847_v37 = vld [vmem:[#allocation2 + $0x604] ss:$16 sps:$4 sm:$0xff]  }
  0x9f   :  { %1908 = vmatmul.mubr.bf16.gmra.mrb[28].mxu0 %v239_v43  ;;  %2360 = vmatmul.mubr.bf16.gmra.mrb[28].mxu1 %v239_v43  ;;  %v121_v43 = vld [vmem:[%s7356_s0 + $0x210] sm:$0xff] }
  0xa0   :  { %1947 = vmatpush1.bf16.msra.mxu0 %v5737_v41  ;;  %2399 = vmatpush1.bf16.msra.mxu1 %v5740_v42  ;;  %v5791_v41 = vld [vmem:[#allocation2 + $0x4e0] ss:$16 sps:$4 sm:$0xff]   ;;  %v5794_v42 = vld [vmem:[#allocation2 + $0x4e8] ss:$16 sps:$4 sm:$0xff]  }
  0xa1   :  { %1948 = vmatprep.subr.bf16.mxu0 %v5745_v46  ;;  %2400 = vmatprep.subr.bf16.mxu1 %v5748_v47  ;;  %v5802_v46 = vld [vmem:[#allocation2 + $0x50c] ss:$16 sps:$4 sm:$0xff]   ;;  %v5797_v47 = vld [vmem:[#allocation2 + $0x500] ss:$16 sps:$4 sm:$0xff]  }
  0xa2   :  { %1950 = vmatprep.mubr.bf16.mxu0 %v186_v49  ;;  %2402 = vmatprep.mubr.bf16.mxu1 %v186_v49  ;;  %v217_v49 = vpack.c.bf16 %v129_v44, %v121_v43  ;;  %v84_v43 = vld [vmem:[%s7356_s0 + $0xe8] sm:$0xff]  ;;  %v5853_v44 = vld [vmem:[#allocation2 + $0x624] ss:$16 sps:$4 sm:$0xff]  }
  0xa4   :  { %1949 = vmatpush1.bf16.msra.mxu0 %v5743_v48  ;;  %2401 = vmatpush1.bf16.msra.mxu1 %v5746_v50  ;;  %v5800_v48 = vld [vmem:[#allocation2 + $0x508] ss:$16 sps:$4 sm:$0xff]  }
  0xa5   :  { %2031 = vmatprep.subr.bf16.mxu0 %v5751_v53  ;;  %2483 = vmatprep.subr.bf16.mxu1 %v5754_v54  ;;  %v138_v50 = vld [vmem:[%s7356_s0 + $0x298] sm:$0xff]  ;;  %v5803_v54 = vld [vmem:[#allocation2 + $0x520] ss:$16 sps:$4 sm:$0xff]  }
  0xa6   :  { %v5808_v53 = vld [vmem:[#allocation2 + $0x52c] ss:$16 sps:$4 sm:$0xff]  }
  0xa7   :  { %1951 = vmatmul.mubr.bf16.vlgmr.msra.gmra.mrb[0].mxu0 %v185_v56  ;;  %2403 = vmatmul.mubr.bf16.vlgmr.msra.gmra.mrb[0].mxu1 %v185_v56  ;;  %v5806_v56 = vld [vmem:[#allocation2 + $0x528] ss:$16 sps:$4 sm:$0xff]  }
  0xa8   :  { %2032 = vmatpush1.bf16.msra.mxu0 %v5749_v55  ;;  %2484 = vmatpush1.bf16.msra.mxu1 %v5752_v59  ;;  %v226_v55 = vpack.c.bf16 %v146_v51, %v138_v50  ;;  %v5811_v59 = vld [vmem:[#allocation2 + $0x544] ss:$16 sps:$4 sm:$0xff]  }
  0xa9   :  { %2033 = vmatprep.subr.bf16.mxu0 %v5757_v60  ;;  %2485 = vmatprep.subr.bf16.mxu1 %v5760_v61  ;;  %v5814_v60 = vld [vmem:[#allocation2 + $0x54c] ss:$16 sps:$4 sm:$0xff]   ;;  %v5809_v61 = vld [vmem:[#allocation2 + $0x540] ss:$16 sps:$4 sm:$0xff]   ;;  %v5859_v51 = vld [vmem:[#allocation2 + $0x644] ss:$16 sps:$4 sm:$0xff]  }
  0xaa   :  { %1960 = vmatprep.mubr.bf16.mxu0 %v194_v0  ;;  %2412 = vmatprep.mubr.bf16.mxu1 %v194_v0  ;;  %v162_v0 = vld [vmem:[%s7356_s0 + $0x358] sm:$0xff]  ;;  %v83_v50 = vld [vmem:[%s7356_s0 + $0xe0] sm:$0xff] }
  0xac   :  { %2034 = vmatpush1.bf16.msra.mxu0 %v5755_v62  ;;  %2486 = vmatpush1.bf16.msra.mxu1 %v5758_v63  ;;  %v225_v62 = vpack.c.bf16 %v145_v58, %v137_v57  ;;  %v154_v63 = vld [vmem:[%s7356_s0 + $0x318] sm:$0xff]  ;;  %v100_v57 = vld [vmem:[%s7356_s0 + $0x168] sm:$0xff]  ;;  %v5865_v58 = vld [vmem:[#allocation2 + $0x664] ss:$16 sps:$4 sm:$0xff]  }
  0xad   :  { %2035 = vmatprep.subr.bf16.mxu0 %v5763_v3  ;;  %2487 = vmatprep.subr.bf16.mxu1 %v5766_v4  ;;  %v5820_v3 = vld [vmem:[#allocation2 + $0x56c] ss:$16 sps:$4 sm:$0xff]   ;;  %v5815_v4 = vld [vmem:[#allocation2 + $0x560] ss:$16 sps:$4 sm:$0xff]   ;;  %v234_v6 = vpack.c.bf16 %v162_v0, %v154_v63 }
  0xae   :  { %v91_v63 = vld [vmem:[%s7356_s0 + $0x120] sm:$0xff] }
  0xaf   :  { %1961 = vmatmul.mubr.bf16.gmra.mrb[4].mxu0 %v193_v5  ;;  %2413 = vmatmul.mubr.bf16.gmra.mrb[4].mxu1 %v193_v5  ;;  %v5818_v5 = vld [vmem:[#allocation2 + $0x568] ss:$16 sps:$4 sm:$0xff]   ;;  %v99_v0 = vld [vmem:[%s7356_s0 + $0x160] sm:$0xff] }
  0xb0   :  { %2036 = vmatpush1.bf16.msra.mxu0 %v5761_v8  ;;  %2488 = vmatpush1.bf16.msra.mxu1 %v5764_v9  ;;  %v161_v8 = vld [vmem:[%s7356_s0 + $0x350] sm:$0xff] }
  0xb1   :  { %2037 = vmatprep.subr.bf16.mxu0 %v5769_v10  ;;  %2489 = vmatprep.subr.bf16.mxu1 %v5772_v11  ;;  %v5823_v9 = vld [vmem:[#allocation2 + $0x584] ss:$16 sps:$4 sm:$0xff]   ;;  %v5826_v10 = vld [vmem:[#allocation2 + $0x58c] ss:$16 sps:$4 sm:$0xff]   ;;  %v233_v11 = vpack.c.bf16 %v161_v8, %v153_v7  ;;  %v5872_v7 = vld [vmem:[#allocation2 + $0x688] ss:$16 sps:$4 sm:$0xff]  }
  0xb2   :  { %1970 = vmatprep.mubr.bf16.mxu0 %v202_v14  ;;  %2422 = vmatprep.mubr.bf16.mxu1 %v202_v14  ;;  %v5821_v14 = vld [vmem:[#allocation2 + $0x580] ss:$16 sps:$4 sm:$0xff]   ;;  %v5877_v8 = vld [vmem:[#allocation2 + $0x6a4] ss:$16 sps:$4 sm:$0xff]  }
  0xb4   :  { %2038 = vmatpush1.bf16.msra.mxu0 %v5767_v12  ;;  %2490 = vmatpush1.bf16.msra.mxu1 %v5770_v13  ;;  %v170_v12 = vld [vmem:[%s7356_s0 + $0x398] sm:$0xff] }
  0xb5   :  { %2039 = vmatprep.subr.bf16.mxu0 %v5775_v17  ;;  %2491 = vmatprep.subr.bf16.mxu1 %v5778_v18  ;;  %v178_v13 = vld [vmem:[%s7356_s0 + $0x3d8] sm:$0xff]  ;;  %v5827_v18 = vld [vmem:[#allocation2 + $0x5a0] ss:$16 sps:$4 sm:$0xff]  }
  0xb6   :  { %v5832_v17 = vld [vmem:[#allocation2 + $0x5ac] ss:$16 sps:$4 sm:$0xff]  }
  0xb7   :  { %1971 = vmatmul.mubr.bf16.gmra.mrb[8].mxu0 %v201_v20  ;;  %2423 = vmatmul.mubr.bf16.gmra.mrb[8].mxu1 %v201_v20  ;;  %v242_v20 = vpack.c.bf16 %v178_v13, %v170_v12  ;;  %v5878_v12 = vld [vmem:[#allocation2 + $0x6a8] ss:$16 sps:$4 sm:$0xff]   ;;  %v107_v13 = vld [vmem:[%s7356_s0 + $0x1a0] sm:$0xff] }
  0xb8   :  { %2040 = vmatpush1.bf16.msra.mxu0 %v5773_v19  ;;  %2492 = vmatpush1.bf16.msra.mxu1 %v5776_v21  ;;  %v5830_v19 = vld [vmem:[#allocation2 + $0x5a8] ss:$16 sps:$4 sm:$0xff]   ;;  %v169_v21 = vld [vmem:[%s7356_s0 + $0x390] sm:$0xff] }
  0xb9   :  { %2041 = vmatprep.subr.bf16.mxu0 %v5781_v24  ;;  %2493 = vmatprep.subr.bf16.mxu1 %v5784_v25  ;;  %v5838_v24 = vld [vmem:[#allocation2 + $0x5cc] ss:$16 sps:$4 sm:$0xff]   ;;  %v5833_v25 = vld [vmem:[#allocation2 + $0x5c0] ss:$16 sps:$4 sm:$0xff]  }
  0xba   :  { %1980 = vmatprep.mubr.bf16.mxu0 %v210_v27  ;;  %2432 = vmatprep.mubr.bf16.mxu1 %v210_v27  ;;  %v5836_v27 = vld [vmem:[#allocation2 + $0x5c8] ss:$16 sps:$4 sm:$0xff]  }
  0xbc   :  { %2042 = vmatpush1.bf16.msra.mxu0 %v5779_v26  ;;  %2494 = vmatpush1.bf16.msra.mxu1 %v5782_v28  ;;  %v241_v26 = vpack.c.bf16 %v177_v22, %v169_v21  ;;  %v60_v28 = vld [vmem:[%s7356_s0 + $0x28] sm:$0xff]  ;;  %v5889_v22 = vld [vmem:[#allocation2 + $0x6e4] ss:$16 sps:$4 sm:$0xff]  }
  0xbd   :  { %2043 = vmatprep.subr.bf16.mxu0 %v5787_v31  ;;  %2495 = vmatprep.subr.bf16.mxu1 %v5790_v32  ;;  %v5844_v31 = vld [vmem:[#allocation2 + $0x5ec] ss:$16 sps:$4 sm:$0xff]   ;;  %v5839_v32 = vld [vmem:[#allocation2 + $0x5e0] ss:$16 sps:$4 sm:$0xff]  }
  0xbe   :  { %v132_v21 = vld [vmem:[%s7356_s0 + $0x268] sm:$0xff] }
  0xbf   :  { %1981 = vmatmul.mubr.bf16.gmra.mrb[12].mxu0 %v209_v35  ;;  %2433 = vmatmul.mubr.bf16.gmra.mrb[12].mxu1 %v209_v35  ;;  %v59_v35 = vld [vmem:[%s7356_s0 + $0x20] sm:$0xff] }
  0xc0   :  { %2044 = vmatpush1.bf16.msra.mxu0 %v5785_v33  ;;  %2496 = vmatpush1.bf16.msra.mxu1 %v5788_v34  ;;  %v188_v33 = vpack.c.bf16 %v68_v29, %v60_v28  ;;  %v5842_v34 = vld [vmem:[#allocation2 + $0x5e8] ss:$16 sps:$4 sm:$0xff]   ;;  %v131_v28 = vld [vmem:[%s7356_s0 + $0x260] sm:$0xff] }
  0xc1   :  { %2045 = vmatprep.subr.bf16.mxu0 %v5793_v38  ;;  %2497 = vmatprep.subr.bf16.mxu1 %v5796_v39  ;;  %v5850_v38 = vld [vmem:[#allocation2 + $0x60c] ss:$16 sps:$4 sm:$0xff]   ;;  %v5845_v39 = vld [vmem:[#allocation2 + $0x600] ss:$16 sps:$4 sm:$0xff]   ;;  %v5895_v29 = vld [vmem:[#allocation2 + $0x704] ss:$16 sps:$4 sm:$0xff]  }
  0xc2   :  { %1990 = vmatprep.mubr.bf16.mxu0 %v218_v40  ;;  %2442 = vmatprep.mubr.bf16.mxu1 %v218_v40  ;;  %v5848_v40 = vld [vmem:[#allocation2 + $0x608] ss:$16 sps:$4 sm:$0xff]  }
  0xc4   :  { %2046 = vmatpush1.bf16.msra.mxu0 %v5791_v41  ;;  %2498 = vmatpush1.bf16.msra.mxu1 %v5794_v42  ;;  %v187_v41 = vpack.c.bf16 %v67_v36, %v59_v35  ;;  %v76_v42 = vld [vmem:[%s7356_s0 + $0xa8] sm:$0xff]  ;;  %v5901_v36 = vld [vmem:[#allocation2 + $0x724] ss:$16 sps:$4 sm:$0xff]  }
  0xc5   :  { %2047 = vmatprep.subr.bf16.mxu0 %v5799_v45  ;;  %2499 = vmatprep.subr.bf16.mxu1 %v5802_v46  ;;  %v5856_v45 = vld [vmem:[#allocation2 + $0x62c] ss:$16 sps:$4 sm:$0xff]   ;;  %v196_v46 = vpack.c.bf16 %v84_v43, %v76_v42  ;;  %v147_v42 = vld [vmem:[%s7356_s0 + $0x2e0] sm:$0xff] }
  0xc6   :  { %v148_v35 = vld [vmem:[%s7356_s0 + $0x2e8] sm:$0xff]  ;;  %v5907_v43 = vld [vmem:[#allocation2 + $0x744] ss:$16 sps:$4 sm:$0xff]  }
  0xc7   :  { %1991 = vmatmul.mubr.bf16.gmra.mrb[16].mxu0 %v217_v49  ;;  %2443 = vmatmul.mubr.bf16.gmra.mrb[16].mxu1 %v217_v49  ;;  %v75_v49 = vld [vmem:[%s7356_s0 + $0xa0] sm:$0xff] }
  0xc8   :  { %2048 = vmatpush1.bf16.msra.mxu0 %v5797_v47  ;;  %2500 = vmatpush1.bf16.msra.mxu1 %v5800_v48  ;;  %v5851_v47 = vld [vmem:[#allocation2 + $0x620] ss:$16 sps:$4 sm:$0xff]   ;;  %v5854_v48 = vld [vmem:[#allocation2 + $0x628] ss:$16 sps:$4 sm:$0xff]  }
  0xc9   :  { %2049 = vmatprep.subr.bf16.mxu0 %v5805_v52  ;;  %2501 = vmatprep.subr.bf16.mxu1 %v5808_v53  ;;  %v5862_v52 = vld [vmem:[#allocation2 + $0x64c] ss:$16 sps:$4 sm:$0xff]   ;;  %v5857_v53 = vld [vmem:[#allocation2 + $0x640] ss:$16 sps:$4 sm:$0xff]  }
  0xca   :  { %2000 = vmatprep.mubr.bf16.mxu0 %v226_v55  ;;  %2452 = vmatprep.mubr.bf16.mxu1 %v226_v55  ;;  %v195_v55 = vpack.c.bf16 %v83_v50, %v75_v49  ;;  %v164_v49 = vld [vmem:[%s7356_s0 + $0x368] sm:$0xff]  ;;  %v5913_v50 = vld [vmem:[#allocation2 + $0x764] ss:$16 sps:$4 sm:$0xff]  }
  0xcc   :  { %2050 = vmatpush1.bf16.msra.mxu0 %v5803_v54  ;;  %2502 = vmatpush1.bf16.msra.mxu1 %v5806_v56  ;;  %v5860_v54 = vld [vmem:[#allocation2 + $0x648] ss:$16 sps:$4 sm:$0xff]  }
  0xcd   :  { %2051 = vmatprep.subr.bf16.mxu0 %v5811_v59  ;;  %2503 = vmatprep.subr.bf16.mxu1 %v5814_v60  ;;  %v92_v56 = vld [vmem:[%s7356_s0 + $0x128] sm:$0xff] }
  0xce   :  { %v5868_v59 = vld [vmem:[#allocation2 + $0x66c] ss:$16 sps:$4 sm:$0xff]   ;;  %v204_v60 = vpack.c.bf16 %v100_v57, %v92_v56  ;;  %v163_v56 = vld [vmem:[%s7356_s0 + $0x360] sm:$0xff] }
  0xcf   :  { %2001 = vmatmul.mubr.bf16.gmra.mrb[20].mxu0 %v225_v62  ;;  %2453 = vmatmul.mubr.bf16.gmra.mrb[20].mxu1 %v225_v62  ;;  %v5866_v62 = vld [vmem:[#allocation2 + $0x668] ss:$16 sps:$4 sm:$0xff]   ;;  %v5919_v57 = vld [vmem:[#allocation2 + $0x784] ss:$16 sps:$4 sm:$0xff]  }
  0xd0   :  { %2052 = vmatpush1.bf16.msra.mxu0 %v5809_v61  ;;  %2504 = vmatpush1.bf16.msra.mxu1 %v5812_v1  ;;  %v5863_v61 = vld [vmem:[#allocation2 + $0x660] ss:$16 sps:$4 sm:$0xff]   ;;  %v5871_v1 = vld [vmem:[#allocation2 + $0x684] ss:$16 sps:$4 sm:$0xff]  }
  0xd1   :  { %2053 = vmatprep.subr.bf16.mxu0 %v5817_v2  ;;  %2505 = vmatprep.subr.bf16.mxu1 %v5820_v3  ;;  %v5874_v2 = vld [vmem:[#allocation2 + $0x68c] ss:$16 sps:$4 sm:$0xff]   ;;  %v203_v3 = vpack.c.bf16 %v99_v0, %v91_v63  ;;  %v5925_v0 = vld [vmem:[#allocation2 + $0x7a4] ss:$16 sps:$4 sm:$0xff]  }
  0xd2   :  { %2010 = vmatprep.mubr.bf16.mxu0 %v234_v6  ;;  %2462 = vmatprep.mubr.bf16.mxu1 %v234_v6  ;;  %v5869_v6 = vld [vmem:[#allocation2 + $0x680] ss:$16 sps:$4 sm:$0xff]   ;;  %v180_v63 = vld [vmem:[%s7356_s0 + $0x3e8] sm:$0xff] }
  0xd4   :  { %2054 = vmatpush1.bf16.msra.mxu0 %v5815_v4  ;;  %2506 = vmatpush1.bf16.msra.mxu1 %v5818_v5  ;;  %v108_v4 = vld [vmem:[%s7356_s0 + $0x1a8] sm:$0xff] }
  0xd5   :  { %2055 = vmatprep.subr.bf16.mxu0 %v5823_v9  ;;  %2507 = vmatprep.subr.bf16.mxu1 %v5826_v10  ;;  %v116_v5 = vld [vmem:[%s7356_s0 + $0x1e8] sm:$0xff] }
  0xd6   :  { %v5880_v9 = vld [vmem:[#allocation2 + $0x6ac] ss:$16 sps:$4 sm:$0xff]   ;;  %v212_v10 = vpack.c.bf16 %v116_v5, %v108_v4  ;;  %v171_v5 = vld [vmem:[%s7356_s0 + $0x3a0] sm:$0xff] }
  0xd7   :  { %2011 = vmatmul.mubr.bf16.gmra.mrb[24].mxu0 %v233_v11  ;;  %2463 = vmatmul.mubr.bf16.gmra.mrb[24].mxu1 %v233_v11  ;;  %v5875_v11 = vld [vmem:[#allocation2 + $0x6a0] ss:$16 sps:$4 sm:$0xff]  }
  0xd8   :  { %2056 = vmatpush1.bf16.msra.mxu0 %v5821_v14  ;;  %2508 = vmatpush1.bf16.msra.mxu1 %v5824_v15  ;;  %v115_v14 = vld [vmem:[%s7356_s0 + $0x1e0] sm:$0xff] }
  0xd9   :  { %2057 = vmatprep.subr.bf16.mxu0 %v5829_v16  ;;  %2509 = vmatprep.subr.bf16.mxu1 %v5832_v17  ;;  %v5883_v15 = vld [vmem:[#allocation2 + $0x6c4] ss:$16 sps:$4 sm:$0xff]   ;;  %v5886_v16 = vld [vmem:[#allocation2 + $0x6cc] ss:$16 sps:$4 sm:$0xff]   ;;  %v5881_v17 = vld [vmem:[#allocation2 + $0x6c0] ss:$16 sps:$4 sm:$0xff]  }
  0xda   :  { %2020 = vmatprep.mubr.bf16.mxu0 %v242_v20  ;;  %2472 = vmatprep.mubr.bf16.mxu1 %v242_v20  ;;  %v124_v20 = vld [vmem:[%s7356_s0 + $0x228] sm:$0xff] }
  0xdc   :  { %2058 = vmatpush1.bf16.msra.mxu0 %v5827_v18  ;;  %2510 = vmatpush1.bf16.msra.mxu1 %v5830_v19  ;;  %v5884_v18 = vld [vmem:[#allocation2 + $0x6c8] ss:$16 sps:$4 sm:$0xff]   ;;  %v211_v19 = vpack.c.bf16 %v115_v14, %v107_v13  ;;  %v5937_v14 = vld [vmem:[#allocation2 + $0x7e4] ss:$16 sps:$4 sm:$0xff]  }
  0xdd   :  { %2059 = vmatprep.subr.bf16.mxu0 %v5835_v23  ;;  %2511 = vmatprep.subr.bf16.mxu1 %v5838_v24  ;;  %v5892_v23 = vld [vmem:[#allocation2 + $0x6ec] ss:$16 sps:$4 sm:$0xff]   ;;  %v5887_v24 = vld [vmem:[#allocation2 + $0x6e0] ss:$16 sps:$4 sm:$0xff]  }
  0xde   :  { %v70_v13 = vld [vmem:[%s7356_s0 + $0x78] sm:$0xff] }
  0xdf   :  { %2021 = vmatmul.mubr.bf16.gmra.mrb[28].mxu0 %v241_v26  ;;  %2473 = vmatmul.mubr.bf16.gmra.mrb[28].mxu1 %v241_v26  ;;  %v220_v26 = vpack.c.bf16 %v132_v21, %v124_v20  ;;  %v69_v20 = vld [vmem:[%s7356_s0 + $0x70] sm:$0xff]  ;;  %v78_v21 = vld [vmem:[%s7356_s0 + $0xb8] sm:$0xff] }
  0xe0   :  { %2060 = vmatpush1.bf16.msra.mxu0 %v5833_v25  ;;  %2512 = vmatpush1.bf16.msra.mxu1 %v5836_v27  ;;  %v5890_v25 = vld [vmem:[#allocation2 + $0x6e8] ss:$16 sps:$4 sm:$0xff]   ;;  %v123_v27 = vld [vmem:[%s7356_s0 + $0x220] sm:$0xff] }
  0xe1   :  { %2061 = vmatprep.subr.bf16.mxu0 %v5841_v30  ;;  %2513 = vmatprep.subr.bf16.mxu1 %v5844_v31  ;;  %v5898_v30 = vld [vmem:[#allocation2 + $0x70c] ss:$16 sps:$4 sm:$0xff]   ;;  %v5893_v31 = vld [vmem:[#allocation2 + $0x700] ss:$16 sps:$4 sm:$0xff]  }
  0xe2   :  { %2063 = vmatprep.mubr.bf16.mxu0 %v188_v33  ;;  %2515 = vmatprep.mubr.bf16.mxu1 %v188_v33  ;;  %v219_v33 = vpack.c.bf16 %v131_v28, %v123_v27  ;;  %v5944_v27 = vld [vmem:[%s7359_s3 + $0x8] ss:$16 sps:$4 sm:$0xff]  }
  0xe4   :  { %2062 = vmatpush1.bf16.msra.mxu0 %v5839_v32  ;;  %2514 = vmatpush1.bf16.msra.mxu1 %v5842_v34  ;;  %v5896_v32 = vld [vmem:[#allocation2 + $0x708] ss:$16 sps:$4 sm:$0xff]  }
  0xe5   :  { %2144 = vmatprep.subr.bf16.mxu0 %v5847_v37  ;;  %2596 = vmatprep.subr.bf16.mxu1 %v5850_v38  ;;  %v140_v34 = vld [vmem:[%s7356_s0 + $0x2a8] sm:$0xff]  ;;  %v5899_v38 = vld [vmem:[#allocation2 + $0x720] ss:$16 sps:$4 sm:$0xff]  }
  0xe6   :  { %v5904_v37 = vld [vmem:[#allocation2 + $0x72c] ss:$16 sps:$4 sm:$0xff]  }
  0xe7   :  { %2064 = vmatmul.mubr.bf16.vlgmr.msra.gmra.mrb[0].mxu0 %v187_v41  ;;  %2516 = vmatmul.mubr.bf16.vlgmr.msra.gmra.mrb[0].mxu1 %v187_v41  ;;  %v139_v41 = vld [vmem:[%s7356_s0 + $0x2a0] sm:$0xff] }
  0xe8   :  { %2145 = vmatpush1.bf16.msra.mxu0 %v5845_v39  ;;  %2597 = vmatpush1.bf16.msra.mxu1 %v5848_v40  ;;  %v5902_v39 = vld [vmem:[#allocation2 + $0x728] ss:$16 sps:$4 sm:$0xff]   ;;  %v228_v40 = vpack.c.bf16 %v148_v35, %v140_v34  ;;  %v5947_v35 = vld [vmem:[%s7359_s3 + $0x20] ss:$16 sps:$4 sm:$0xff]  }
  0xe9   :  { %2146 = vmatprep.subr.bf16.mxu0 %v5853_v44  ;;  %2598 = vmatprep.subr.bf16.mxu1 %v5856_v45  ;;  %v5910_v44 = vld [vmem:[#allocation2 + $0x74c] ss:$16 sps:$4 sm:$0xff]   ;;  %v5905_v45 = vld [vmem:[#allocation2 + $0x740] ss:$16 sps:$4 sm:$0xff]  }
  0xea   :  { %2073 = vmatprep.mubr.bf16.mxu0 %v196_v46  ;;  %2525 = vmatprep.mubr.bf16.mxu1 %v196_v46  ;;  %v5908_v46 = vld [vmem:[#allocation2 + $0x748] ss:$16 sps:$4 sm:$0xff]  }
  0xeb   :  { %v102_v34 = vld [vmem:[%s7356_s0 + $0x178] sm:$0xff] }
  0xec   :  { %2147 = vmatpush1.bf16.msra.mxu0 %v5851_v47  ;;  %2599 = vmatpush1.bf16.msra.mxu1 %v5854_v48  ;;  %v227_v47 = vpack.c.bf16 %v147_v42, %v139_v41  ;;  %v156_v48 = vld [vmem:[%s7356_s0 + $0x328] sm:$0xff] }
  0xed   :  { %2148 = vmatprep.subr.bf16.mxu0 %v5859_v51  ;;  %2600 = vmatprep.subr.bf16.mxu1 %v5862_v52  ;;  %v5916_v51 = vld [vmem:[#allocation2 + $0x76c] ss:$16 sps:$4 sm:$0xff]   ;;  %v5911_v52 = vld [vmem:[#allocation2 + $0x760] ss:$16 sps:$4 sm:$0xff]   ;;  %v5956_v41 = vld [vmem:[%s7359_s3 + $0x48] ss:$16 sps:$4 sm:$0xff]  }
  0xef   :  { %2074 = vmatmul.mubr.bf16.gmra.mrb[4].mxu0 %v195_v55  ;;  %2526 = vmatmul.mubr.bf16.gmra.mrb[4].mxu1 %v195_v55  ;;  %v155_v55 = vld [vmem:[%s7356_s0 + $0x320] sm:$0xff] }
  0xf0   :  { %2149 = vmatpush1.bf16.msra.mxu0 %v5857_v53  ;;  %2601 = vmatpush1.bf16.msra.mxu1 %v5860_v54  ;;  %v5914_v53 = vld [vmem:[#allocation2 + $0x768] ss:$16 sps:$4 sm:$0xff]   ;;  %v236_v54 = vpack.c.bf16 %v164_v49, %v156_v48  ;;  %v5959_v49 = vld [vmem:[%s7359_s3 + $0x60] ss:$16 sps:$4 sm:$0xff]  }
  0xf1   :  { %2150 = vmatprep.subr.bf16.mxu0 %v5865_v58  ;;  %2602 = vmatprep.subr.bf16.mxu1 %v5868_v59  ;;  %v5922_v58 = vld [vmem:[#allocation2 + $0x78c] ss:$16 sps:$4 sm:$0xff]   ;;  %v5917_v59 = vld [vmem:[#allocation2 + $0x780] ss:$16 sps:$4 sm:$0xff]  }
  0xf2   :  { %2083 = vmatprep.mubr.bf16.mxu0 %v204_v60  ;;  %2535 = vmatprep.mubr.bf16.mxu1 %v204_v60  ;;  %v5920_v60 = vld [vmem:[#allocation2 + $0x788] ss:$16 sps:$4 sm:$0xff]  }
  0xf3   :  { %v118_v48 = vld [vmem:[%s7356_s0 + $0x1f8] sm:$0xff] }
  0xf4   :  { %2151 = vmatpush1.bf16.msra.mxu0 %v5863_v61  ;;  %2603 = vmatpush1.bf16.msra.mxu1 %v5866_v62  ;;  %v235_v61 = vpack.c.bf16 %v163_v56, %v155_v55  ;;  %v172_v62 = vld [vmem:[%s7356_s0 + $0x3a8] sm:$0xff] }
  0xf5   :  { %2152 = vmatprep.subr.bf16.mxu0 %v5871_v1  ;;  %2604 = vmatprep.subr.bf16.mxu1 %v5874_v2  ;;  %v5928_v1 = vld [vmem:[#allocation2 + $0x7ac] ss:$16 sps:$4 sm:$0xff]   ;;  %v5923_v2 = vld [vmem:[#allocation2 + $0x7a0] ss:$16 sps:$4 sm:$0xff]   ;;  %v244_v4 = vpack.c.bf16 %v180_v63, %v172_v62  ;;  %v5968_v55 = vld [vmem:[%s7359_s3 + $0x88] ss:$16 sps:$4 sm:$0xff]  }
  0xf6   :  { %v134_v62 = vld [vmem:[%s7356_s0 + $0x278] sm:$0xff]  ;;  %v5971_v63 = vld [vmem:[%s7359_s3 + $0xa0] ss:$16 sps:$4 sm:$0xff]  }
  0xf7   :  { %2084 = vmatmul.mubr.bf16.gmra.mrb[8].mxu0 %v203_v3  ;;  %2536 = vmatmul.mubr.bf16.gmra.mrb[8].mxu1 %v203_v3  ;;  %v5926_v3 = vld [vmem:[#allocation2 + $0x7a8] ss:$16 sps:$4 sm:$0xff]  }
  0xf8   :  { %2153 = vmatpush1.bf16.msra.mxu0 %v5869_v6  ;;  %2605 = vmatpush1.bf16.msra.mxu1 %v5872_v7  ;;  %v179_v6 = vld [vmem:[%s7356_s0 + $0x3e0] sm:$0xff] }
  0xf9   :  { %2154 = vmatprep.subr.bf16.mxu0 %v5877_v8  ;;  %2606 = vmatprep.subr.bf16.mxu1 %v5880_v9  ;;  %v5931_v7 = vld [vmem:[#allocation2 + $0x7c4] ss:$16 sps:$4 sm:$0xff]   ;;  %v5934_v8 = vld [vmem:[#allocation2 + $0x7cc] ss:$16 sps:$4 sm:$0xff]   ;;  %v5929_v9 = vld [vmem:[#allocation2 + $0x7c0] ss:$16 sps:$4 sm:$0xff]  }
  0xfa   :  { %2093 = vmatprep.mubr.bf16.mxu0 %v212_v10  ;;  %2545 = vmatprep.mubr.bf16.mxu1 %v212_v10  ;;  %v5932_v10 = vld [vmem:[#allocation2 + $0x7c8] ss:$16 sps:$4 sm:$0xff]  }
  0xfc   :  { %2155 = vmatpush1.bf16.msra.mxu0 %v5875_v11  ;;  %2607 = vmatpush1.bf16.msra.mxu1 %v5878_v12  ;;  %v243_v11 = vpack.c.bf16 %v179_v6, %v171_v5  ;;  %v62_v12 = vld [vmem:[%s7356_s0 + $0x38] sm:$0xff] }
  0xfd   :  { %2156 = vmatprep.subr.bf16.mxu0 %v5883_v15  ;;  %2608 = vmatprep.subr.bf16.mxu1 %v5886_v16  ;;  %v5940_v15 = vld [vmem:[#allocation2 + $0x7ec] ss:$16 sps:$4 sm:$0xff]   ;;  %v5935_v16 = vld [vmem:[#allocation2 + $0x7e0] ss:$16 sps:$4 sm:$0xff]   ;;  %v5980_v5 = vld [vmem:[%s7359_s3 + $0xc8] ss:$16 sps:$4 sm:$0xff]  }
  0xff   :  { %2094 = vmatmul.mubr.bf16.gmra.mrb[12].mxu0 %v211_v19  ;;  %2546 = vmatmul.mubr.bf16.gmra.mrb[12].mxu1 %v211_v19  ;;  %v61_v19 = vld [vmem:[%s7356_s0 + $0x30] sm:$0xff] }
 0x100   :  { %2157 = vmatpush1.bf16.msra.mxu0 %v5881_v17  ;;  %2609 = vmatpush1.bf16.msra.mxu1 %v5884_v18  ;;  %v5938_v17 = vld [vmem:[#allocation2 + $0x7e8] ss:$16 sps:$4 sm:$0xff]   ;;  %v190_v18 = vpack.c.bf16 %v70_v13, %v62_v12  ;;  %v5983_v13 = vld [vmem:[%s7359_s3 + $0xe0] ss:$16 sps:$4 sm:$0xff]  }
 0x101   :  { %2158 = vmatprep.subr.bf16.mxu0 %v5889_v22  ;;  %2610 = vmatprep.subr.bf16.mxu1 %v5892_v23  ;;  %v86_v22 = vld [vmem:[%s7356_s0 + $0xf8] sm:$0xff]  ;;  %v5943_v23 = vld [vmem:[%s7359_s3 + $0x4] ss:$16 sps:$4 sm:$0xff]  }
 0x102   :  { %2103 = vmatprep.mubr.bf16.mxu0 %v220_v26  ;;  %2555 = vmatprep.mubr.bf16.mxu1 %v220_v26  ;;  %v5941_v26 = vld [vmem:[%s7359_s3] ss:$16 sps:$4 sm:$0xff]   ;;  %v198_v28 = vpack.c.bf16 %v86_v22, %v78_v21  ;;  %v150_v12 = vld [vmem:[%s7356_s0 + $0x2f8] sm:$0xff]  ;;  %v5997_v21 = vld [vmem:[%s7359_s3 + $0x124] ss:$16 sps:$4 sm:$0xff]  }
 0x103   :  { %v6000_v22 = vld [vmem:[%s7359_s3 + $0x12c] ss:$16 sps:$4 sm:$0xff]  }
 0x104   :  { %2159 = vmatpush1.bf16.msra.mxu0 %v5887_v24  ;;  %2611 = vmatpush1.bf16.msra.mxu1 %v5890_v25  ;;  %v5946_v24 = vld [vmem:[%s7359_s3 + $0xc] ss:$16 sps:$4 sm:$0xff]   ;;  %v189_v25 = vpack.c.bf16 %v69_v20, %v61_v19  ;;  %v5992_v19 = vld [vmem:[%s7359_s3 + $0x108] ss:$16 sps:$4 sm:$0xff]  }
 0x105   :  { %2160 = vmatprep.subr.bf16.mxu0 %v5895_v29  ;;  %2612 = vmatprep.subr.bf16.mxu1 %v5898_v30  ;;  %v5949_v29 = vld [vmem:[%s7359_s3 + $0x24] ss:$16 sps:$4 sm:$0xff]   ;;  %v5952_v30 = vld [vmem:[%s7359_s3 + $0x2c] ss:$16 sps:$4 sm:$0xff]  }
 0x107   :  { %2104 = vmatmul.mubr.bf16.gmra.mrb[16].mxu0 %v219_v33  ;;  %2556 = vmatmul.mubr.bf16.gmra.mrb[16].mxu1 %v219_v33  ;;  %v94_v33 = vld [vmem:[%s7356_s0 + $0x138] sm:$0xff] }
 0x108   :  { %2161 = vmatpush1.bf16.msra.mxu0 %v5893_v31  ;;  %2613 = vmatpush1.bf16.msra.mxu1 %v5896_v32  ;;  %v77_v31 = vld [vmem:[%s7356_s0 + $0xb0] sm:$0xff]  ;;  %v206_v42 = vpack.c.bf16 %v102_v34, %v94_v33  ;;  %v6004_v34 = vld [vmem:[%s7359_s3 + $0x148] ss:$16 sps:$4 sm:$0xff]  }
 0x109   :  { %2162 = vmatprep.subr.bf16.mxu0 %v5901_v36  ;;  %2614 = vmatprep.subr.bf16.mxu1 %v5904_v37  ;;  %v85_v32 = vld [vmem:[%s7356_s0 + $0xf0] sm:$0xff]  ;;  %v5950_v36 = vld [vmem:[%s7359_s3 + $0x28] ss:$16 sps:$4 sm:$0xff]  }
 0x10a   :  { %2113 = vmatprep.mubr.bf16.mxu0 %v228_v40  ;;  %2565 = vmatprep.mubr.bf16.mxu1 %v228_v40  ;;  %v5955_v37 = vld [vmem:[%s7359_s3 + $0x44] ss:$16 sps:$4 sm:$0xff]   ;;  %v5953_v40 = vld [vmem:[%s7359_s3 + $0x40] ss:$16 sps:$4 sm:$0xff]  }
 0x10b   :  { %v6001_v33 = vld [vmem:[%s7359_s3 + $0x140] ss:$16 sps:$4 sm:$0xff]  }
 0x10c   :  { %2163 = vmatpush1.bf16.msra.mxu0 %v5899_v38  ;;  %2615 = vmatpush1.bf16.msra.mxu1 %v5902_v39  ;;  %v5958_v38 = vld [vmem:[%s7359_s3 + $0x4c] ss:$16 sps:$4 sm:$0xff]   ;;  %v197_v39 = vpack.c.bf16 %v85_v32, %v77_v31 }
 0x10d   :  { %2164 = vmatprep.subr.bf16.mxu0 %v5907_v43  ;;  %2616 = vmatprep.subr.bf16.mxu1 %v5910_v44  ;;  %v5961_v43 = vld [vmem:[%s7359_s3 + $0x64] ss:$16 sps:$4 sm:$0xff]   ;;  %v5964_v44 = vld [vmem:[%s7359_s3 + $0x6c] ss:$16 sps:$4 sm:$0xff]  }
 0x10f   :  { %2114 = vmatmul.mubr.bf16.gmra.mrb[20].mxu0 %v227_v47  ;;  %2566 = vmatmul.mubr.bf16.gmra.mrb[20].mxu1 %v227_v47  ;;  %v110_v47 = vld [vmem:[%s7356_s0 + $0x1b8] sm:$0xff] }
 0x110   :  { %2165 = vmatpush1.bf16.msra.mxu0 %v5905_v45  ;;  %2617 = vmatpush1.bf16.msra.mxu1 %v5908_v46  ;;  %v93_v45 = vld [vmem:[%s7356_s0 + $0x130] sm:$0xff]  ;;  %v214_v56 = vpack.c.bf16 %v118_v48, %v110_v47  ;;  %v6016_v48 = vld [vmem:[%s7359_s3 + $0x188] ss:$16 sps:$4 sm:$0xff]  }
 0x111   :  { %2166 = vmatprep.subr.bf16.mxu0 %v5913_v50  ;;  %2618 = vmatprep.subr.bf16.mxu1 %v5916_v51  ;;  %v101_v46 = vld [vmem:[%s7356_s0 + $0x170] sm:$0xff]  ;;  %v5962_v50 = vld [vmem:[%s7359_s3 + $0x68] ss:$16 sps:$4 sm:$0xff]  }
 0x112   :  { %2123 = vmatprep.mubr.bf16.mxu0 %v236_v54  ;;  %2575 = vmatprep.mubr.bf16.mxu1 %v236_v54  ;;  %v5967_v51 = vld [vmem:[%s7359_s3 + $0x84] ss:$16 sps:$4 sm:$0xff]   ;;  %v5965_v54 = vld [vmem:[%s7359_s3 + $0x80] ss:$16 sps:$4 sm:$0xff]  }
 0x113   :  { %v6013_v47 = vld [vmem:[%s7359_s3 + $0x180] ss:$16 sps:$4 sm:$0xff]  }
 0x114   :  { %2167 = vmatpush1.bf16.msra.mxu0 %v5911_v52  ;;  %2619 = vmatpush1.bf16.msra.mxu1 %v5914_v53  ;;  %v5970_v52 = vld [vmem:[%s7359_s3 + $0x8c] ss:$16 sps:$4 sm:$0xff]   ;;  %v205_v53 = vpack.c.bf16 %v101_v46, %v93_v45 }
 0x115   :  { %2168 = vmatprep.subr.bf16.mxu0 %v5919_v57  ;;  %2620 = vmatprep.subr.bf16.mxu1 %v5922_v58  ;;  %v5973_v57 = vld [vmem:[%s7359_s3 + $0xa4] ss:$16 sps:$4 sm:$0xff]   ;;  %v5976_v58 = vld [vmem:[%s7359_s3 + $0xac] ss:$16 sps:$4 sm:$0xff]  }
 0x117   :  { %2124 = vmatmul.mubr.bf16.gmra.mrb[24].mxu0 %v235_v61  ;;  %2576 = vmatmul.mubr.bf16.gmra.mrb[24].mxu1 %v235_v61  ;;  %v126_v61 = vld [vmem:[%s7356_s0 + $0x238] sm:$0xff] }
 0x118   :  { %2169 = vmatpush1.bf16.msra.mxu0 %v5917_v59  ;;  %2621 = vmatpush1.bf16.msra.mxu1 %v5920_v60  ;;  %v109_v59 = vld [vmem:[%s7356_s0 + $0x1b0] sm:$0xff]  ;;  %v222_v6 = vpack.c.bf16 %v134_v62, %v126_v61  ;;  %v6036_v61 = vld [vmem:[%s7359_s3 + $0x1ec] ss:$16 sps:$4 sm:$0xff]  }
 0x119   :  { %2170 = vmatprep.subr.bf16.mxu0 %v5925_v0  ;;  %2622 = vmatprep.subr.bf16.mxu1 %v5928_v1  ;;  %v117_v60 = vld [vmem:[%s7356_s0 + $0x1f0] sm:$0xff]  ;;  %v5974_v0 = vld [vmem:[%s7359_s3 + $0xa8] ss:$16 sps:$4 sm:$0xff]  }
 0x11a   :  { %2133 = vmatprep.mubr.bf16.mxu0 %v244_v4  ;;  %2585 = vmatprep.mubr.bf16.mxu1 %v244_v4  ;;  %v5979_v1 = vld [vmem:[%s7359_s3 + $0xc4] ss:$16 sps:$4 sm:$0xff]   ;;  %v5977_v4 = vld [vmem:[%s7359_s3 + $0xc0] ss:$16 sps:$4 sm:$0xff]  }
 0x11b   :  { %v6031_v62 = vld [vmem:[%s7359_s3 + $0x1e0] ss:$16 sps:$4 sm:$0xff]  }
 0x11c   :  { %2171 = vmatpush1.bf16.msra.mxu0 %v5923_v2  ;;  %2623 = vmatpush1.bf16.msra.mxu1 %v5926_v3  ;;  %v5982_v2 = vld [vmem:[%s7359_s3 + $0xcc] ss:$16 sps:$4 sm:$0xff]   ;;  %v213_v3 = vpack.c.bf16 %v117_v60, %v109_v59  ;;  %v6028_v59 = vld [vmem:[%s7359_s3 + $0x1c8] ss:$16 sps:$4 sm:$0xff]   ;;  %v6033_v60 = vld [vmem:[%s7359_s3 + $0x1e4] ss:$16 sps:$4 sm:$0xff]  }
 0x11d   :  { %2172 = vmatprep.subr.bf16.mxu0 %v5931_v7  ;;  %2624 = vmatprep.subr.bf16.mxu1 %v5934_v8  ;;  %v5985_v7 = vld [vmem:[%s7359_s3 + $0xe4] ss:$16 sps:$4 sm:$0xff]   ;;  %v5988_v8 = vld [vmem:[%s7359_s3 + $0xec] ss:$16 sps:$4 sm:$0xff]  }
 0x11f   :  { %2134 = vmatmul.mubr.bf16.gmra.mrb[28].mxu0 %v243_v11  ;;  %2586 = vmatmul.mubr.bf16.gmra.mrb[28].mxu1 %v243_v11  ;;  %v142_v11 = vld [vmem:[%s7356_s0 + $0x2b8] sm:$0xff] }
 0x120   :  { %2173 = vmatpush1.bf16.msra.mxu0 %v5929_v9  ;;  %2625 = vmatpush1.bf16.msra.mxu1 %v5932_v10  ;;  %v125_v9 = vld [vmem:[%s7356_s0 + $0x230] sm:$0xff]  ;;  %v230_v20 = vpack.c.bf16 %v150_v12, %v142_v11 }
 0x121   :  { %2174 = vmatprep.subr.bf16.mxu0 %v5937_v14  ;;  %2626 = vmatprep.subr.bf16.mxu1 %v5940_v15  ;;  %v133_v10 = vld [vmem:[%s7356_s0 + $0x270] sm:$0xff]  ;;  %v5986_v14 = vld [vmem:[%s7359_s3 + $0xe8] ss:$16 sps:$4 sm:$0xff]  }
 0x122   :  { %2176 = vmatprep.mubr.bf16.mxu0 %v190_v18  ;;  %2628 = vmatprep.mubr.bf16.mxu1 %v190_v18  ;;  %v5991_v15 = vld [vmem:[%s7359_s3 + $0x104] ss:$16 sps:$4 sm:$0xff]   ;;  %v5989_v18 = vld [vmem:[%s7359_s3 + $0x100] ss:$16 sps:$4 sm:$0xff]  }
 0x124   :  { %2175 = vmatpush1.bf16.msra.mxu0 %v5935_v16  ;;  %2627 = vmatpush1.bf16.msra.mxu1 %v5938_v17  ;;  %v5994_v16 = vld [vmem:[%s7359_s3 + $0x10c] ss:$16 sps:$4 sm:$0xff]   ;;  %v221_v17 = vpack.c.bf16 %v133_v10, %v125_v9 }
 0x125   :  { %3595 = vmatprep.subr.bf16.mxu0 %v5943_v23  ;;  %3821 = vmatprep.subr.bf16.mxu1 %v5946_v24  ;;  %v141_v23 = vld [vmem:[%s7356_s0 + $0x2b0] sm:$0xff] }
 0x126   :  { %v149_v24 = vld [vmem:[%s7356_s0 + $0x2f0] sm:$0xff] }
 0x127   :  { %2177 = vmatmul.mubr.bf16.vlgmr.msra.gmra.mrb[0].mxu0 %v189_v25  ;;  %2629 = vmatmul.mubr.bf16.vlgmr.msra.gmra.mrb[0].mxu1 %v189_v25  ;;  %v158_v25 = vld [vmem:[%s7356_s0 + $0x338] sm:$0xff]  ;;  %v229_v31 = vpack.c.bf16 %v149_v24, %v141_v23 }
 0x128   :  { %2186 = vmatprep.mubr.bf16.mxu0 %v198_v28  ;;  %2638 = vmatprep.mubr.bf16.mxu1 %v198_v28  ;;  %v5998_v28 = vld [vmem:[%s7359_s3 + $0x128] ss:$16 sps:$4 sm:$0xff]  }
 0x129   :  { %3596 = vmatpush1.bf16.msra.mxu0 %v5941_v26  ;;  %3822 = vmatpush1.bf16.msra.mxu1 %v5944_v27  ;;  %v166_v26 = vld [vmem:[%s7356_s0 + $0x378] sm:$0xff]  ;;  %v5995_v27 = vld [vmem:[%s7359_s3 + $0x120] ss:$16 sps:$4 sm:$0xff]  }
 0x12a   :  { %3597 = vmatprep.subr.bf16.mxu0 %v5949_v29  ;;  %3823 = vmatprep.subr.bf16.mxu1 %v5952_v30  ;;  %v6003_v29 = vld [vmem:[%s7359_s3 + $0x144] ss:$16 sps:$4 sm:$0xff]   ;;  %v6006_v30 = vld [vmem:[%s7359_s3 + $0x14c] ss:$16 sps:$4 sm:$0xff]   ;;  %v238_v32 = vpack.c.bf16 %v166_v26, %v158_v25 }
 0x12d   :  { %3598 = vmatpush1.bf16.msra.mxu0 %v5947_v35  ;;  %3824 = vmatpush1.bf16.msra.mxu1 %v5950_v36  ;;  %v6009_v35 = vld [vmem:[%s7359_s3 + $0x164] ss:$16 sps:$4 sm:$0xff]   ;;  %v6012_v36 = vld [vmem:[%s7359_s3 + $0x16c] ss:$16 sps:$4 sm:$0xff]  }
 0x12e   :  { %3599 = vmatprep.subr.bf16.mxu0 %v5955_v37  ;;  %3825 = vmatprep.subr.bf16.mxu1 %v5958_v38  ;;  %v157_v37 = vld [vmem:[%s7356_s0 + $0x330] sm:$0xff] }
 0x12f   :  { %2187 = vmatmul.mubr.bf16.gmra.mrb[4].mxu0 %v197_v39  ;;  %2639 = vmatmul.mubr.bf16.gmra.mrb[4].mxu1 %v197_v39  ;;  %v165_v38 = vld [vmem:[%s7356_s0 + $0x370] sm:$0xff]  ;;  %v174_v39 = vld [vmem:[%s7356_s0 + $0x3b8] sm:$0xff] }
 0x130   :  { %2196 = vmatprep.mubr.bf16.mxu0 %v206_v42  ;;  %2648 = vmatprep.mubr.bf16.mxu1 %v206_v42  ;;  %v6010_v42 = vld [vmem:[%s7359_s3 + $0x168] ss:$16 sps:$4 sm:$0xff]   ;;  %v237_v45 = vpack.c.bf16 %v165_v38, %v157_v37 }
 0x131   :  { %3600 = vmatpush1.bf16.msra.mxu0 %v5953_v40  ;;  %3826 = vmatpush1.bf16.msra.mxu1 %v5956_v41  ;;  %v182_v40 = vld [vmem:[%s7356_s0 + $0x3f8] sm:$0xff]  ;;  %v6007_v41 = vld [vmem:[%s7359_s3 + $0x160] ss:$16 sps:$4 sm:$0xff]  }
 0x132   :  { %3601 = vmatprep.subr.bf16.mxu0 %v5961_v43  ;;  %3827 = vmatprep.subr.bf16.mxu1 %v5964_v44  ;;  %v6015_v43 = vld [vmem:[%s7359_s3 + $0x184] ss:$16 sps:$4 sm:$0xff]   ;;  %v6018_v44 = vld [vmem:[%s7359_s3 + $0x18c] ss:$16 sps:$4 sm:$0xff]   ;;  %v246_v46 = vpack.c.bf16 %v182_v40, %v174_v39 }
 0x135   :  { %3602 = vmatpush1.bf16.msra.mxu0 %v5959_v49  ;;  %3828 = vmatpush1.bf16.msra.mxu1 %v5962_v50  ;;  %v6021_v49 = vld [vmem:[%s7359_s3 + $0x1a4] ss:$16 sps:$4 sm:$0xff]   ;;  %v6024_v50 = vld [vmem:[%s7359_s3 + $0x1ac] ss:$16 sps:$4 sm:$0xff]  }
 0x136   :  { %3603 = vmatprep.subr.bf16.mxu0 %v5967_v51  ;;  %3829 = vmatprep.subr.bf16.mxu1 %v5970_v52  ;;  %v173_v51 = vld [vmem:[%s7356_s0 + $0x3b0] sm:$0xff] }
 0x137   :  { %2197 = vmatmul.mubr.bf16.gmra.mrb[8].mxu0 %v205_v53  ;;  %2649 = vmatmul.mubr.bf16.gmra.mrb[8].mxu1 %v205_v53  ;;  %v181_v52 = vld [vmem:[%s7356_s0 + $0x3f0] sm:$0xff] }
 0x138   :  { %2206 = vmatprep.mubr.bf16.mxu0 %v214_v56  ;;  %2658 = vmatprep.mubr.bf16.mxu1 %v214_v56  ;;  %v6019_v53 = vld [vmem:[%s7359_s3 + $0x1a0] ss:$16 sps:$4 sm:$0xff]   ;;  %v6027_v56 = vld [vmem:[%s7359_s3 + $0x1c4] ss:$16 sps:$4 sm:$0xff]  }
 0x139   :  { %3604 = vmatpush1.bf16.msra.mxu0 %v5965_v54  ;;  %3830 = vmatpush1.bf16.msra.mxu1 %v5968_v55  ;;  %v6022_v54 = vld [vmem:[%s7359_s3 + $0x1a8] ss:$16 sps:$4 sm:$0xff]   ;;  %v245_v55 = vpack.c.bf16 %v181_v52, %v173_v51 }
 0x13a   :  { %3605 = vmatprep.subr.bf16.mxu0 %v5973_v57  ;;  %3831 = vmatprep.subr.bf16.mxu1 %v5976_v58  ;;  %v6030_v57 = vld [vmem:[%s7359_s3 + $0x1cc] ss:$16 sps:$4 sm:$0xff]   ;;  %v6025_v58 = vld [vmem:[%s7359_s3 + $0x1c0] ss:$16 sps:$4 sm:$0xff]  }
 0x13d   :  { %3606 = vmatpush1.bf16.msra.mxu0 %v5971_v63  ;;  %3832 = vmatpush1.bf16.msra.mxu1 %v5974_v0  ;;  %v6034_v63 = vld [vmem:[%s7359_s3 + $0x1e8] ss:$16 sps:$4 sm:$0xff]   ;;  %v6039_v0 = vld [vmem:[%s7359_s3 + $0x204] ss:$16 sps:$4 sm:$0xff]  }
 0x13e   :  { %3607 = vmatprep.subr.bf16.mxu0 %v5979_v1  ;;  %3833 = vmatprep.subr.bf16.mxu1 %v5982_v2  ;;  %v6042_v1 = vld [vmem:[%s7359_s3 + $0x20c] ss:$16 sps:$4 sm:$0xff]   ;;  %v505_v2 = vlaneseq }
 0x13f   :  { %2207 = vmatmul.mubr.bf16.gmra.mrb[12].mxu0 %v213_v3  ;;  %2659 = vmatmul.mubr.bf16.gmra.mrb[12].mxu1 %v213_v3 }
 0x140   :  { %2216 = vmatprep.mubr.bf16.mxu0 %v222_v6  ;;  %2668 = vmatprep.mubr.bf16.mxu1 %v222_v6  ;;  %v6865_v3 = vshrl.u32 %v505_v2, 7  ;;  %v503_v6 = vld [vmem:[%s7358_s2] sm:$0xf] }
 0x141   :  { %3608 = vmatpush1.bf16.msra.mxu0 %v5977_v4  ;;  %3834 = vmatpush1.bf16.msra.mxu1 %v5980_v5 }
 0x142   :  { %3609 = vmatprep.subr.bf16.mxu0 %v5985_v7  ;;  %3835 = vmatprep.subr.bf16.mxu1 %v5988_v8  ;;  %v507_v4 = vsub.s32 0, %v6865_v3  ;;  %v515_v5 = vsub.s32 2, %v6865_v3  ;;  %v511_v7 = vsub.s32 1, %v6865_v3  ;;  %v519_v8 = vsub.s32 3, %v6865_v3 }
 0x144   :  { %v6876_v9 = vrot.slane %v503_v6, %v507_v4  ;;  %v6880_v10 = vrot.slane %v503_v6, %v515_v5  ;;  %v6884_v11 = vrot.slane %v503_v6, %v511_v7  ;;  %v6888_v12 = vrot.slane %v503_v6, %v519_v8 }
 0x145   :  { %3610 = vmatpush1.bf16.msra.mxu0 %v5983_v13  ;;  %3836 = vmatpush1.bf16.msra.mxu1 %v5986_v14 }
 0x146   :  { %3611 = vmatprep.subr.bf16.mxu0 %v5991_v15  ;;  %3837 = vmatprep.subr.bf16.mxu1 %v5994_v16 }
 0x147   :  { %2217 = vmatmul.mubr.bf16.gmra.mrb[16].mxu0 %v221_v17  ;;  %2669 = vmatmul.mubr.bf16.gmra.mrb[16].mxu1 %v221_v17 }
 0x148   :  { %2226 = vmatprep.mubr.bf16.mxu0 %v230_v20  ;;  %2678 = vmatprep.mubr.bf16.mxu1 %v230_v20 }
 0x149   :  { %3612 = vmatpush1.bf16.msra.mxu0 %v5989_v18  ;;  %3838 = vmatpush1.bf16.msra.mxu1 %v5992_v19 }
 0x14a   :  { %3613 = vmatprep.subr.bf16.mxu0 %v5997_v21  ;;  %3839 = vmatprep.subr.bf16.mxu1 %v6000_v22 }
 0x14d   :  { %3614 = vmatpush1.bf16.msra.mxu0 %v5995_v27  ;;  %3840 = vmatpush1.bf16.msra.mxu1 %v5998_v28 }
 0x14e   :  { %3615 = vmatprep.subr.bf16.mxu0 %v6003_v29  ;;  %3841 = vmatprep.subr.bf16.mxu1 %v6006_v30 }
 0x14f   :  { %2227 = vmatmul.mubr.bf16.gmra.mrb[20].mxu0 %v229_v31  ;;  %2679 = vmatmul.mubr.bf16.gmra.mrb[20].mxu1 %v229_v31 }
 0x150   :  { %2236 = vmatprep.mubr.bf16.mxu0 %v238_v32  ;;  %2688 = vmatprep.mubr.bf16.mxu1 %v238_v32 }
 0x151   :  { %3616 = vmatpush1.bf16.msra.mxu0 %v6001_v33  ;;  %3842 = vmatpush1.bf16.msra.mxu1 %v6004_v34 }
 0x152   :  { %3617 = vmatprep.subr.bf16.mxu0 %v6009_v35  ;;  %3843 = vmatprep.subr.bf16.mxu1 %v6012_v36 }
 0x155   :  { %3618 = vmatpush1.bf16.msra.mxu0 %v6007_v41  ;;  %3844 = vmatpush1.bf16.msra.mxu1 %v6010_v42 }
 0x156   :  { %3619 = vmatprep.subr.bf16.mxu0 %v6015_v43  ;;  %3845 = vmatprep.subr.bf16.mxu1 %v6018_v44  ;;  %v6037_v43 = vld [vmem:[%s7359_s3 + $0x200] ss:$16 sps:$4 sm:$0xff]   ;;  %v6040_v44 = vld [vmem:[%s7359_s3 + $0x208] ss:$16 sps:$4 sm:$0xff]  }
 0x157   :  { %2237 = vmatmul.mubr.bf16.gmra.mrb[24].mxu0 %v237_v45  ;;  %2689 = vmatmul.mubr.bf16.gmra.mrb[24].mxu1 %v237_v45 }
 0x158   :  { %2246 = vmatprep.mubr.bf16.mxu0 %v246_v46  ;;  %2698 = vmatprep.mubr.bf16.mxu1 %v246_v46 }
 0x159   :  { %3620 = vmatpush1.bf16.msra.mxu0 %v6013_v47  ;;  %3846 = vmatpush1.bf16.msra.mxu1 %v6016_v48 }
 0x15a   :  { %3621 = vmatprep.subr.bf16.mxu0 %v6021_v49  ;;  %3847 = vmatprep.subr.bf16.mxu1 %v6024_v50  ;;  %v6045_v49 = vld [vmem:[%s7359_s3 + $0x224] ss:$16 sps:$4 sm:$0xff]   ;;  %v6048_v50 = vld [vmem:[%s7359_s3 + $0x22c] ss:$16 sps:$4 sm:$0xff]  }
 0x15d   :  { %3622 = vmatpush1.bf16.msra.mxu0 %v6019_v53  ;;  %3848 = vmatpush1.bf16.msra.mxu1 %v6022_v54 }
 0x15e   :  { %3623 = vmatprep.subr.bf16.mxu0 %v6027_v56  ;;  %3849 = vmatprep.subr.bf16.mxu1 %v6030_v57 }
 0x15f   :  { %2247 = vmatmul.mubr.bf16.gmra.mrb[28].mxu0 %v245_v55  ;;  %2699 = vmatmul.mubr.bf16.gmra.mrb[28].mxu1 %v245_v55 }
 0x161   :  { %3624 = vmatpush1.bf16.msra.mxu0 %v6025_v58  ;;  %3850 = vmatpush1.bf16.msra.mxu1 %v6028_v59 }
 0x162   :  { %3625 = vmatprep.subr.bf16.mxu0 %v6033_v60  ;;  %3851 = vmatprep.subr.bf16.mxu1 %v6036_v61  ;;  %v6043_v61 = vld [vmem:[%s7359_s3 + $0x220] ss:$16 sps:$4 sm:$0xff]  }
 0x165   :  { %3626 = vmatpush1.bf16.msra.mxu0 %v6031_v62  ;;  %3852 = vmatpush1.bf16.msra.mxu1 %v6034_v63  ;;  %v6046_v62 = vld [vmem:[%s7359_s3 + $0x228] ss:$16 sps:$4 sm:$0xff]   ;;  %v6051_v63 = vld [vmem:[%s7359_s3 + $0x244] ss:$16 sps:$4 sm:$0xff]  }
 0x166   :  { %3708 = vmatprep.subr.bf16.mxu0 %v6039_v0  ;;  %3934 = vmatprep.subr.bf16.mxu1 %v6042_v1 }
 0x1fa   :  { %v2178_v13 = vpop.f32.mrb[0].mxu0  ;;  %v2630_v14 = vpop.f32.mrb[0].mxu1 }
 0x1fb   :  { %v5167_v15 = vadd.f32 %v2178_v13, %v6876_v9  ;;  %v5199_v16 = vadd.f32 %v2630_v14, %v6880_v10  ;;  %v2180_v17 = vpop.f32.mrb[1].mxu0  ;;  %v2632_v18 = vpop.f32.mrb[1].mxu1  ;;  %v6054_v13 = vld [vmem:[%s7359_s3 + $0x24c] ss:$16 sps:$4 sm:$0xff]  }
 0x1fc   :  { %v5168_v19 = vadd.f32 %v2180_v17, %v6884_v11  ;;  %v5200_v20 = vadd.f32 %v2632_v18, %v6888_v12  ;;  %v2182_v21 = vpop.f32.mrb[2].mxu0  ;;  %v2634_v22 = vpop.f32.mrb[2].mxu1 }
 0x1fd   :  { %v5169_v23 = vadd.f32 %v2182_v21, %v6876_v9  ;;  %v5201_v24 = vadd.f32 %v2634_v22, %v6880_v10  ;;  %v2184_v25 = vpop.f32.mrb[3].mxu0  ;;  %v2636_v26 = vpop.f32.mrb[3].mxu1  ;;  %v2709_v29 = vmax.f32 %v5167_v15, 0.0  ;;  %v2711_v30 = vmax.f32 %v5199_v16, 0.0 }
 0x1fe   :  { %v5170_v27 = vadd.f32 %v2184_v25, %v6884_v11  ;;  %v5202_v28 = vadd.f32 %v2636_v26, %v6888_v12  ;;  %v2710_v33 = vmax.f32 %v5168_v19, 0.0  ;;  %v2712_v34 = vmax.f32 %v5200_v20, 0.0  ;;  %v6052_v25 = vld [vmem:[%s7359_s3 + $0x248] ss:$16 sps:$4 sm:$0xff]  }
 0x1ff   :  { %v2713_v31 = vmax.f32 %v5169_v23, 0.0  ;;  %v2715_v32 = vmax.f32 %v5201_v24, 0.0  ;;  %v6049_v24 = vld [vmem:[%s7359_s3 + $0x240] ss:$16 sps:$4 sm:$0xff]  }
 0x200   :  { %v2714_v35 = vmax.f32 %v5170_v27, 0.0  ;;  %v2716_v36 = vmax.f32 %v5202_v28, 0.0 }
 0x201   :  { %v2773_v37 = vpack.c.bf16 %v2713_v31, %v2709_v29  ;;  %v6898_v38 = vpack.c.bf16 %v2715_v32, %v2711_v30  ;;  %v6057_v30 = vld [vmem:[%s7359_s3 + $0x264] ss:$16 sps:$4 sm:$0xff]   ;;  %v6060_v31 = vld [vmem:[%s7359_s3 + $0x26c] ss:$16 sps:$4 sm:$0xff]  }
 0x202   :  { %v2774_v39 = vpack.c.bf16 %v2714_v35, %v2710_v33  ;;  %v6900_v40 = vpack.c.bf16 %v2716_v36, %v2712_v34  ;;  %v2188_v41 = vpop.f32.mrb[4].mxu0  ;;  %v2640_v42 = vpop.f32.mrb[4].mxu1 }
 0x203   :  { %v5171_v45 = vadd.f32 %v2188_v41, %v6876_v9  ;;  %v5203_v46 = vadd.f32 %v2640_v42, %v6880_v10  ;;  %v2190_v47 = vpop.f32.mrb[5].mxu0  ;;  %v2642_v48 = vpop.f32.mrb[5].mxu1 }
 0x204   :  { %v5172_v51 = vadd.f32 %v2190_v47, %v6884_v11  ;;  %v5204_v52 = vadd.f32 %v2642_v48, %v6888_v12  ;;  %v2192_v53 = vpop.f32.mrb[6].mxu0  ;;  %v2644_v54 = vpop.f32.mrb[6].mxu1  ;;  %3627 = vmatprep.mubr.bf16.mxu0 %v2774_v39  ;;  %3853 = vmatprep.mubr.bf16.mxu1 %v2774_v39 }
 0x205   :  { %v5173_v55 = vadd.f32 %v2192_v53, %v6876_v9  ;;  %v5205_v56 = vadd.f32 %v2644_v54, %v6880_v10  ;;  %v2194_v57 = vpop.f32.mrb[7].mxu0  ;;  %v2646_v58 = vpop.f32.mrb[7].mxu1  ;;  %3628 = vmatmul.mubr.bf16.vlgmr.msra.gmra.mrb[32].mxu0 %v2773_v37  ;;  %3854 = vmatmul.mubr.bf16.vlgmr.msra.gmra.mrb[32].mxu1 %v2773_v37  ;;  %v2717_v0 = vmax.f32 %v5171_v45, 0.0  ;;  %v2719_v1 = vmax.f32 %v5203_v46, 0.0  ;;  %v6058_v45 = vld [vmem:[%s7359_s3 + $0x268] ss:$16 sps:$4 sm:$0xff]  }
 0x206   :  { %v5174_v59 = vadd.f32 %v2194_v57, %v6884_v11  ;;  %v5206_v60 = vadd.f32 %v2646_v58, %v6888_v12  ;;  %3709 = vmatpush1.bf16.msra.mxu0 %v6037_v43  ;;  %3935 = vmatpush1.bf16.msra.mxu1 %v6040_v44  ;;  %v2718_v14 = vmax.f32 %v5172_v51, 0.0  ;;  %v2720_v15 = vmax.f32 %v5204_v52, 0.0  ;;  %v6055_v44 = vld [vmem:[%s7359_s3 + $0x260] ss:$16 sps:$4 sm:$0xff]   ;;  %v6063_v46 = vld [vmem:[%s7359_s3 + $0x284] ss:$16 sps:$4 sm:$0xff]  }
 0x207   :  { %v2721_v2 = vmax.f32 %v5173_v55, 0.0  ;;  %v2723_v6 = vmax.f32 %v5205_v56, 0.0  ;;  %3710 = vmatprep.subr.bf16.mxu0 %v6045_v49  ;;  %3936 = vmatprep.subr.bf16.mxu1 %v6048_v50  ;;  %v6066_v51 = vld [vmem:[%s7359_s3 + $0x28c] ss:$16 sps:$4 sm:$0xff]  }
 0x208   :  { %v2722_v16 = vmax.f32 %v5174_v59, 0.0  ;;  %v2724_v17 = vmax.f32 %v5206_v60, 0.0 }
 0x209   :  { %v2777_v18 = vpack.c.bf16 %v2721_v2, %v2717_v0  ;;  %v6934_v19 = vpack.c.bf16 %v2723_v6, %v2719_v1 }
 0x20a   :  { %v2778_v20 = vpack.c.bf16 %v2722_v16, %v2718_v14  ;;  %v6936_v21 = vpack.c.bf16 %v2724_v17, %v2720_v15  ;;  %v2198_v22 = vpop.f32.mrb[8].mxu0  ;;  %v2650_v23 = vpop.f32.mrb[8].mxu1  ;;  %3711 = vmatpush1.bf16.msra.mxu0 %v6043_v61  ;;  %3937 = vmatpush1.bf16.msra.mxu1 %v6046_v62  ;;  %v6061_v62 = vld [vmem:[%s7359_s3 + $0x280] ss:$16 sps:$4 sm:$0xff]   ;;  %v6072_v14 = vld [vmem:[%s7359_s3 + $0x2ac] ss:$16 sps:$4 sm:$0xff]  }
 0x20b   :  { %v5175_v26 = vadd.f32 %v2198_v22, %v6876_v9  ;;  %v5207_v27 = vadd.f32 %v2650_v23, %v6880_v10  ;;  %v2200_v28 = vpop.f32.mrb[9].mxu0  ;;  %v2652_v29 = vpop.f32.mrb[9].mxu1  ;;  %3712 = vmatprep.subr.bf16.mxu0 %v6051_v63  ;;  %3938 = vmatprep.subr.bf16.mxu1 %v6054_v13  ;;  %v6064_v63 = vld [vmem:[%s7359_s3 + $0x288] ss:$16 sps:$4 sm:$0xff]   ;;  %v6069_v13 = vld [vmem:[%s7359_s3 + $0x2a4] ss:$16 sps:$4 sm:$0xff]  }
 0x20c   :  { %v5176_v32 = vadd.f32 %v2200_v28, %v6884_v11  ;;  %v5208_v33 = vadd.f32 %v2652_v29, %v6888_v12  ;;  %v2202_v34 = vpop.f32.mrb[10].mxu0  ;;  %v2654_v35 = vpop.f32.mrb[10].mxu1  ;;  %3637 = vmatprep.mubr.bf16.mxu0 %v2778_v20  ;;  %3863 = vmatprep.mubr.bf16.mxu1 %v2778_v20  ;;  %v6070_v28 = vld [vmem:[%s7359_s3 + $0x2a8] ss:$16 sps:$4 sm:$0xff]   ;;  %v6075_v29 = vld [vmem:[%s7359_s3 + $0x2c4] ss:$16 sps:$4 sm:$0xff]  }
 0x20d   :  { %v5177_v36 = vadd.f32 %v2202_v34, %v6876_v9  ;;  %v5209_v37 = vadd.f32 %v2654_v35, %v6880_v10  ;;  %v2204_v39 = vpop.f32.mrb[11].mxu0  ;;  %v2656_v41 = vpop.f32.mrb[11].mxu1  ;;  %3638 = vmatmul.mubr.bf16.gmra.mrb[36].mxu0 %v2777_v18  ;;  %3864 = vmatmul.mubr.bf16.gmra.mrb[36].mxu1 %v2777_v18  ;;  %v2725_v47 = vmax.f32 %v5175_v26, 0.0  ;;  %v2727_v48 = vmax.f32 %v5207_v27, 0.0  ;;  %v6067_v27 = vld [vmem:[%s7359_s3 + $0x2a0] ss:$16 sps:$4 sm:$0xff]  }
 0x20e   :  { %v5178_v42 = vadd.f32 %v2204_v39, %v6884_v11  ;;  %v5210_v43 = vadd.f32 %v2656_v41, %v6888_v12  ;;  %3713 = vmatpush1.bf16.msra.mxu0 %v6049_v24  ;;  %3939 = vmatpush1.bf16.msra.mxu1 %v6052_v25  ;;  %v2726_v52 = vmax.f32 %v5176_v32, 0.0  ;;  %v2728_v53 = vmax.f32 %v5208_v33, 0.0  ;;  %v6078_v34 = vld [vmem:[%s7359_s3 + $0x2cc] ss:$16 sps:$4 sm:$0xff]  }
 0x20f   :  { %v2729_v49 = vmax.f32 %v5177_v36, 0.0  ;;  %v2731_v50 = vmax.f32 %v5209_v37, 0.0  ;;  %3714 = vmatprep.subr.bf16.mxu0 %v6057_v30  ;;  %3940 = vmatprep.subr.bf16.mxu1 %v6060_v31 }
 0x210   :  { %v2730_v54 = vmax.f32 %v5178_v42, 0.0  ;;  %v2732_v55 = vmax.f32 %v5210_v43, 0.0 }
 0x211   :  { %v2781_v56 = vpack.c.bf16 %v2729_v49, %v2725_v47  ;;  %v6970_v57 = vpack.c.bf16 %v2731_v50, %v2727_v48  ;;  %v6073_v47 = vld [vmem:[%s7359_s3 + $0x2c0] ss:$16 sps:$4 sm:$0xff]   ;;  %v6076_v48 = vld [vmem:[%s7359_s3 + $0x2c8] ss:$16 sps:$4 sm:$0xff]  }
 0x212   :  { %v2782_v58 = vpack.c.bf16 %v2730_v54, %v2726_v52  ;;  %v6972_v59 = vpack.c.bf16 %v2732_v55, %v2728_v53  ;;  %v2208_v60 = vpop.f32.mrb[12].mxu0  ;;  %v2660_v61 = vpop.f32.mrb[12].mxu1  ;;  %3715 = vmatpush1.bf16.msra.mxu0 %v6055_v44  ;;  %3941 = vmatpush1.bf16.msra.mxu1 %v6058_v45  ;;  %v6081_v53 = vld [vmem:[%s7359_s3 + $0x2e4] ss:$16 sps:$4 sm:$0xff]   ;;  %v6084_v54 = vld [vmem:[%s7359_s3 + $0x2ec] ss:$16 sps:$4 sm:$0xff]  }
 0x213   :  { %v5179_v0 = vadd.f32 %v2208_v60, %v6876_v9  ;;  %v5211_v1 = vadd.f32 %v2660_v61, %v6880_v10  ;;  %v2210_v2 = vpop.f32.mrb[13].mxu0  ;;  %v2662_v6 = vpop.f32.mrb[13].mxu1  ;;  %3716 = vmatprep.subr.bf16.mxu0 %v6063_v46  ;;  %3942 = vmatprep.subr.bf16.mxu1 %v6066_v51 }
 0x214   :  { %v5180_v15 = vadd.f32 %v2210_v2, %v6884_v11  ;;  %v5212_v16 = vadd.f32 %v2662_v6, %v6888_v12  ;;  %v2212_v17 = vpop.f32.mrb[14].mxu0  ;;  %v2664_v18 = vpop.f32.mrb[14].mxu1  ;;  %3647 = vmatprep.mubr.bf16.mxu0 %v2782_v58  ;;  %3873 = vmatprep.mubr.bf16.mxu1 %v2782_v58  ;;  %v6079_v6 = vld [vmem:[%s7359_s3 + $0x2e0] ss:$16 sps:$4 sm:$0xff]  }
 0x215   :  { %v5181_v20 = vadd.f32 %v2212_v17, %v6876_v9  ;;  %v5213_v22 = vadd.f32 %v2664_v18, %v6880_v10  ;;  %v2214_v23 = vpop.f32.mrb[15].mxu0  ;;  %v2666_v24 = vpop.f32.mrb[15].mxu1  ;;  %3648 = vmatmul.mubr.bf16.gmra.mrb[40].mxu0 %v2781_v56  ;;  %3874 = vmatmul.mubr.bf16.gmra.mrb[40].mxu1 %v2781_v56  ;;  %v2733_v30 = vmax.f32 %v5179_v0, 0.0  ;;  %v2735_v31 = vmax.f32 %v5211_v1, 0.0 }
 0x216   :  { %v5182_v25 = vadd.f32 %v2214_v23, %v6884_v11  ;;  %v5214_v26 = vadd.f32 %v2666_v24, %v6888_v12  ;;  %3717 = vmatpush1.bf16.msra.mxu0 %v6061_v62  ;;  %3943 = vmatpush1.bf16.msra.mxu1 %v6064_v63  ;;  %v2734_v35 = vmax.f32 %v5180_v15, 0.0  ;;  %v2736_v36 = vmax.f32 %v5212_v16, 0.0 }
 0x217   :  { %v2737_v32 = vmax.f32 %v5181_v20, 0.0  ;;  %v2739_v33 = vmax.f32 %v5213_v22, 0.0  ;;  %3718 = vmatprep.subr.bf16.mxu0 %v6069_v13  ;;  %3944 = vmatprep.subr.bf16.mxu1 %v6072_v14  ;;  %v6082_v13 = vld [vmem:[%s7359_s3 + $0x2e8] ss:$16 sps:$4 sm:$0xff]   ;;  %v6087_v14 = vld [vmem:[%s7359_s3 + $0x304] ss:$16 sps:$4 sm:$0xff]  }
 0x218   :  { %v2738_v37 = vmax.f32 %v5182_v25, 0.0  ;;  %v2740_v39 = vmax.f32 %v5214_v26, 0.0  ;;  %v6090_v20 = vld [vmem:[%s7359_s3 + $0x30c] ss:$16 sps:$4 sm:$0xff]  }
 0x219   :  { %v2785_v41 = vpack.c.bf16 %v2737_v32, %v2733_v30  ;;  %v7006_v42 = vpack.c.bf16 %v2739_v33, %v2735_v31  ;;  %v6085_v32 = vld [vmem:[%s7359_s3 + $0x300] ss:$16 sps:$4 sm:$0xff]   ;;  %v6088_v33 = vld [vmem:[%s7359_s3 + $0x308] ss:$16 sps:$4 sm:$0xff]  }
 0x21a   :  { %v2786_v43 = vpack.c.bf16 %v2738_v37, %v2734_v35  ;;  %v7008_v44 = vpack.c.bf16 %v2740_v39, %v2736_v36  ;;  %v2218_v45 = vpop.f32.mrb[16].mxu0  ;;  %v2670_v46 = vpop.f32.mrb[16].mxu1  ;;  %3719 = vmatpush1.bf16.msra.mxu0 %v6067_v27  ;;  %3945 = vmatpush1.bf16.msra.mxu1 %v6070_v28  ;;  %v6093_v39 = vld [vmem:[%s7359_s3 + $0x324] ss:$16 sps:$4 sm:$0xff]  }
 0x21b   :  { %v5183_v49 = vadd.f32 %v2218_v45, %v6876_v9  ;;  %v5215_v50 = vadd.f32 %v2670_v46, %v6880_v10  ;;  %v2220_v51 = vpop.f32.mrb[17].mxu0  ;;  %v2672_v52 = vpop.f32.mrb[17].mxu1  ;;  %3720 = vmatprep.subr.bf16.mxu0 %v6075_v29  ;;  %3946 = vmatprep.subr.bf16.mxu1 %v6078_v34 }
 0x21c   :  { %v5184_v55 = vadd.f32 %v2220_v51, %v6884_v11  ;;  %v5216_v56 = vadd.f32 %v2672_v52, %v6888_v12  ;;  %v2222_v58 = vpop.f32.mrb[18].mxu0  ;;  %v2674_v60 = vpop.f32.mrb[18].mxu1  ;;  %3657 = vmatprep.mubr.bf16.mxu0 %v2786_v43  ;;  %3883 = vmatprep.mubr.bf16.mxu1 %v2786_v43 }
 0x21d   :  { %v5185_v61 = vadd.f32 %v2222_v58, %v6876_v9  ;;  %v5217_v62 = vadd.f32 %v2674_v60, %v6880_v10  ;;  %v2224_v63 = vpop.f32.mrb[19].mxu0  ;;  %v2676_v0 = vpop.f32.mrb[19].mxu1  ;;  %3658 = vmatmul.mubr.bf16.gmra.mrb[44].mxu0 %v2785_v41  ;;  %3884 = vmatmul.mubr.bf16.gmra.mrb[44].mxu1 %v2785_v41  ;;  %v2741_v15 = vmax.f32 %v5183_v49, 0.0  ;;  %v2743_v16 = vmax.f32 %v5215_v50, 0.0  ;;  %v6096_v41 = vld [vmem:[%s7359_s3 + $0x32c] ss:$16 sps:$4 sm:$0xff]  }
 0x21e   :  { %v5186_v1 = vadd.f32 %v2224_v63, %v6884_v11  ;;  %v5218_v2 = vadd.f32 %v2676_v0, %v6888_v12  ;;  %3721 = vmatpush1.bf16.msra.mxu0 %v6073_v47  ;;  %3947 = vmatpush1.bf16.msra.mxu1 %v6076_v48  ;;  %v2742_v22 = vmax.f32 %v5184_v55, 0.0  ;;  %v2744_v23 = vmax.f32 %v5216_v56, 0.0  ;;  %v6094_v55 = vld [vmem:[%s7359_s3 + $0x328] ss:$16 sps:$4 sm:$0xff]   ;;  %v6099_v56 = vld [vmem:[%s7359_s3 + $0x344] ss:$16 sps:$4 sm:$0xff]  }
 0x21f   :  { %v2745_v17 = vmax.f32 %v5185_v61, 0.0  ;;  %v2747_v18 = vmax.f32 %v5217_v62, 0.0  ;;  %3722 = vmatprep.subr.bf16.mxu0 %v6081_v53  ;;  %3948 = vmatprep.subr.bf16.mxu1 %v6084_v54  ;;  %v6091_v54 = vld [vmem:[%s7359_s3 + $0x320] ss:$16 sps:$4 sm:$0xff]   ;;  %v6102_v63 = vld [vmem:[%s7359_s3 + $0x34c] ss:$16 sps:$4 sm:$0xff]  }
 0x220   :  { %v2746_v24 = vmax.f32 %v5186_v1, 0.0  ;;  %v2748_v25 = vmax.f32 %v5218_v2, 0.0 }
 0x221   :  { %v2789_v26 = vpack.c.bf16 %v2745_v17, %v2741_v15  ;;  %v7042_v27 = vpack.c.bf16 %v2747_v18, %v2743_v16 }
 0x222   :  { %v2790_v28 = vpack.c.bf16 %v2746_v24, %v2742_v22  ;;  %v7044_v29 = vpack.c.bf16 %v2748_v25, %v2744_v23  ;;  %v2228_v30 = vpop.f32.mrb[20].mxu0  ;;  %v2680_v31 = vpop.f32.mrb[20].mxu1  ;;  %3723 = vmatpush1.bf16.msra.mxu0 %v6079_v6  ;;  %3949 = vmatpush1.bf16.msra.mxu1 %v6082_v13  ;;  %v6100_v22 = vld [vmem:[%s7359_s3 + $0x348] ss:$16 sps:$4 sm:$0xff]  }
 0x223   :  { %v5187_v34 = vadd.f32 %v2228_v30, %v6876_v9  ;;  %v5219_v35 = vadd.f32 %v2680_v31, %v6880_v10  ;;  %v2230_v36 = vpop.f32.mrb[21].mxu0  ;;  %v2682_v37 = vpop.f32.mrb[21].mxu1  ;;  %3724 = vmatprep.subr.bf16.mxu0 %v6087_v14  ;;  %3950 = vmatprep.subr.bf16.mxu1 %v6090_v20  ;;  %v6097_v20 = vld [vmem:[%s7359_s3 + $0x340] ss:$16 sps:$4 sm:$0xff]   ;;  %v6108_v30 = vld [vmem:[%s7359_s3 + $0x36c] ss:$16 sps:$4 sm:$0xff]  }
 0x224   :  { %v5188_v43 = vadd.f32 %v2230_v36, %v6884_v11  ;;  %v5220_v45 = vadd.f32 %v2682_v37, %v6888_v12  ;;  %v2232_v46 = vpop.f32.mrb[22].mxu0  ;;  %v2684_v47 = vpop.f32.mrb[22].mxu1  ;;  %3667 = vmatprep.mubr.bf16.mxu0 %v2790_v28  ;;  %3893 = vmatprep.mubr.bf16.mxu1 %v2790_v28  ;;  %v6105_v28 = vld [vmem:[%s7359_s3 + $0x364] ss:$16 sps:$4 sm:$0xff]  }
 0x225   :  { %v5189_v48 = vadd.f32 %v2232_v46, %v6876_v9  ;;  %v5221_v49 = vadd.f32 %v2684_v47, %v6880_v10  ;;  %v2234_v50 = vpop.f32.mrb[23].mxu0  ;;  %v2686_v51 = vpop.f32.mrb[23].mxu1  ;;  %3668 = vmatmul.mubr.bf16.gmra.mrb[48].mxu0 %v2789_v26  ;;  %3894 = vmatmul.mubr.bf16.gmra.mrb[48].mxu1 %v2789_v26  ;;  %v2749_v58 = vmax.f32 %v5187_v34, 0.0  ;;  %v2751_v60 = vmax.f32 %v5219_v35, 0.0  ;;  %v6106_v46 = vld [vmem:[%s7359_s3 + $0x368] ss:$16 sps:$4 sm:$0xff]  }
 0x226   :  { %v5190_v52 = vadd.f32 %v2234_v50, %v6884_v11  ;;  %v5222_v53 = vadd.f32 %v2686_v51, %v6888_v12  ;;  %3725 = vmatpush1.bf16.msra.mxu0 %v6085_v32  ;;  %3951 = vmatpush1.bf16.msra.mxu1 %v6088_v33  ;;  %v2750_v0 = vmax.f32 %v5188_v43, 0.0  ;;  %v2752_v1 = vmax.f32 %v5220_v45, 0.0  ;;  %v6103_v45 = vld [vmem:[%s7359_s3 + $0x360] ss:$16 sps:$4 sm:$0xff]   ;;  %v6111_v47 = vld [vmem:[%s7359_s3 + $0x384] ss:$16 sps:$4 sm:$0xff]  }
 0x227   :  { %v2753_v61 = vmax.f32 %v5189_v48, 0.0  ;;  %v2755_v62 = vmax.f32 %v5221_v49, 0.0  ;;  %3726 = vmatprep.subr.bf16.mxu0 %v6093_v39  ;;  %3952 = vmatprep.subr.bf16.mxu1 %v6096_v41 }
 0x228   :  { %v2754_v2 = vmax.f32 %v5190_v52, 0.0  ;;  %v2756_v6 = vmax.f32 %v5222_v53, 0.0  ;;  %v6114_v52 = vld [vmem:[%s7359_s3 + $0x38c] ss:$16 sps:$4 sm:$0xff]  }
 0x229   :  { %v2793_v13 = vpack.c.bf16 %v2753_v61, %v2749_v58  ;;  %v7078_v14 = vpack.c.bf16 %v2755_v62, %v2751_v60 }
 0x22a   :  { %v2794_v15 = vpack.c.bf16 %v2754_v2, %v2750_v0  ;;  %v7080_v16 = vpack.c.bf16 %v2756_v6, %v2752_v1  ;;  %v2238_v17 = vpop.f32.mrb[24].mxu0  ;;  %v2690_v18 = vpop.f32.mrb[24].mxu1  ;;  %3727 = vmatpush1.bf16.msra.mxu0 %v6091_v54  ;;  %3953 = vmatpush1.bf16.msra.mxu1 %v6094_v55  ;;  %v6109_v1 = vld [vmem:[%s7359_s3 + $0x380] ss:$16 sps:$4 sm:$0xff]   ;;  %v6112_v2 = vld [vmem:[%s7359_s3 + $0x388] ss:$16 sps:$4 sm:$0xff]  }
 0x22b   :  { %v5191_v23 = vadd.f32 %v2238_v17, %v6876_v9  ;;  %v5223_v24 = vadd.f32 %v2690_v18, %v6880_v10  ;;  %v2240_v25 = vpop.f32.mrb[25].mxu0  ;;  %v2692_v26 = vpop.f32.mrb[25].mxu1  ;;  %3728 = vmatprep.subr.bf16.mxu0 %v6099_v56  ;;  %3954 = vmatprep.subr.bf16.mxu1 %v6102_v63  ;;  %v6117_v18 = vld [vmem:[%s7359_s3 + $0x3a4] ss:$16 sps:$4 sm:$0xff]  }
 0x22c   :  { %v5192_v31 = vadd.f32 %v2240_v25, %v6884_v11  ;;  %v5224_v32 = vadd.f32 %v2692_v26, %v6888_v12  ;;  %v2242_v33 = vpop.f32.mrb[26].mxu0  ;;  %v2694_v34 = vpop.f32.mrb[26].mxu1  ;;  %3677 = vmatprep.mubr.bf16.mxu0 %v2794_v15  ;;  %3903 = vmatprep.mubr.bf16.mxu1 %v2794_v15 }
 0x22d   :  { %v5193_v35 = vadd.f32 %v2242_v33, %v6876_v9  ;;  %v5225_v36 = vadd.f32 %v2694_v34, %v6880_v10  ;;  %v2244_v37 = vpop.f32.mrb[27].mxu0  ;;  %v2696_v39 = vpop.f32.mrb[27].mxu1  ;;  %3678 = vmatmul.mubr.bf16.gmra.mrb[52].mxu0 %v2793_v13  ;;  %3904 = vmatmul.mubr.bf16.gmra.mrb[52].mxu1 %v2793_v13  ;;  %v2757_v48 = vmax.f32 %v5191_v23, 0.0  ;;  %v2759_v49 = vmax.f32 %v5223_v24, 0.0  ;;  %v6115_v34 = vld [vmem:[%s7359_s3 + $0x3a0] ss:$16 sps:$4 sm:$0xff]  }
 0x22e   :  { %v5194_v41 = vadd.f32 %v2244_v37, %v6884_v11  ;;  %v5226_v43 = vadd.f32 %v2696_v39, %v6888_v12  ;;  %3729 = vmatpush1.bf16.msra.mxu0 %v6097_v20  ;;  %3955 = vmatpush1.bf16.msra.mxu1 %v6100_v22  ;;  %v2758_v53 = vmax.f32 %v5192_v31, 0.0  ;;  %v2760_v54 = vmax.f32 %v5224_v32, 0.0  ;;  %v6120_v20 = vld [vmem:[%s7359_s3 + $0x3ac] ss:$16 sps:$4 sm:$0xff]  }
 0x22f   :  { %v2761_v50 = vmax.f32 %v5193_v35, 0.0  ;;  %v2763_v51 = vmax.f32 %v5225_v36, 0.0  ;;  %3730 = vmatprep.subr.bf16.mxu0 %v6105_v28  ;;  %3956 = vmatprep.subr.bf16.mxu1 %v6108_v30 }
 0x230   :  { %v2762_v55 = vmax.f32 %v5194_v41, 0.0  ;;  %v2764_v56 = vmax.f32 %v5226_v43, 0.0 }
 0x231   :  { %v2797_v58 = vpack.c.bf16 %v2761_v50, %v2757_v48  ;;  %v7114_v60 = vpack.c.bf16 %v2763_v51, %v2759_v49  ;;  %v6121_v50 = vld [vmem:[%s7359_s3 + $0x3c0] ss:$16 sps:$4 sm:$0xff]   ;;  %v6124_v51 = vld [vmem:[%s7359_s3 + $0x3c8] ss:$16 sps:$4 sm:$0xff]  }
 0x232   :  { %v2798_v61 = vpack.c.bf16 %v2762_v55, %v2758_v53  ;;  %v7116_v62 = vpack.c.bf16 %v2764_v56, %v2760_v54  ;;  %v2248_v63 = vpop.f32.mrb[28].mxu0  ;;  %v2700_v0 = vpop.f32.mrb[28].mxu1  ;;  %3731 = vmatpush1.bf16.msra.mxu0 %v6103_v45  ;;  %3957 = vmatpush1.bf16.msra.mxu1 %v6106_v46  ;;  %v6132_v53 = vld [vmem:[%s7359_s3 + $0x3ec] ss:$16 sps:$4 sm:$0xff]   ;;  %v6127_v54 = vld [vmem:[%s7359_s3 + $0x3e0] ss:$16 sps:$4 sm:$0xff]  }
 0x233   :  { %v5195_v6 = vadd.f32 %v2248_v63, %v6876_v9  ;;  %v5227_v13 = vadd.f32 %v2700_v0, %v6880_v10  ;;  %v2250_v15 = vpop.f32.mrb[29].mxu0  ;;  %v2702_v17 = vpop.f32.mrb[29].mxu1  ;;  %3732 = vmatprep.subr.bf16.mxu0 %v6111_v47  ;;  %3958 = vmatprep.subr.bf16.mxu1 %v6114_v52  ;;  %v6129_v52 = vld [vmem:[%s7359_s3 + $0x3e4] ss:$16 sps:$4 sm:$0xff]   ;;  %v6130_v55 = vld [vmem:[%s7359_s3 + $0x3e8] ss:$16 sps:$4 sm:$0xff]  }
 0x234   :  { %v5196_v22 = vadd.f32 %v2250_v15, %v6884_v11  ;;  %v5228_v23 = vadd.f32 %v2702_v17, %v6888_v12  ;;  %v2252_v24 = vpop.f32.mrb[30].mxu0  ;;  %v2704_v25 = vpop.f32.mrb[30].mxu1  ;;  %3687 = vmatprep.mubr.bf16.mxu0 %v2798_v61  ;;  %3913 = vmatprep.mubr.bf16.mxu1 %v2798_v61  ;;  %v6133_v56 = vld [vmem:[#allocation4 + $0x40] sm:$0xff]   ;;  %v6137_v0 = vld [vmem:[#allocation4 + $0x48] sm:$0xff]   ;;  %v6142_v15 = vld [vmem:[#allocation4 + $0x10] sm:$0xff]  }
 0x235   :  { %v5197_v26 = vadd.f32 %v2252_v24, %v6876_v9  ;;  %v5229_v28 = vadd.f32 %v2704_v25, %v6880_v10  ;;  %v2254_v30 = vpop.f32.mrb[31].mxu0  ;;  %v2706_v31 = vpop.f32.mrb[31].mxu1  ;;  %3688 = vmatmul.mubr.bf16.gmra.mrb[56].mxu0 %v2797_v58  ;;  %3914 = vmatmul.mubr.bf16.gmra.mrb[56].mxu1 %v2797_v58  ;;  %v6118_v9 = vld [vmem:[%s7359_s3 + $0x3a8] ss:$16 sps:$4 sm:$0xff]   ;;  %v6123_v10 = vld [vmem:[%s7359_s3 + $0x3c4] ss:$16 sps:$4 sm:$0xff]  }
 0x236   :  { %v5198_v32 = vadd.f32 %v2254_v30, %v6884_v11  ;;  %v5230_v33 = vadd.f32 %v2706_v31, %v6888_v12  ;;  %3733 = vmatpush1.bf16.msra.mxu0 %v6109_v1  ;;  %3959 = vmatpush1.bf16.msra.mxu1 %v6112_v2  ;;  %v2765_v35 = vmax.f32 %v5195_v6, 0.0  ;;  %v2767_v36 = vmax.f32 %v5227_v13, 0.0  ;;  %v6126_v12 = vld [vmem:[%s7359_s3 + $0x3cc] ss:$16 sps:$4 sm:$0xff]   ;;  %v6135_v58 = vld [vmem:[#allocation4 + $0xc0] sm:$0xff]   ;;  %v6141_v6 = vld [vmem:[#allocation4 + $0x50] sm:$0xff]  }
 0x237   :  { %v2769_v37 = vmax.f32 %v5197_v26, 0.0  ;;  %v2771_v11 = vmax.f32 %v5229_v28, 0.0  ;;  %3734 = vmatprep.subr.bf16.mxu0 %v6117_v18  ;;  %3960 = vmatprep.subr.bf16.mxu1 %v6120_v20  ;;  %v2766_v39 = vmax.f32 %v5196_v22, 0.0  ;;  %v2768_v41 = vmax.f32 %v5228_v23, 0.0  ;;  %v6134_v61 = vld [vmem:[#allocation4] sm:$0xff]   ;;  %v6139_v1 = vld [vmem:[#allocation4 + $0xc8] sm:$0xff]  }
 0x238   :  { %v2770_v43 = vmax.f32 %v5198_v32, 0.0  ;;  %v2772_v45 = vmax.f32 %v5230_v33, 0.0  ;;  %v6136_v63 = vld [vmem:[#allocation4 + $0x80] sm:$0xff]   ;;  %v6140_v2 = vld [vmem:[#allocation4 + $0x88] sm:$0xff]   ;;  %v6143_v13 = vld [vmem:[#allocation4 + $0xd0] sm:$0xff]  }
 0x239   :  { %v2801_v46 = vpack.c.bf16 %v2769_v37, %v2765_v35  ;;  %v7150_v47 = vpack.c.bf16 %v2771_v11, %v2767_v36  ;;  %v6144_v17 = vld [vmem:[#allocation4 + $0x90] sm:$0xff]   ;;  %v6145_v18 = vld [vmem:[#allocation4 + $0x58] sm:$0xff]   ;;  %v6149_v22 = vld [vmem:[#allocation4 + $0x60] sm:$0xff]  }
 0x23a   :  { %v2802_v48 = vpack.c.bf16 %v2770_v43, %v2766_v39  ;;  %v7152_v49 = vpack.c.bf16 %v2772_v45, %v2768_v41  ;;  %3735 = vmatpush1.bf16.msra.mxu0 %v6115_v34  ;;  %3961 = vmatpush1.bf16.msra.mxu1 %v6118_v9  ;;  %v6148_v20 = vld [vmem:[#allocation4 + $0x98] sm:$0xff]   ;;  %v6151_v23 = vld [vmem:[#allocation4 + $0xe0] sm:$0xff]   ;;  %v6153_v26 = vld [vmem:[#allocation4 + $0x68] sm:$0xff]  }
 0x23b   :  { %3736 = vmatprep.subr.bf16.mxu0 %v6123_v10  ;;  %3962 = vmatprep.subr.bf16.mxu1 %v6126_v12  ;;  %v6150_v24 = vld [vmem:[#allocation4 + $0x20] sm:$0xff]   ;;  %v6156_v28 = vld [vmem:[#allocation4 + $0xa8] sm:$0xff]   ;;  %v6157_v30 = vld [vmem:[#allocation4 + $0x70] sm:$0xff]  }
 0x23c   :  { %3697 = vmatprep.mubr.bf16.mxu0 %v2802_v48  ;;  %3923 = vmatprep.mubr.bf16.mxu1 %v2802_v48  ;;  %v6152_v25 = vld [vmem:[#allocation4 + $0xa0] sm:$0xff]   ;;  %v6159_v31 = vld [vmem:[#allocation4 + $0xf0] sm:$0xff]  }
 0x23d   :  { %3698 = vmatmul.mubr.bf16.gmra.mrb[60].mxu0 %v2801_v46  ;;  %3924 = vmatmul.mubr.bf16.gmra.mrb[60].mxu1 %v2801_v46  ;;  %v6158_v32 = vld [vmem:[#allocation4 + $0x30] sm:$0xff]  }
 0x23e   :  { %3737 = vmatpush1.bf16.msra.mxu0 %v6121_v50  ;;  %3740 = vmatprep.mubr.bf16.mxu0 %v6900_v40  ;;  %v6160_v33 = vld [vmem:[#allocation4 + $0xb0] sm:$0xff]  }
 0x23f   :  { %3963 = vmatpush1.bf16.msra.mxu1 %v6124_v51  ;;  %3966 = vmatprep.mubr.bf16.mxu1 %v6900_v40  ;;  %v6138_v40 = vld [vmem:[#allocation4 + $0x8] sm:$0xff]  }
 0x240   :  { %3738 = vmatprep.subr.bf16.mxu0 %v6129_v52  ;;  %3964 = vmatprep.subr.bf16.mxu1 %v6132_v53 }
 0x242   :  { %3739 = vmatpush1.bf16.msra.mxu0 %v6127_v54 }
 0x243   :  { %3965 = vmatpush1.bf16.msra.mxu1 %v6130_v55  ;;  %5039 = vmatprep.subr.bf16.mxu0 %v6133_v56 }
 0x244   :  { %5103 = vmatprep.subr.bf16.mxu1 %v6135_v58 }
 0x245   :  { %3741 = vmatmul.mubr.bf16.vlgmr.msra.gmra.mrb[32].mxu0 %v6898_v38 }
 0x246   :  { %3967 = vmatmul.mubr.bf16.vlgmr.msra.gmra.mrb[32].mxu1 %v6898_v38  ;;  %3750 = vmatprep.mubr.bf16.mxu0 %v6936_v21  ;;  %v6147_v38 = vld [vmem:[#allocation4 + $0xd8] sm:$0xff]  }
 0x247   :  { %3976 = vmatprep.mubr.bf16.mxu1 %v6936_v21  ;;  %5040 = vmatpush3.bf16.msra.mxu0 %v6134_v61  ;;  %v6146_v21 = vld [vmem:[#allocation4 + $0x18] sm:$0xff]  }
 0x248   :  { %5104 = vmatpush3.bf16.msra.mxu1 %v6136_v63  ;;  %5041 = vmatprep.subr.bf16.mxu0 %v6137_v0 }
 0x249   :  { %5105 = vmatprep.subr.bf16.mxu1 %v6139_v1 }
 0x24b   :  { %5042 = vmatpush3.bf16.msra.mxu0 %v6138_v40 }
 0x24c   :  { %5106 = vmatpush3.bf16.msra.mxu1 %v6140_v2  ;;  %5043 = vmatprep.subr.bf16.mxu0 %v6141_v6 }
 0x24d   :  { %3751 = vmatmul.mubr.bf16.gmra.mrb[36].mxu0 %v6934_v19  ;;  %5107 = vmatprep.subr.bf16.mxu1 %v6143_v13 }
 0x24e   :  { %3977 = vmatmul.mubr.bf16.gmra.mrb[36].mxu1 %v6934_v19  ;;  %3760 = vmatprep.mubr.bf16.mxu0 %v6972_v59  ;;  %v6155_v19 = vld [vmem:[#allocation4 + $0xe8] sm:$0xff]  }
 0x24f   :  { %3986 = vmatprep.mubr.bf16.mxu1 %v6972_v59  ;;  %5044 = vmatpush3.bf16.msra.mxu0 %v6142_v15  ;;  %v6154_v59 = vld [vmem:[#allocation4 + $0x28] sm:$0xff]  }
 0x250   :  { %5108 = vmatpush3.bf16.msra.mxu1 %v6144_v17  ;;  %5045 = vmatprep.subr.bf16.mxu0 %v6145_v18 }
 0x251   :  { %5109 = vmatprep.subr.bf16.mxu1 %v6147_v38 }
 0x253   :  { %5046 = vmatpush3.bf16.msra.mxu0 %v6146_v21 }
 0x254   :  { %5110 = vmatpush3.bf16.msra.mxu1 %v6148_v20  ;;  %5047 = vmatprep.subr.bf16.mxu0 %v6149_v22 }
 0x255   :  { %3761 = vmatmul.mubr.bf16.gmra.mrb[40].mxu0 %v6970_v57  ;;  %5111 = vmatprep.subr.bf16.mxu1 %v6151_v23 }
 0x256   :  { %3987 = vmatmul.mubr.bf16.gmra.mrb[40].mxu1 %v6970_v57  ;;  %3770 = vmatprep.mubr.bf16.mxu0 %v7008_v44  ;;  %v6161_v57 = vld [vmem:[#allocation4 + $0x78] sm:$0xff]  }
 0x257   :  { %3996 = vmatprep.mubr.bf16.mxu1 %v7008_v44  ;;  %5048 = vmatpush3.bf16.msra.mxu0 %v6150_v24  ;;  %v6162_v44 = vld [vmem:[#allocation4 + $0x38] sm:$0xff]  }
 0x258   :  { %5112 = vmatpush3.bf16.msra.mxu1 %v6152_v25  ;;  %5049 = vmatprep.subr.bf16.mxu0 %v6153_v26 }
 0x259   :  { %5113 = vmatprep.subr.bf16.mxu1 %v6155_v19 }
 0x25b   :  { %5050 = vmatpush3.bf16.msra.mxu0 %v6154_v59 }
 0x25c   :  { %5114 = vmatpush3.bf16.msra.mxu1 %v6156_v28  ;;  %5051 = vmatprep.subr.bf16.mxu0 %v6157_v30 }
 0x25d   :  { %3771 = vmatmul.mubr.bf16.gmra.mrb[44].mxu0 %v7006_v42  ;;  %5115 = vmatprep.subr.bf16.mxu1 %v6159_v31 }
 0x25e   :  { %3997 = vmatmul.mubr.bf16.gmra.mrb[44].mxu1 %v7006_v42  ;;  %3780 = vmatprep.mubr.bf16.mxu0 %v7044_v29  ;;  %v6163_v42 = vld [vmem:[#allocation4 + $0xf8] sm:$0xff]  }
 0x25f   :  { %4006 = vmatprep.mubr.bf16.mxu1 %v7044_v29  ;;  %5052 = vmatpush3.bf16.msra.mxu0 %v6158_v32  ;;  %v2933_v29 = vld [vmem:[%s7360_s4] sm:$0xf] }
 0x260   :  { %5116 = vmatpush3.bf16.msra.mxu1 %v6160_v33  ;;  %5053 = vmatprep.subr.bf16.mxu0 %v6161_v57 }
 0x261   :  { %5117 = vmatprep.subr.bf16.mxu1 %v6163_v42 }
 0x263   :  { %5054 = vmatpush3.bf16.msra.mxu0 %v6162_v44 }
 0x265   :  { %3781 = vmatmul.mubr.bf16.gmra.mrb[48].mxu0 %v7042_v27 }
 0x266   :  { %4007 = vmatmul.mubr.bf16.gmra.mrb[48].mxu1 %v7042_v27  ;;  %3790 = vmatprep.mubr.bf16.mxu0 %v7080_v16  ;;  %v6164_v27 = vld [vmem:[#allocation4 + $0xb8] sm:$0xff]  }
 0x267   :  { %4016 = vmatprep.mubr.bf16.mxu1 %v7080_v16  ;;  %5118 = vmatpush3.bf16.msra.mxu1 %v6164_v27  ;;  %v7213_v16 = vrot.slane %v2933_v29, %v515_v5 }
 0x26d   :  { %3791 = vmatmul.mubr.bf16.gmra.mrb[52].mxu0 %v7078_v14 }
 0x26e   :  { %4017 = vmatmul.mubr.bf16.gmra.mrb[52].mxu1 %v7078_v14  ;;  %3800 = vmatprep.mubr.bf16.mxu0 %v7116_v62  ;;  %v7209_v14 = vrot.slane %v2933_v29, %v507_v4 }
 0x26f   :  { %4026 = vmatprep.mubr.bf16.mxu1 %v7116_v62  ;;  %v7221_v62 = vrot.slane %v2933_v29, %v519_v8 }
 0x275   :  { %3801 = vmatmul.mubr.bf16.gmra.mrb[56].mxu0 %v7114_v60 }
 0x276   :  { %4027 = vmatmul.mubr.bf16.gmra.mrb[56].mxu1 %v7114_v60  ;;  %3810 = vmatprep.mubr.bf16.mxu0 %v7152_v49  ;;  %v7217_v60 = vrot.slane %v2933_v29, %v511_v7 }
 0x277   :  { %4036 = vmatprep.mubr.bf16.mxu1 %v7152_v49 }
 0x27d   :  { %3811 = vmatmul.mubr.bf16.gmra.mrb[60].mxu0 %v7150_v47 }
 0x27e   :  { %4037 = vmatmul.mubr.bf16.gmra.mrb[60].mxu1 %v7150_v47 }
 0x318   :  { %v3742_v34 = vpop.f32.mrb[32].mxu0 }
 0x319   :  { %v5231_v9 = vadd.f32 %v3742_v34, %v7209_v14  ;;  %v3968_v10 = vpop.f32.mrb[32].mxu1  ;;  %v3744_v35 = vpop.f32.mrb[33].mxu0 }
 0x31a   :  { %v5263_v4 = vadd.f32 %v3968_v10, %v7213_v16  ;;  %v5232_v36 = vadd.f32 %v3744_v35, %v7217_v60  ;;  %v3970_v37 = vpop.f32.mrb[33].mxu1  ;;  %v3746_v5 = vpop.f32.mrb[34].mxu0 }
 0x31b   :  { %v5264_v11 = vadd.f32 %v3970_v37, %v7221_v62  ;;  %v5233_v7 = vadd.f32 %v3746_v5, %v7209_v14  ;;  %v3972_v12 = vpop.f32.mrb[34].mxu1  ;;  %v3748_v39 = vpop.f32.mrb[35].mxu0  ;;  %v4047_v43 = vmax.f32 %v5231_v9, 0.0 }
 0x31c   :  { %v5265_v3 = vadd.f32 %v3972_v12, %v7213_v16  ;;  %v5234_v8 = vadd.f32 %v3748_v39, %v7217_v60  ;;  %v3974_v41 = vpop.f32.mrb[35].mxu1  ;;  %v4049_v47 = vmax.f32 %v5263_v4, 0.0  ;;  %v4048_v48 = vmax.f32 %v5232_v36, 0.0 }
 0x31d   :  { %v4051_v45 = vmax.f32 %v5233_v7, 0.0  ;;  %v5266_v46 = vadd.f32 %v3974_v41, %v7221_v62  ;;  %v4050_v51 = vmax.f32 %v5264_v11, 0.0 }
 0x31e   :  { %v4053_v49 = vmax.f32 %v5265_v3, 0.0  ;;  %v4052_v50 = vmax.f32 %v5234_v8, 0.0 }
 0x31f   :  { %v4111_v52 = vpack.c.bf16 %v4051_v45, %v4047_v43  ;;  %v4054_v53 = vmax.f32 %v5266_v46, 0.0 }
 0x320   :  { %v4113_v54 = vpack.c.bf16 %v4053_v49, %v4049_v47  ;;  %v4112_v55 = vpack.c.bf16 %v4052_v50, %v4048_v48  ;;  %v3752_v56 = vpop.f32.mrb[36].mxu0 }
 0x321   :  { %v4114_v58 = vpack.c.bf16 %v4054_v53, %v4050_v51  ;;  %v5235_v61 = vadd.f32 %v3752_v56, %v7209_v14  ;;  %v3978_v63 = vpop.f32.mrb[36].mxu1  ;;  %v3754_v0 = vpop.f32.mrb[37].mxu0 }
 0x322   :  { %v5267_v1 = vadd.f32 %v3978_v63, %v7213_v16  ;;  %v5236_v40 = vadd.f32 %v3754_v0, %v7217_v60  ;;  %v3980_v2 = vpop.f32.mrb[37].mxu1  ;;  %v3756_v6 = vpop.f32.mrb[38].mxu0  ;;  %4438 = vmatprep.mubr.bf16.mxu0 %v4112_v55 }
 0x323   :  { %v5268_v13 = vadd.f32 %v3980_v2, %v7221_v62  ;;  %v5237_v15 = vadd.f32 %v3756_v6, %v7209_v14  ;;  %v3982_v17 = vpop.f32.mrb[38].mxu1  ;;  %4535 = vmatprep.mubr.bf16.mxu1 %v4114_v58  ;;  %v3758_v18 = vpop.f32.mrb[39].mxu0  ;;  %4439 = vmatmul.mubr.bf16.vlgmr.msra.gmra.mrb[64].mxu0 %v4111_v52  ;;  %v4055_v22 = vmax.f32 %v5235_v61, 0.0 }
 0x324   :  { %v5269_v38 = vadd.f32 %v3982_v17, %v7213_v16  ;;  %v5238_v21 = vadd.f32 %v3758_v18, %v7217_v60  ;;  %v3984_v20 = vpop.f32.mrb[39].mxu1  ;;  %4536 = vmatmul.mubr.bf16.vlgmr.msra.gmra.mrb[64].mxu1 %v4113_v54  ;;  %v4057_v25 = vmax.f32 %v5267_v1, 0.0  ;;  %v4056_v26 = vmax.f32 %v5236_v40, 0.0 }
 0x325   :  { %v4059_v23 = vmax.f32 %v5237_v15, 0.0  ;;  %v5270_v24 = vadd.f32 %v3984_v20, %v7221_v62  ;;  %v4058_v28 = vmax.f32 %v5268_v13, 0.0 }
 0x326   :  { %v4061_v19 = vmax.f32 %v5269_v38, 0.0  ;;  %v4060_v59 = vmax.f32 %v5238_v21, 0.0 }
 0x327   :  { %v4115_v30 = vpack.c.bf16 %v4059_v23, %v4055_v22  ;;  %v4062_v31 = vmax.f32 %v5270_v24, 0.0 }
 0x328   :  { %v4117_v32 = vpack.c.bf16 %v4061_v19, %v4057_v25  ;;  %v4116_v33 = vpack.c.bf16 %v4060_v59, %v4056_v26  ;;  %v3762_v57 = vpop.f32.mrb[40].mxu0 }
 0x329   :  { %v4118_v42 = vpack.c.bf16 %v4062_v31, %v4058_v28  ;;  %v5239_v44 = vadd.f32 %v3762_v57, %v7209_v14  ;;  %v3988_v27 = vpop.f32.mrb[40].mxu1  ;;  %v3764_v29 = vpop.f32.mrb[41].mxu0 }
 0x32a   :  { %v5271_v34 = vadd.f32 %v3988_v27, %v7213_v16  ;;  %v5240_v9 = vadd.f32 %v3764_v29, %v7217_v60  ;;  %v3990_v10 = vpop.f32.mrb[41].mxu1  ;;  %v3766_v35 = vpop.f32.mrb[42].mxu0  ;;  %4446 = vmatprep.mubr.bf16.mxu0 %v4116_v33 }
 0x32b   :  { %v5272_v4 = vadd.f32 %v3990_v10, %v7221_v62  ;;  %v5241_v36 = vadd.f32 %v3766_v35, %v7209_v14  ;;  %v3992_v37 = vpop.f32.mrb[42].mxu1  ;;  %4543 = vmatprep.mubr.bf16.mxu1 %v4118_v42  ;;  %v3768_v5 = vpop.f32.mrb[43].mxu0  ;;  %4447 = vmatmul.mubr.bf16.gmra.mrb[68].mxu0 %v4115_v30  ;;  %v4063_v39 = vmax.f32 %v5239_v44, 0.0 }
 0x32c   :  { %v5273_v11 = vadd.f32 %v3992_v37, %v7213_v16  ;;  %v5242_v7 = vadd.f32 %v3768_v5, %v7217_v60  ;;  %v3994_v12 = vpop.f32.mrb[43].mxu1  ;;  %4544 = vmatmul.mubr.bf16.gmra.mrb[68].mxu1 %v4117_v32  ;;  %v4065_v41 = vmax.f32 %v5271_v34, 0.0  ;;  %v4064_v43 = vmax.f32 %v5240_v9, 0.0 }
 0x32d   :  { %v4067_v3 = vmax.f32 %v5241_v36, 0.0  ;;  %v5274_v8 = vadd.f32 %v3994_v12, %v7221_v62  ;;  %v4066_v47 = vmax.f32 %v5272_v4, 0.0 }
 0x32e   :  { %v4069_v45 = vmax.f32 %v5273_v11, 0.0  ;;  %v4068_v46 = vmax.f32 %v5242_v7, 0.0 }
 0x32f   :  { %v4119_v48 = vpack.c.bf16 %v4067_v3, %v4063_v39  ;;  %v4070_v49 = vmax.f32 %v5274_v8, 0.0 }
 0x330   :  { %v4121_v50 = vpack.c.bf16 %v4069_v45, %v4065_v41  ;;  %v4120_v51 = vpack.c.bf16 %v4068_v46, %v4064_v43  ;;  %v3772_v52 = vpop.f32.mrb[44].mxu0 }
 0x331   :  { %v4122_v53 = vpack.c.bf16 %v4070_v49, %v4066_v47  ;;  %v5243_v54 = vadd.f32 %v3772_v52, %v7209_v14  ;;  %v3998_v55 = vpop.f32.mrb[44].mxu1  ;;  %v3774_v56 = vpop.f32.mrb[45].mxu0 }
 0x332   :  { %v5275_v58 = vadd.f32 %v3998_v55, %v7213_v16  ;;  %v5244_v61 = vadd.f32 %v3774_v56, %v7217_v60  ;;  %v4000_v63 = vpop.f32.mrb[45].mxu1  ;;  %v3776_v0 = vpop.f32.mrb[46].mxu0  ;;  %4454 = vmatprep.mubr.bf16.mxu0 %v4120_v51 }
 0x333   :  { %v5276_v1 = vadd.f32 %v4000_v63, %v7221_v62  ;;  %v5245_v40 = vadd.f32 %v3776_v0, %v7209_v14  ;;  %v4002_v2 = vpop.f32.mrb[46].mxu1  ;;  %4551 = vmatprep.mubr.bf16.mxu1 %v4122_v53  ;;  %v3778_v6 = vpop.f32.mrb[47].mxu0  ;;  %4455 = vmatmul.mubr.bf16.gmra.mrb[72].mxu0 %v4119_v48  ;;  %v4071_v18 = vmax.f32 %v5243_v54, 0.0 }
 0x334   :  { %v5277_v13 = vadd.f32 %v4002_v2, %v7213_v16  ;;  %v5246_v15 = vadd.f32 %v3778_v6, %v7217_v60  ;;  %v4004_v17 = vpop.f32.mrb[47].mxu1  ;;  %4552 = vmatmul.mubr.bf16.gmra.mrb[72].mxu1 %v4121_v50  ;;  %v4073_v20 = vmax.f32 %v5275_v58, 0.0  ;;  %v4072_v22 = vmax.f32 %v5244_v61, 0.0 }
 0x335   :  { %v4075_v38 = vmax.f32 %v5245_v40, 0.0  ;;  %v5278_v21 = vadd.f32 %v4004_v17, %v7221_v62  ;;  %v4074_v25 = vmax.f32 %v5276_v1, 0.0 }
 0x336   :  { %v4077_v23 = vmax.f32 %v5277_v13, 0.0  ;;  %v4076_v24 = vmax.f32 %v5246_v15, 0.0 }
 0x337   :  { %v4123_v26 = vpack.c.bf16 %v4075_v38, %v4071_v18  ;;  %v4078_v19 = vmax.f32 %v5278_v21, 0.0 }
 0x338   :  { %v4125_v59 = vpack.c.bf16 %v4077_v23, %v4073_v20  ;;  %v4124_v28 = vpack.c.bf16 %v4076_v24, %v4072_v22  ;;  %v3782_v30 = vpop.f32.mrb[48].mxu0 }
 0x339   :  { %v4126_v31 = vpack.c.bf16 %v4078_v19, %v4074_v25  ;;  %v5247_v32 = vadd.f32 %v3782_v30, %v7209_v14  ;;  %v4008_v33 = vpop.f32.mrb[48].mxu1  ;;  %v3784_v57 = vpop.f32.mrb[49].mxu0 }
 0x33a   :  { %v5279_v42 = vadd.f32 %v4008_v33, %v7213_v16  ;;  %v5248_v44 = vadd.f32 %v3784_v57, %v7217_v60  ;;  %v4010_v27 = vpop.f32.mrb[49].mxu1  ;;  %v3786_v29 = vpop.f32.mrb[50].mxu0  ;;  %4462 = vmatprep.mubr.bf16.mxu0 %v4124_v28 }
 0x33b   :  { %v5280_v34 = vadd.f32 %v4010_v27, %v7221_v62  ;;  %v5249_v9 = vadd.f32 %v3786_v29, %v7209_v14  ;;  %v4012_v10 = vpop.f32.mrb[50].mxu1  ;;  %4559 = vmatprep.mubr.bf16.mxu1 %v4126_v31  ;;  %v3788_v35 = vpop.f32.mrb[51].mxu0  ;;  %4463 = vmatmul.mubr.bf16.gmra.mrb[76].mxu0 %v4123_v26  ;;  %v4079_v5 = vmax.f32 %v5247_v32, 0.0 }
 0x33c   :  { %v5281_v4 = vadd.f32 %v4012_v10, %v7213_v16  ;;  %v5250_v36 = vadd.f32 %v3788_v35, %v7217_v60  ;;  %v4014_v37 = vpop.f32.mrb[51].mxu1  ;;  %4560 = vmatmul.mubr.bf16.gmra.mrb[76].mxu1 %v4125_v59  ;;  %v4081_v12 = vmax.f32 %v5279_v42, 0.0  ;;  %v4080_v39 = vmax.f32 %v5248_v44, 0.0 }
 0x33d   :  { %v4083_v11 = vmax.f32 %v5249_v9, 0.0  ;;  %v5282_v7 = vadd.f32 %v4014_v37, %v7221_v62  ;;  %v4082_v41 = vmax.f32 %v5280_v34, 0.0 }
 0x33e   :  { %v4085_v3 = vmax.f32 %v5281_v4, 0.0  ;;  %v4084_v8 = vmax.f32 %v5250_v36, 0.0 }
 0x33f   :  { %v4127_v43 = vpack.c.bf16 %v4083_v11, %v4079_v5  ;;  %v4086_v45 = vmax.f32 %v5282_v7, 0.0 }
 0x340   :  { %v4129_v46 = vpack.c.bf16 %v4085_v3, %v4081_v12  ;;  %v4128_v47 = vpack.c.bf16 %v4084_v8, %v4080_v39  ;;  %v3792_v48 = vpop.f32.mrb[52].mxu0 }
 0x341   :  { %v4130_v49 = vpack.c.bf16 %v4086_v45, %v4082_v41  ;;  %v5251_v50 = vadd.f32 %v3792_v48, %v7209_v14  ;;  %v4018_v51 = vpop.f32.mrb[52].mxu1  ;;  %v3794_v52 = vpop.f32.mrb[53].mxu0 }
 0x342   :  { %v5283_v53 = vadd.f32 %v4018_v51, %v7213_v16  ;;  %v5252_v54 = vadd.f32 %v3794_v52, %v7217_v60  ;;  %v4020_v55 = vpop.f32.mrb[53].mxu1  ;;  %v3796_v56 = vpop.f32.mrb[54].mxu0  ;;  %4470 = vmatprep.mubr.bf16.mxu0 %v4128_v47 }
 0x343   :  { %v5284_v58 = vadd.f32 %v4020_v55, %v7221_v62  ;;  %v5253_v61 = vadd.f32 %v3796_v56, %v7209_v14  ;;  %v4022_v63 = vpop.f32.mrb[54].mxu1  ;;  %4567 = vmatprep.mubr.bf16.mxu1 %v4130_v49  ;;  %v3798_v0 = vpop.f32.mrb[55].mxu0  ;;  %4471 = vmatmul.mubr.bf16.gmra.mrb[80].mxu0 %v4127_v43  ;;  %v4087_v6 = vmax.f32 %v5251_v50, 0.0 }
 0x344   :  { %v5285_v1 = vadd.f32 %v4022_v63, %v7213_v16  ;;  %v5254_v40 = vadd.f32 %v3798_v0, %v7217_v60  ;;  %v4024_v2 = vpop.f32.mrb[55].mxu1  ;;  %4568 = vmatmul.mubr.bf16.gmra.mrb[80].mxu1 %v4129_v46  ;;  %v4089_v17 = vmax.f32 %v5283_v53, 0.0  ;;  %v4088_v18 = vmax.f32 %v5252_v54, 0.0 }
 0x345   :  { %v4091_v13 = vmax.f32 %v5253_v61, 0.0  ;;  %v5286_v15 = vadd.f32 %v4024_v2, %v7221_v62  ;;  %v4090_v20 = vmax.f32 %v5284_v58, 0.0 }
 0x346   :  { %v4093_v38 = vmax.f32 %v5285_v1, 0.0  ;;  %v4092_v21 = vmax.f32 %v5254_v40, 0.0 }
 0x347   :  { %v4131_v22 = vpack.c.bf16 %v4091_v13, %v4087_v6  ;;  %v4094_v23 = vmax.f32 %v5286_v15, 0.0 }
 0x348   :  { %v4133_v24 = vpack.c.bf16 %v4093_v38, %v4089_v17  ;;  %v4132_v25 = vpack.c.bf16 %v4092_v21, %v4088_v18  ;;  %v3802_v26 = vpop.f32.mrb[56].mxu0 }
 0x349   :  { %v4134_v19 = vpack.c.bf16 %v4094_v23, %v4090_v20  ;;  %v5255_v59 = vadd.f32 %v3802_v26, %v7209_v14  ;;  %v4028_v28 = vpop.f32.mrb[56].mxu1  ;;  %v3804_v30 = vpop.f32.mrb[57].mxu0 }
 0x34a   :  { %v5287_v31 = vadd.f32 %v4028_v28, %v7213_v16  ;;  %v5256_v32 = vadd.f32 %v3804_v30, %v7217_v60  ;;  %v4030_v33 = vpop.f32.mrb[57].mxu1  ;;  %v3806_v57 = vpop.f32.mrb[58].mxu0  ;;  %4478 = vmatprep.mubr.bf16.mxu0 %v4132_v25 }
 0x34b   :  { %v5288_v42 = vadd.f32 %v4030_v33, %v7221_v62  ;;  %v5257_v44 = vadd.f32 %v3806_v57, %v7209_v14  ;;  %v4032_v27 = vpop.f32.mrb[58].mxu1  ;;  %4575 = vmatprep.mubr.bf16.mxu1 %v4134_v19  ;;  %v3808_v29 = vpop.f32.mrb[59].mxu0  ;;  %4479 = vmatmul.mubr.bf16.gmra.mrb[84].mxu0 %v4131_v22  ;;  %v4095_v35 = vmax.f32 %v5255_v59, 0.0 }
 0x34c   :  { %v5289_v34 = vadd.f32 %v4032_v27, %v7213_v16  ;;  %v5258_v9 = vadd.f32 %v3808_v29, %v7217_v60  ;;  %v4034_v10 = vpop.f32.mrb[59].mxu1  ;;  %4576 = vmatmul.mubr.bf16.gmra.mrb[84].mxu1 %v4133_v24  ;;  %v4097_v37 = vmax.f32 %v5287_v31, 0.0  ;;  %v4096_v5 = vmax.f32 %v5256_v32, 0.0 }
 0x34d   :  { %v4099_v4 = vmax.f32 %v5257_v44, 0.0  ;;  %v5290_v36 = vadd.f32 %v4034_v10, %v7221_v62  ;;  %v4098_v12 = vmax.f32 %v5288_v42, 0.0 }
 0x34e   :  { %v4101_v11 = vmax.f32 %v5289_v34, 0.0  ;;  %v4100_v7 = vmax.f32 %v5258_v9, 0.0 }
 0x34f   :  { %v4135_v39 = vpack.c.bf16 %v4099_v4, %v4095_v35  ;;  %v4102_v3 = vmax.f32 %v5290_v36, 0.0 }
 0x350   :  { %v4137_v8 = vpack.c.bf16 %v4101_v11, %v4097_v37  ;;  %v4136_v41 = vpack.c.bf16 %v4100_v7, %v4096_v5  ;;  %v3812_v43 = vpop.f32.mrb[60].mxu0 }
 0x351   :  { %v4138_v45 = vpack.c.bf16 %v4102_v3, %v4098_v12  ;;  %v5259_v46 = vadd.f32 %v3812_v43, %v7209_v14  ;;  %v4038_v47 = vpop.f32.mrb[60].mxu1  ;;  %v3814_v48 = vpop.f32.mrb[61].mxu0 }
 0x352   :  { %v5291_v49 = vadd.f32 %v4038_v47, %v7213_v16  ;;  %v5260_v50 = vadd.f32 %v3814_v48, %v7217_v60  ;;  %v4040_v51 = vpop.f32.mrb[61].mxu1  ;;  %v3816_v52 = vpop.f32.mrb[62].mxu0  ;;  %4486 = vmatprep.mubr.bf16.mxu0 %v4136_v41 }
 0x353   :  { %v5292_v53 = vadd.f32 %v4040_v51, %v7221_v62  ;;  %v5261_v54 = vadd.f32 %v3816_v52, %v7209_v14  ;;  %v4042_v55 = vpop.f32.mrb[62].mxu1  ;;  %4583 = vmatprep.mubr.bf16.mxu1 %v4138_v45  ;;  %v3818_v56 = vpop.f32.mrb[63].mxu0  ;;  %4487 = vmatmul.mubr.bf16.gmra.mrb[88].mxu0 %v4135_v39  ;;  %v4103_v0 = vmax.f32 %v5259_v46, 0.0 }
 0x354   :  { %v5293_v58 = vadd.f32 %v4042_v55, %v7213_v16  ;;  %v5262_v61 = vadd.f32 %v3818_v56, %v7217_v60  ;;  %v4044_v63 = vpop.f32.mrb[63].mxu1  ;;  %4584 = vmatmul.mubr.bf16.gmra.mrb[88].mxu1 %v4137_v8  ;;  %v4105_v2 = vmax.f32 %v5291_v49, 0.0  ;;  %v4104_v6 = vmax.f32 %v5260_v50, 0.0 }
 0x355   :  { %v4107_v1 = vmax.f32 %v5261_v54, 0.0  ;;  %v5294_v40 = vadd.f32 %v4044_v63, %v7221_v62  ;;  %v4106_v17 = vmax.f32 %v5292_v53, 0.0  ;;  %v7290_v62 = vld [vmem:[%s7362_s6] ss:$0 sm:$0xff] }
 0x356   :  { %v4109_v13 = vmax.f32 %v5293_v58, 0.0  ;;  %v4108_v15 = vmax.f32 %v5262_v61, 0.0 }
 0x357   :  { %v4139_v14 = vpack.c.bf16 %v4107_v1, %v4103_v0  ;;  %v4110_v18 = vmax.f32 %v5294_v40, 0.0 }
 0x358   :  { %v4141_v38 = vpack.c.bf16 %v4109_v13, %v4105_v2  ;;  %v4140_v21 = vpack.c.bf16 %v4108_v15, %v4104_v6 }
 0x359   :  { %v4142_v20 = vpack.c.bf16 %v4110_v18, %v4106_v17 }
 0x35a   :  { %4494 = vmatprep.mubr.bf16.mxu0 %v4140_v21 }
 0x35b   :  { %4591 = vmatprep.mubr.bf16.mxu1 %v4142_v20  ;;  %4495 = vmatmul.mubr.bf16.gmra.mrb[92].mxu0 %v4139_v14 }
 0x35c   :  { %4592 = vmatmul.mubr.bf16.gmra.mrb[92].mxu1 %v4141_v38 }
 0x3f6   :  { %v5055_v16 = vpop.f32.mrb[64].mxu0 }
 0x3f7   :  { %v5119_v60 = vpop.f32.mrb[64].mxu1  ;;  %v5056_v22 = vpop.f32.mrb[65].mxu0 }
 0x3f8   :  { %v5057_v23 = vadd.f32 %v5056_v22, %v5055_v16  ;;  %v5120_v24 = vpop.f32.mrb[65].mxu1  ;;  %v5058_v25 = vpop.f32.mrb[66].mxu0 }
 0x3f9   :  { %v5121_v26 = vadd.f32 %v5120_v24, %v5119_v60  ;;  %v5122_v19 = vpop.f32.mrb[66].mxu1  ;;  %v5059_v59 = vpop.f32.mrb[67].mxu0 }
 0x3fa   :  { %v4441_v28 = vadd.f32 %v5057_v23, %v7290_v62  ;;  %v5060_v30 = vadd.f32 %v5059_v59, %v5058_v25  ;;  %v5123_v31 = vpop.f32.mrb[67].mxu1 }
 0x3fb   :  { %v5124_v32 = vadd.f32 %v5123_v31, %v5122_v19 }
 0x3fc   :  { %v4538_v33 = vadd.f32 %v5121_v26, %v4441_v28  ;;  %v4444_v57 = vadd.f32 %v5060_v30, %v7290_v62 }
 0x3fe   :  { %4600 = vst [vmem:[%s7363_s7] sm:$0xff] %v4538_v33  ;;  %v4541_v42 = vadd.f32 %v5124_v32, %v4444_v57  ;;  %v5061_v44 = vpop.f32.mrb[68].mxu0 }
 0x3ff   :  { %v5125_v27 = vpop.f32.mrb[68].mxu1  ;;  %v5062_v29 = vpop.f32.mrb[69].mxu0 }
 0x400   :  { %4601 = vst [vmem:[%s7363_s7 + $0x8] sm:$0xff] %v4541_v42  ;;  %v5063_v34 = vadd.f32 %v5062_v29, %v5061_v44  ;;  %v5126_v9 = vpop.f32.mrb[69].mxu1  ;;  %v5064_v10 = vpop.f32.mrb[70].mxu0 }
 0x401   :  { %v5127_v35 = vadd.f32 %v5126_v9, %v5125_v27  ;;  %v5128_v4 = vpop.f32.mrb[70].mxu1  ;;  %v5065_v36 = vpop.f32.mrb[71].mxu0 }
 0x402   :  { %v4449_v37 = vadd.f32 %v5063_v34, %v7290_v62  ;;  %v5066_v5 = vadd.f32 %v5065_v36, %v5064_v10  ;;  %v5129_v11 = vpop.f32.mrb[71].mxu1 }
 0x403   :  { %v5130_v7 = vadd.f32 %v5129_v11, %v5128_v4 }
 0x404   :  { %v4546_v12 = vadd.f32 %v5127_v35, %v4449_v37  ;;  %v4452_v39 = vadd.f32 %v5066_v5, %v7290_v62 }
 0x406   :  { %4602 = vst [vmem:[%s7363_s7 + $0x10] sm:$0xff] %v4546_v12  ;;  %v4549_v3 = vadd.f32 %v5130_v7, %v4452_v39  ;;  %v5067_v8 = vpop.f32.mrb[72].mxu0 }
 0x407   :  { %v5131_v41 = vpop.f32.mrb[72].mxu1  ;;  %v5068_v43 = vpop.f32.mrb[73].mxu0 }
 0x408   :  { %4603 = vst [vmem:[%s7363_s7 + $0x18] sm:$0xff] %v4549_v3  ;;  %v5069_v45 = vadd.f32 %v5068_v43, %v5067_v8  ;;  %v5132_v46 = vpop.f32.mrb[73].mxu1  ;;  %v5070_v47 = vpop.f32.mrb[74].mxu0 }
 0x409   :  { %v5133_v48 = vadd.f32 %v5132_v46, %v5131_v41  ;;  %v5134_v49 = vpop.f32.mrb[74].mxu1  ;;  %v5071_v50 = vpop.f32.mrb[75].mxu0 }
 0x40a   :  { %v4457_v51 = vadd.f32 %v5069_v45, %v7290_v62  ;;  %v5072_v52 = vadd.f32 %v5071_v50, %v5070_v47  ;;  %v5135_v53 = vpop.f32.mrb[75].mxu1 }
 0x40b   :  { %v5136_v54 = vadd.f32 %v5135_v53, %v5134_v49 }
 0x40c   :  { %v4554_v55 = vadd.f32 %v5133_v48, %v4457_v51  ;;  %v4460_v56 = vadd.f32 %v5072_v52, %v7290_v62 }
 0x40e   :  { %4604 = vst [vmem:[%s7363_s7 + $0x20] sm:$0xff] %v4554_v55  ;;  %v4557_v58 = vadd.f32 %v5136_v54, %v4460_v56  ;;  %v5073_v61 = vpop.f32.mrb[76].mxu0 }
 0x40f   :  { %v5137_v63 = vpop.f32.mrb[76].mxu1  ;;  %v5074_v0 = vpop.f32.mrb[77].mxu0 }
 0x410   :  { %4605 = vst [vmem:[%s7363_s7 + $0x28] sm:$0xff] %v4557_v58  ;;  %v5075_v1 = vadd.f32 %v5074_v0, %v5073_v61  ;;  %v5138_v40 = vpop.f32.mrb[77].mxu1  ;;  %v5076_v2 = vpop.f32.mrb[78].mxu0 }
 0x411   :  { %v5139_v6 = vadd.f32 %v5138_v40, %v5137_v63  ;;  %v5140_v13 = vpop.f32.mrb[78].mxu1  ;;  %v5077_v15 = vpop.f32.mrb[79].mxu0 }
 0x412   :  { %v4465_v17 = vadd.f32 %v5075_v1, %v7290_v62  ;;  %v5078_v14 = vadd.f32 %v5077_v15, %v5076_v2  ;;  %v5141_v18 = vpop.f32.mrb[79].mxu1 }
 0x413   :  { %v5142_v38 = vadd.f32 %v5141_v18, %v5140_v13 }
 0x414   :  { %v4562_v21 = vadd.f32 %v5139_v6, %v4465_v17  ;;  %v4468_v20 = vadd.f32 %v5078_v14, %v7290_v62 }
 0x416   :  { %4606 = vst [vmem:[%s7363_s7 + $0x30] sm:$0xff] %v4562_v21  ;;  %v4565_v16 = vadd.f32 %v5142_v38, %v4468_v20  ;;  %v5079_v60 = vpop.f32.mrb[80].mxu0 }
 0x417   :  { %v5143_v22 = vpop.f32.mrb[80].mxu1  ;;  %v5080_v23 = vpop.f32.mrb[81].mxu0 }
 0x418   :  { %4607 = vst [vmem:[%s7363_s7 + $0x38] sm:$0xff] %v4565_v16  ;;  %v5081_v24 = vadd.f32 %v5080_v23, %v5079_v60  ;;  %v5144_v25 = vpop.f32.mrb[81].mxu1  ;;  %v5082_v26 = vpop.f32.mrb[82].mxu0 }
 0x419   :  { %v5145_v19 = vadd.f32 %v5144_v25, %v5143_v22  ;;  %v5146_v59 = vpop.f32.mrb[82].mxu1  ;;  %v5083_v28 = vpop.f32.mrb[83].mxu0 }
 0x41a   :  { %v4473_v30 = vadd.f32 %v5081_v24, %v7290_v62  ;;  %v5084_v31 = vadd.f32 %v5083_v28, %v5082_v26  ;;  %v5147_v32 = vpop.f32.mrb[83].mxu1 }
 0x41b   :  { %v5148_v33 = vadd.f32 %v5147_v32, %v5146_v59 }
 0x41c   :  { %v4570_v57 = vadd.f32 %v5145_v19, %v4473_v30  ;;  %v4476_v42 = vadd.f32 %v5084_v31, %v7290_v62 }
 0x41e   :  { %4608 = vst [vmem:[%s7363_s7 + $0x40] sm:$0xff] %v4570_v57  ;;  %v4573_v44 = vadd.f32 %v5148_v33, %v4476_v42  ;;  %v5085_v27 = vpop.f32.mrb[84].mxu0 }
 0x41f   :  { %v5149_v29 = vpop.f32.mrb[84].mxu1  ;;  %v5086_v34 = vpop.f32.mrb[85].mxu0 }
 0x420   :  { %4609 = vst [vmem:[%s7363_s7 + $0x48] sm:$0xff] %v4573_v44  ;;  %v5087_v9 = vadd.f32 %v5086_v34, %v5085_v27  ;;  %v5150_v10 = vpop.f32.mrb[85].mxu1  ;;  %v5088_v35 = vpop.f32.mrb[86].mxu0 }
 0x421   :  { %v5151_v4 = vadd.f32 %v5150_v10, %v5149_v29  ;;  %v5152_v36 = vpop.f32.mrb[86].mxu1  ;;  %v5089_v37 = vpop.f32.mrb[87].mxu0 }
 0x422   :  { %v4481_v5 = vadd.f32 %v5087_v9, %v7290_v62  ;;  %v5090_v11 = vadd.f32 %v5089_v37, %v5088_v35  ;;  %v5153_v7 = vpop.f32.mrb[87].mxu1 }
 0x423   :  { %v5154_v12 = vadd.f32 %v5153_v7, %v5152_v36 }
 0x424   :  { %v4578_v39 = vadd.f32 %v5151_v4, %v4481_v5  ;;  %v4484_v3 = vadd.f32 %v5090_v11, %v7290_v62 }
 0x426   :  { %4610 = vst [vmem:[%s7363_s7 + $0x50] sm:$0xff] %v4578_v39  ;;  %v4581_v8 = vadd.f32 %v5154_v12, %v4484_v3  ;;  %v5091_v41 = vpop.f32.mrb[88].mxu0 }
 0x427   :  { %v5155_v43 = vpop.f32.mrb[88].mxu1  ;;  %v5092_v45 = vpop.f32.mrb[89].mxu0 }
 0x428   :  { %4611 = vst [vmem:[%s7363_s7 + $0x58] sm:$0xff] %v4581_v8  ;;  %v5093_v46 = vadd.f32 %v5092_v45, %v5091_v41  ;;  %v5156_v47 = vpop.f32.mrb[89].mxu1  ;;  %v5094_v48 = vpop.f32.mrb[90].mxu0 }
 0x429   :  { %v5157_v49 = vadd.f32 %v5156_v47, %v5155_v43  ;;  %v5158_v50 = vpop.f32.mrb[90].mxu1  ;;  %v5095_v51 = vpop.f32.mrb[91].mxu0 }
 0x42a   :  { %v4489_v52 = vadd.f32 %v5093_v46, %v7290_v62  ;;  %v5096_v53 = vadd.f32 %v5095_v51, %v5094_v48  ;;  %v5159_v54 = vpop.f32.mrb[91].mxu1 }
 0x42b   :  { %v5160_v55 = vadd.f32 %v5159_v54, %v5158_v50 }
 0x42c   :  { %v4586_v56 = vadd.f32 %v5157_v49, %v4489_v52  ;;  %v4492_v58 = vadd.f32 %v5096_v53, %v7290_v62 }
 0x42e   :  { %4612 = vst [vmem:[%s7363_s7 + $0x60] sm:$0xff] %v4586_v56  ;;  %v4589_v61 = vadd.f32 %v5160_v55, %v4492_v58  ;;  %v5097_v63 = vpop.f32.mrb[92].mxu0 }
 0x42f   :  { %v5161_v0 = vpop.f32.mrb[92].mxu1  ;;  %v5098_v1 = vpop.f32.mrb[93].mxu0 }
 0x430   :  { %4613 = vst [vmem:[%s7363_s7 + $0x68] sm:$0xff] %v4589_v61  ;;  %v5099_v40 = vadd.f32 %v5098_v1, %v5097_v63  ;;  %v5162_v2 = vpop.f32.mrb[93].mxu1  ;;  %v5100_v6 = vpop.f32.mrb[94].mxu0 }
 0x431   :  { %v5163_v13 = vadd.f32 %v5162_v2, %v5161_v0  ;;  %v5164_v15 = vpop.f32.mrb[94].mxu1  ;;  %v5101_v17 = vpop.f32.mrb[95].mxu0 }
 0x432   :  { %v4497_v14 = vadd.f32 %v5099_v40, %v7290_v62  ;;  %v5102_v18 = vadd.f32 %v5101_v17, %v5100_v6  ;;  %v5165_v38 = vpop.f32.mrb[95].mxu1 }
 0x433   :  { %v5166_v21 = vadd.f32 %v5165_v38, %v5164_v15 }
 0x434   :  { %v4594_v20 = vadd.f32 %v5163_v13, %v4497_v14  ;;  %v4500_v16 = vadd.f32 %v5102_v18, %v7290_v62 }
 0x436   :  { %4614 = vst [vmem:[%s7363_s7 + $0x70] sm:$0xff] %v4594_v20  ;;  %v4597_v60 = vadd.f32 %v5166_v21, %v4500_v16 }
 0x438   :  { %4615 = vst [vmem:[%s7363_s7 + $0x78] sm:$0xff] %v4597_v60 }
 0x439   :  { %4620 = vsyncpa [#allocation3], 1 }
 0x43a   :  { %4621 = vsyncpa [#allocation5], 1 }

</bundles_post_ra>
